<compile_context>
chip_gen: v5e
topology: v5e:2x2
jax: 0.10.0
libtpu: 0.0.40
codegen_flags: <defaults>
</compile_context>

<pallas_src>
import functools

import jax
import jax.numpy as jnp
from jax.experimental import pallas as pl
from jax.experimental.pallas import tpu as pltpu

# ---- small, module-consistent sizes ----
B = 2       # batch
L = 8       # sequence length (trajectory length)
V = 36      # views per step (feature is (B, L, 36, feature_size) in the PyTorch code)
FEAT = 64   # feature_size
HID = 32    # hidden_size (num_directions = 1)

_VMEM = pl.BlockSpec(memory_space=pltpu.MemorySpace.VMEM)
_HBM = pl.BlockSpec(memory_space=pl.ANY)


# ----------------------------------------------------------------------------
# Fused kernel: lstm -> SoftDotAttention -> post_lstm
# ----------------------------------------------------------------------------
def _speaker_encoder_kernel(Bk, Lk,
                            x_ref, feat_hbm_ref,
                            w_ih1_ref, w_hh1_ref, b1_ref,
                            w_fused_ref, w_out_c_ref,
                            w_ih2_ref, w_hh2_ref, b2_ref,
                            out_ref, feat_vmem, feat_sem):
    Nk, Fk = x_ref.shape
    Hk = w_hh1_ref.shape[0]

    # Start the feature HBM->VMEM copy now; it overlaps the LSTM-1 serial recurrence.
    feat_cp = pltpu.make_async_copy(feat_hbm_ref, feat_vmem, feat_sem)
    feat_cp.start()

    def act(gates):
        # Packed gate order (pack_params): [i | f | o | g] -> one sigmoid + one tanh.
        sig = jax.nn.sigmoid(gates[:, :3 * Hk])
        g_g = jnp.tanh(gates[:, 3 * Hk:])
        return sig[:, :Hk], sig[:, Hk:2 * Hk], sig[:, 2 * Hk:3 * Hk], g_g

    def run_lstm(gates_x, w_hh_ref):
        # gates_x: (N, 4H) -> (B, L, 4H); L == 8 so this is a tile-aligned leading-dim split.
        gates_blg = gates_x.reshape(Bk, Lk, 4 * Hk)
        h = jnp.zeros((Bk, Hk), jnp.float32)
        c = jnp.zeros((Bk, Hk), jnp.float32)
        hs = []
        for t in range(Lk):  # static unroll; h/c stay in registers, no per-step stores
            gates = gates_blg[:, t, :] + jnp.dot(h, w_hh_ref[...],
                                                 preferred_element_type=jnp.float32)
            i_g, f_g, o_g, g_g = act(gates)
            c = f_g * c + i_g * g_g
            h = o_g * jnp.tanh(c)
            hs.append(h)
        # Single stack at the end -> (B, L, H) -> (N, H); one dense value, one relayout.
        return jnp.stack(hs, axis=1).reshape(Nk, Hk)

    # ---------------- LSTM 1 (self.lstm) ----------------
    # Input projection hoisted out of the recurrence: one (N, F) x (F, 4H) matmul, bias folded.
    gates_x1 = (jnp.dot(x_ref[...], w_ih1_ref[...], preferred_element_type=jnp.float32)
                + b1_ref[...])
    ctx2d = run_lstm(gates_x1, w_hh1_ref)                                  # (N, H)

    # ---------------- SoftDotAttention over all N = B*L query positions ----------------
    # Fused (N, H) x (H, F+H): lanes [0:F] = linear_in(h), lanes [F:] = h-half of linear_out.
    fused = jnp.dot(ctx2d, w_fused_ref[...], preferred_element_type=jnp.float32)
    tgt = fused[:, :Fk]                                                    # (N, F)
    h_term = fused[:, Fk:]                                                 # (N, H)

    feat_cp.wait()
    feat3 = feat_vmem[...]                                                 # (N, V, F)

    scores = jnp.sum(feat3 * tgt[:, None, :], axis=-1)                     # (N, V) lane-dense
    smax = jnp.max(scores, axis=-1, keepdims=True)                         # (N, 1)
    e = jnp.exp(scores - smax)                                             # (N, V)
    denom = jnp.sum(e, axis=-1, keepdims=True)                             # (N, 1)
    weighted = jnp.sum(feat3 * e[:, :, None], axis=1)                      # (N, F) unnormalized
    weighted = weighted * pl.reciprocal(denom, approx=True)                # normalize once (EUP)

    h_tilde = jnp.tanh(
        jnp.dot(weighted, w_out_c_ref[...], preferred_element_type=jnp.float32)
        + h_term)                                                          # (N, H)

    # ---------------- LSTM 2 (self.post_lstm) ----------------
    gates_x2 = (jnp.dot(h_tilde, w_ih2_ref[...], preferred_element_type=jnp.float32)
                + b2_ref[...])
    out_ref[...] = run_lstm(gates_x2, w_hh2_ref)                           # ONE dense store


def speaker_encoder_forward(packed, action_embeds, feature):
    """action_embeds: (B, L, FEAT); feature: (B, L, V, FEAT) -> (B, L, HID)."""
    Bx, Lx, Fx = action_embeds.shape
    Vx = feature.shape[2]
    Hx = packed["w_hh1"].shape[0]
    Nx = Bx * Lx

    # Wrapper-side layout plumbing (free in XLA): flatten the (B, L) leading dims.
    x_flat = action_embeds.reshape(Nx, Fx)
    feat_flat = feature.reshape(Nx, Vx, Fx)

    out2d = pl.pallas_call(
        functools.partial(_speaker_encoder_kernel, Bx, Lx),
        out_shape=jax.ShapeDtypeStruct((Nx, Hx), jnp.float32),
        in_specs=[_VMEM,          # x_flat
                  _HBM,           # feature stays in HBM; DMA'd manually inside the kernel
                  _VMEM, _VMEM, _VMEM,          # lstm1: w_ih1, w_hh1, b1
                  _VMEM, _VMEM,                 # attention: w_fused, w_out_c
                  _VMEM, _VMEM, _VMEM],         # lstm2: w_ih2, w_hh2, b2
        out_specs=_VMEM,
        scratch_shapes=[pltpu.VMEM((Nx, Vx, Fx), jnp.float32),   # feature landing buffer
                        pltpu.SemaphoreType.DMA(())],
    )(x_flat, feat_flat,
      packed["w_ih1"], packed["w_hh1"], packed["b1"],
      packed["w_fused"], packed["w_out_c"],
      packed["w_ih2"], packed["w_hh2"], packed["b2"])
    return out2d.reshape(Bx, Lx, Hx)


# ----------------------------------------------------------------------------
# Parameters: torch layout in init_params, kernel layout via pack_params (done once)
# ----------------------------------------------------------------------------
def init_params(key):
    ks = jax.random.split(key, 10)
    s = 0.1
    return {
        # self.lstm : input FEAT -> HID         (torch gate order i, f, g, o)
        "w_ih1": jax.random.normal(ks[0], (4 * HID, FEAT), jnp.float32) * s,
        "w_hh1": jax.random.normal(ks[1], (4 * HID, HID), jnp.float32) * s,
        "b_ih1": jax.random.normal(ks[2], (4 * HID,), jnp.float32) * s,
        "b_hh1": jax.random.normal(ks[3], (4 * HID,), jnp.float32) * s,
        # SoftDotAttention(query_dim=HID, ctx_dim=FEAT)
        "w_in": jax.random.normal(ks[4], (FEAT, HID), jnp.float32) * s,        # linear_in.weight
        "w_out": jax.random.normal(ks[5], (HID, HID + FEAT), jnp.float32) * s, # linear_out.weight
        # self.post_lstm : input HID -> HID
        "w_ih2": jax.random.normal(ks[6], (4 * HID, HID), jnp.float32) * s,
        "w_hh2": jax.random.normal(ks[7], (4 * HID, HID), jnp.float32) * s,
        "b_ih2": jax.random.normal(ks[8], (4 * HID,), jnp.float32) * s,
        "b_hh2": jax.random.normal(ks[9], (4 * HID,), jnp.float32) * s,
    }


def pack_params(p):
    """Transposes, bias fusion, gate reorder (i,f,g,o -> i,f,o,g) and weight fusion, done once."""
    H_ = p["w_hh1"].shape[1]
    F_ = p["w_ih1"].shape[1]

    def reorder_cols(w2d):   # (in, 4H) columns in torch order [i|f|g|o] -> [i|f|o|g]
        return jnp.concatenate([w2d[:, :2 * H_], w2d[:, 3 * H_:], w2d[:, 2 * H_:3 * H_]], axis=1)

    def reorder_bias(b1d):
        return jnp.concatenate([b1d[:2 * H_], b1d[3 * H_:], b1d[2 * H_:3 * H_]])

    w_in_t = p["w_in"].T                 # (H, F)
    w_out_c = p["w_out"][:, :F_].T       # (F, H)  -> multiplies weighted_context
    w_out_h = p["w_out"][:, F_:].T       # (H, H)  -> multiplies h
    return {
        "w_ih1": reorder_cols(p["w_ih1"].T),                       # (F, 4H)
        "w_hh1": reorder_cols(p["w_hh1"].T),                       # (H, 4H)
        "b1": reorder_bias(p["b_ih1"] + p["b_hh1"])[None, :],      # (1, 4H)
        "w_fused": jnp.concatenate([w_in_t, w_out_h], axis=1),     # (H, F+H)
        "w_out_c": w_out_c,                                        # (F, H)
        "w_ih2": reorder_cols(p["w_ih2"].T),                       # (H, 4H)
        "w_hh2": reorder_cols(p["w_hh2"].T),                       # (H, 4H)
        "b2": reorder_bias(p["b_ih2"] + p["b_hh2"])[None, :],      # (1, 4H)
    }


# ----------------------------------------------------------------------------
# Pure-JAX reference (torch semantics) for a correctness sanity check
# ----------------------------------------------------------------------------
def _lstm_ref(x, w_ih, w_hh, b_ih, b_hh):
    Hx = w_hh.shape[1]

    def step(carry, x_t):
        h, c = carry
        gates = x_t @ w_ih.T + h @ w_hh.T + b_ih + b_hh
        i = jax.nn.sigmoid(gates[:, :Hx])
        f = jax.nn.sigmoid(gates[:, Hx:2 * Hx])
        g = jnp.tanh(gates[:, 2 * Hx:3 * Hx])
        o = jax.nn.sigmoid(gates[:, 3 * Hx:])
        c_new = f * c + i * g
        h_new = o * jnp.tanh(c_new)
        return (h_new, c_new), h_new

    h0 = jnp.zeros((x.shape[0], Hx), jnp.float32)
    (_, _), ys = jax.lax.scan(step, (h0, h0), jnp.swapaxes(x, 0, 1))
    return jnp.swapaxes(ys, 0, 1)


def reference_forward(params, action_embeds, feature):
    Bx, Lx, Fx = action_embeds.shape
    ctx = _lstm_ref(action_embeds, params["w_ih1"], params["w_hh1"],
                    params["b_ih1"], params["b_hh1"])                   # (B, L, H)
    h2d = ctx.reshape(Bx * Lx, HID)
    feat2 = feature.reshape(Bx * Lx, feature.shape[2], Fx)
    target = h2d @ params["w_in"].T                                     # (N, F)
    logits = jnp.einsum("nvf,nf->nv", feat2, target)
    attn = jax.nn.softmax(logits, axis=-1)
    weighted = jnp.einsum("nv,nvf->nf", attn, feat2)
    h_tilde = jnp.tanh(jnp.concatenate([weighted, h2d], axis=1) @ params["w_out"].T)
    x2 = h_tilde.reshape(Bx, Lx, HID)
    out = _lstm_ref(x2, params["w_ih2"], params["w_hh2"],
                    params["b_ih2"], params["b_hh2"])
    return out


if __name__ == "__main__":
    key = jax.random.PRNGKey(0)
    pk, dk = jax.random.split(key)
    params = init_params(pk)
    packed = pack_params(params)

    k1, k2 = jax.random.split(dk)
    action_embeds = jax.random.normal(k1, (B, L, FEAT), jnp.float32)    # (B, L, feature_size)
    feature = jax.random.normal(k2, (B, L, V, FEAT), jnp.float32)       # (B, L, 36, feature_size)
    lengths = jnp.full((B,), L, jnp.int32)                              # unused by the forward

    out = speaker_encoder_forward(packed, action_embeds, feature)
    jax.block_until_ready(out)

    ref = reference_forward(params, action_embeds, feature)
    assert out.shape == (B, L, HID)
    # approx reciprocal in the softmax normalization -> slightly looser tolerance than pure f32
    assert jnp.allclose(out, ref, atol=5e-3, rtol=5e-3), float(jnp.max(jnp.abs(out - ref)))

    print("KERNEL_OK")
</pallas_src>

<mosaic_0001>
module attributes {stable_mosaic.version = 11 : i64} {
  func.func @_speaker_encoder_kernel(%arg0: memref<16x64xf32, #tpu.memory_space<vmem>>, %arg1: memref<16x36x64xf32, #tpu.memory_space<any>>, %arg2: memref<64x128xf32, #tpu.memory_space<vmem>>, %arg3: memref<32x128xf32, #tpu.memory_space<vmem>>, %arg4: memref<1x128xf32, #tpu.memory_space<vmem>>, %arg5: memref<32x96xf32, #tpu.memory_space<vmem>>, %arg6: memref<64x32xf32, #tpu.memory_space<vmem>>, %arg7: memref<32x128xf32, #tpu.memory_space<vmem>>, %arg8: memref<32x128xf32, #tpu.memory_space<vmem>>, %arg9: memref<1x128xf32, #tpu.memory_space<vmem>>, %arg10: memref<16x32xf32, #tpu.memory_space<vmem>>, %arg11: memref<16x36x64xf32, #tpu.memory_space<vmem>>, %arg12: memref<!tpu.dma_semaphore, #tpu.memory_space<semaphore_mem>>) attributes {dimension_semantics = [], scalar_prefetch = 0 : i64, scratch_operands = 2 : i64, tpu.core_type = #tpu.core_type<tc>} {
    tpu.enqueue_dma source(%arg1 : memref<16x36x64xf32, #tpu.memory_space<any>>) target(%arg11 : memref<16x36x64xf32, #tpu.memory_space<vmem>>) target_semaphore(%arg12 : memref<!tpu.dma_semaphore, #tpu.memory_space<semaphore_mem>>)
    %c0 = arith.constant 0 : index
    %c0_0 = arith.constant 0 : index
    %0 = vector.load %arg0[%c0, %c0_0] : memref<16x64xf32, #tpu.memory_space<vmem>>, vector<16x64xf32>
    %c0_1 = arith.constant 0 : index
    %c0_2 = arith.constant 0 : index
    %1 = vector.load %arg2[%c0_1, %c0_2] : memref<64x128xf32, #tpu.memory_space<vmem>>, vector<64x128xf32>
    %cst = arith.constant dense<0.000000e+00> : vector<16x128xf32>
    %2 = tpu.matmul %0, %1, %cst {dimension_numbers = #tpu.dot_dimension_numbers<[1], [0], [0], [1], [0, 0, 1, 1], [], []>} : vector<16x64xf32>, vector<64x128xf32>, vector<16x128xf32> -> vector<16x128xf32>
    %c0_3 = arith.constant 0 : index
    %c0_4 = arith.constant 0 : index
    %3 = vector.load %arg4[%c0_3, %c0_4] : memref<1x128xf32, #tpu.memory_space<vmem>>, vector<1x128xf32>
    %4 = vector.broadcast %3 : vector<1x128xf32> to vector<16x128xf32>
    %5 = arith.addf %2, %4 : vector<16x128xf32>
    %6 = vector.shape_cast %5 : vector<16x128xf32> to vector<2x8x128xf32>
    %cst_5 = arith.constant 0.000000e+00 : f32
    %7 = vector.broadcast %cst_5 : f32 to vector<2x32xf32>
    %cst_6 = arith.constant 0.000000e+00 : f32
    %8 = vector.broadcast %cst_6 : f32 to vector<2x32xf32>
    %9 = vector.extract_strided_slice %6 {offsets = [0, 0, 0], sizes = [2, 1, 128], strides = [1, 1, 1]} : vector<2x8x128xf32> to vector<2x1x128xf32>
    %10 = vector.shape_cast %9 : vector<2x1x128xf32> to vector<2x128xf32>
    %c0_7 = arith.constant 0 : index
    %c0_8 = arith.constant 0 : index
    %11 = vector.load %arg3[%c0_7, %c0_8] : memref<32x128xf32, #tpu.memory_space<vmem>>, vector<32x128xf32>
    %cst_9 = arith.constant dense<0.000000e+00> : vector<2x128xf32>
    %12 = tpu.matmul %7, %11, %cst_9 {dimension_numbers = #tpu.dot_dimension_numbers<[1], [0], [0], [1], [0, 0, 1, 1], [], []>} : vector<2x32xf32>, vector<32x128xf32>, vector<2x128xf32> -> vector<2x128xf32>
    %13 = arith.addf %10, %12 : vector<2x128xf32>
    %14 = vector.extract_strided_slice %13 {offsets = [0, 0], sizes = [2, 96], strides = [1, 1]} : vector<2x128xf32> to vector<2x96xf32>
    %15 = arith.negf %14 : vector<2x96xf32>
    %16 = math.exp %15 : vector<2x96xf32>
    %cst_10 = arith.constant 1.000000e+00 : f32
    %17 = vector.broadcast %cst_10 : f32 to vector<2x96xf32>
    %18 = arith.addf %17, %16 : vector<2x96xf32>
    %19 = arith.divf %17, %18 : vector<2x96xf32>
    %20 = vector.extract_strided_slice %13 {offsets = [0, 96], sizes = [2, 32], strides = [1, 1]} : vector<2x128xf32> to vector<2x32xf32>
    %21 = math.tanh %20 : vector<2x32xf32>
    %22 = vector.extract_strided_slice %19 {offsets = [0, 0], sizes = [2, 32], strides = [1, 1]} : vector<2x96xf32> to vector<2x32xf32>
    %23 = vector.extract_strided_slice %19 {offsets = [0, 32], sizes = [2, 32], strides = [1, 1]} : vector<2x96xf32> to vector<2x32xf32>
    %24 = vector.extract_strided_slice %19 {offsets = [0, 64], sizes = [2, 32], strides = [1, 1]} : vector<2x96xf32> to vector<2x32xf32>
    %25 = arith.mulf %23, %8 : vector<2x32xf32>
    %26 = arith.mulf %22, %21 : vector<2x32xf32>
    %27 = arith.addf %25, %26 : vector<2x32xf32>
    %28 = math.tanh %27 : vector<2x32xf32>
    %29 = arith.mulf %24, %28 : vector<2x32xf32>
    %30 = vector.extract_strided_slice %6 {offsets = [0, 1, 0], sizes = [2, 1, 128], strides = [1, 1, 1]} : vector<2x8x128xf32> to vector<2x1x128xf32>
    %31 = vector.shape_cast %30 : vector<2x1x128xf32> to vector<2x128xf32>
    %c0_11 = arith.constant 0 : index
    %c0_12 = arith.constant 0 : index
    %32 = vector.load %arg3[%c0_11, %c0_12] : memref<32x128xf32, #tpu.memory_space<vmem>>, vector<32x128xf32>
    %cst_13 = arith.constant dense<0.000000e+00> : vector<2x128xf32>
    %33 = tpu.matmul %29, %32, %cst_13 {dimension_numbers = #tpu.dot_dimension_numbers<[1], [0], [0], [1], [0, 0, 1, 1], [], []>} : vector<2x32xf32>, vector<32x128xf32>, vector<2x128xf32> -> vector<2x128xf32>
    %34 = arith.addf %31, %33 : vector<2x128xf32>
    %35 = vector.extract_strided_slice %34 {offsets = [0, 0], sizes = [2, 96], strides = [1, 1]} : vector<2x128xf32> to vector<2x96xf32>
    %36 = arith.negf %35 : vector<2x96xf32>
    %37 = math.exp %36 : vector<2x96xf32>
    %cst_14 = arith.constant 1.000000e+00 : f32
    %38 = vector.broadcast %cst_14 : f32 to vector<2x96xf32>
    %39 = arith.addf %38, %37 : vector<2x96xf32>
    %40 = arith.divf %38, %39 : vector<2x96xf32>
    %41 = vector.extract_strided_slice %34 {offsets = [0, 96], sizes = [2, 32], strides = [1, 1]} : vector<2x128xf32> to vector<2x32xf32>
    %42 = math.tanh %41 : vector<2x32xf32>
    %43 = vector.extract_strided_slice %40 {offsets = [0, 0], sizes = [2, 32], strides = [1, 1]} : vector<2x96xf32> to vector<2x32xf32>
    %44 = vector.extract_strided_slice %40 {offsets = [0, 32], sizes = [2, 32], strides = [1, 1]} : vector<2x96xf32> to vector<2x32xf32>
    %45 = vector.extract_strided_slice %40 {offsets = [0, 64], sizes = [2, 32], strides = [1, 1]} : vector<2x96xf32> to vector<2x32xf32>
    %46 = arith.mulf %44, %27 : vector<2x32xf32>
    %47 = arith.mulf %43, %42 : vector<2x32xf32>
    %48 = arith.addf %46, %47 : vector<2x32xf32>
    %49 = math.tanh %48 : vector<2x32xf32>
    %50 = arith.mulf %45, %49 : vector<2x32xf32>
    %51 = vector.extract_strided_slice %6 {offsets = [0, 2, 0], sizes = [2, 1, 128], strides = [1, 1, 1]} : vector<2x8x128xf32> to vector<2x1x128xf32>
    %52 = vector.shape_cast %51 : vector<2x1x128xf32> to vector<2x128xf32>
    %c0_15 = arith.constant 0 : index
    %c0_16 = arith.constant 0 : index
    %53 = vector.load %arg3[%c0_15, %c0_16] : memref<32x128xf32, #tpu.memory_space<vmem>>, vector<32x128xf32>
    %cst_17 = arith.constant dense<0.000000e+00> : vector<2x128xf32>
    %54 = tpu.matmul %50, %53, %cst_17 {dimension_numbers = #tpu.dot_dimension_numbers<[1], [0], [0], [1], [0, 0, 1, 1], [], []>} : vector<2x32xf32>, vector<32x128xf32>, vector<2x128xf32> -> vector<2x128xf32>
    %55 = arith.addf %52, %54 : vector<2x128xf32>
    %56 = vector.extract_strided_slice %55 {offsets = [0, 0], sizes = [2, 96], strides = [1, 1]} : vector<2x128xf32> to vector<2x96xf32>
    %57 = arith.negf %56 : vector<2x96xf32>
    %58 = math.exp %57 : vector<2x96xf32>
    %cst_18 = arith.constant 1.000000e+00 : f32
    %59 = vector.broadcast %cst_18 : f32 to vector<2x96xf32>
    %60 = arith.addf %59, %58 : vector<2x96xf32>
    %61 = arith.divf %59, %60 : vector<2x96xf32>
    %62 = vector.extract_strided_slice %55 {offsets = [0, 96], sizes = [2, 32], strides = [1, 1]} : vector<2x128xf32> to vector<2x32xf32>
    %63 = math.tanh %62 : vector<2x32xf32>
    %64 = vector.extract_strided_slice %61 {offsets = [0, 0], sizes = [2, 32], strides = [1, 1]} : vector<2x96xf32> to vector<2x32xf32>
    %65 = vector.extract_strided_slice %61 {offsets = [0, 32], sizes = [2, 32], strides = [1, 1]} : vector<2x96xf32> to vector<2x32xf32>
    %66 = vector.extract_strided_slice %61 {offsets = [0, 64], sizes = [2, 32], strides = [1, 1]} : vector<2x96xf32> to vector<2x32xf32>
    %67 = arith.mulf %65, %48 : vector<2x32xf32>
    %68 = arith.mulf %64, %63 : vector<2x32xf32>
    %69 = arith.addf %67, %68 : vector<2x32xf32>
    %70 = math.tanh %69 : vector<2x32xf32>
    %71 = arith.mulf %66, %70 : vector<2x32xf32>
    %72 = vector.extract_strided_slice %6 {offsets = [0, 3, 0], sizes = [2, 1, 128], strides = [1, 1, 1]} : vector<2x8x128xf32> to vector<2x1x128xf32>
    %73 = vector.shape_cast %72 : vector<2x1x128xf32> to vector<2x128xf32>
    %c0_19 = arith.constant 0 : index
    %c0_20 = arith.constant 0 : index
    %74 = vector.load %arg3[%c0_19, %c0_20] : memref<32x128xf32, #tpu.memory_space<vmem>>, vector<32x128xf32>
    %cst_21 = arith.constant dense<0.000000e+00> : vector<2x128xf32>
    %75 = tpu.matmul %71, %74, %cst_21 {dimension_numbers = #tpu.dot_dimension_numbers<[1], [0], [0], [1], [0, 0, 1, 1], [], []>} : vector<2x32xf32>, vector<32x128xf32>, vector<2x128xf32> -> vector<2x128xf32>
    %76 = arith.addf %73, %75 : vector<2x128xf32>
    %77 = vector.extract_strided_slice %76 {offsets = [0, 0], sizes = [2, 96], strides = [1, 1]} : vector<2x128xf32> to vector<2x96xf32>
    %78 = arith.negf %77 : vector<2x96xf32>
    %79 = math.exp %78 : vector<2x96xf32>
    %cst_22 = arith.constant 1.000000e+00 : f32
    %80 = vector.broadcast %cst_22 : f32 to vector<2x96xf32>
    %81 = arith.addf %80, %79 : vector<2x96xf32>
    %82 = arith.divf %80, %81 : vector<2x96xf32>
    %83 = vector.extract_strided_slice %76 {offsets = [0, 96], sizes = [2, 32], strides = [1, 1]} : vector<2x128xf32> to vector<2x32xf32>
    %84 = math.tanh %83 : vector<2x32xf32>
    %85 = vector.extract_strided_slice %82 {offsets = [0, 0], sizes = [2, 32], strides = [1, 1]} : vector<2x96xf32> to vector<2x32xf32>
    %86 = vector.extract_strided_slice %82 {offsets = [0, 32], sizes = [2, 32], strides = [1, 1]} : vector<2x96xf32> to vector<2x32xf32>
    %87 = vector.extract_strided_slice %82 {offsets = [0, 64], sizes = [2, 32], strides = [1, 1]} : vector<2x96xf32> to vector<2x32xf32>
    %88 = arith.mulf %86, %69 : vector<2x32xf32>
    %89 = arith.mulf %85, %84 : vector<2x32xf32>
    %90 = arith.addf %88, %89 : vector<2x32xf32>
    %91 = math.tanh %90 : vector<2x32xf32>
    %92 = arith.mulf %87, %91 : vector<2x32xf32>
    %93 = vector.extract_strided_slice %6 {offsets = [0, 4, 0], sizes = [2, 1, 128], strides = [1, 1, 1]} : vector<2x8x128xf32> to vector<2x1x128xf32>
    %94 = vector.shape_cast %93 : vector<2x1x128xf32> to vector<2x128xf32>
    %c0_23 = arith.constant 0 : index
    %c0_24 = arith.constant 0 : index
    %95 = vector.load %arg3[%c0_23, %c0_24] : memref<32x128xf32, #tpu.memory_space<vmem>>, vector<32x128xf32>
    %cst_25 = arith.constant dense<0.000000e+00> : vector<2x128xf32>
    %96 = tpu.matmul %92, %95, %cst_25 {dimension_numbers = #tpu.dot_dimension_numbers<[1], [0], [0], [1], [0, 0, 1, 1], [], []>} : vector<2x32xf32>, vector<32x128xf32>, vector<2x128xf32> -> vector<2x128xf32>
    %97 = arith.addf %94, %96 : vector<2x128xf32>
    %98 = vector.extract_strided_slice %97 {offsets = [0, 0], sizes = [2, 96], strides = [1, 1]} : vector<2x128xf32> to vector<2x96xf32>
    %99 = arith.negf %98 : vector<2x96xf32>
    %100 = math.exp %99 : vector<2x96xf32>
    %cst_26 = arith.constant 1.000000e+00 : f32
    %101 = vector.broadcast %cst_26 : f32 to vector<2x96xf32>
    %102 = arith.addf %101, %100 : vector<2x96xf32>
    %103 = arith.divf %101, %102 : vector<2x96xf32>
    %104 = vector.extract_strided_slice %97 {offsets = [0, 96], sizes = [2, 32], strides = [1, 1]} : vector<2x128xf32> to vector<2x32xf32>
    %105 = math.tanh %104 : vector<2x32xf32>
    %106 = vector.extract_strided_slice %103 {offsets = [0, 0], sizes = [2, 32], strides = [1, 1]} : vector<2x96xf32> to vector<2x32xf32>
    %107 = vector.extract_strided_slice %103 {offsets = [0, 32], sizes = [2, 32], strides = [1, 1]} : vector<2x96xf32> to vector<2x32xf32>
    %108 = vector.extract_strided_slice %103 {offsets = [0, 64], sizes = [2, 32], strides = [1, 1]} : vector<2x96xf32> to vector<2x32xf32>
    %109 = arith.mulf %107, %90 : vector<2x32xf32>
    %110 = arith.mulf %106, %105 : vector<2x32xf32>
    %111 = arith.addf %109, %110 : vector<2x32xf32>
    %112 = math.tanh %111 : vector<2x32xf32>
    %113 = arith.mulf %108, %112 : vector<2x32xf32>
    %114 = vector.extract_strided_slice %6 {offsets = [0, 5, 0], sizes = [2, 1, 128], strides = [1, 1, 1]} : vector<2x8x128xf32> to vector<2x1x128xf32>
    %115 = vector.shape_cast %114 : vector<2x1x128xf32> to vector<2x128xf32>
    %c0_27 = arith.constant 0 : index
    %c0_28 = arith.constant 0 : index
    %116 = vector.load %arg3[%c0_27, %c0_28] : memref<32x128xf32, #tpu.memory_space<vmem>>, vector<32x128xf32>
    %cst_29 = arith.constant dense<0.000000e+00> : vector<2x128xf32>
    %117 = tpu.matmul %113, %116, %cst_29 {dimension_numbers = #tpu.dot_dimension_numbers<[1], [0], [0], [1], [0, 0, 1, 1], [], []>} : vector<2x32xf32>, vector<32x128xf32>, vector<2x128xf32> -> vector<2x128xf32>
    %118 = arith.addf %115, %117 : vector<2x128xf32>
    %119 = vector.extract_strided_slice %118 {offsets = [0, 0], sizes = [2, 96], strides = [1, 1]} : vector<2x128xf32> to vector<2x96xf32>
    %120 = arith.negf %119 : vector<2x96xf32>
    %121 = math.exp %120 : vector<2x96xf32>
    %cst_30 = arith.constant 1.000000e+00 : f32
    %122 = vector.broadcast %cst_30 : f32 to vector<2x96xf32>
    %123 = arith.addf %122, %121 : vector<2x96xf32>
    %124 = arith.divf %122, %123 : vector<2x96xf32>
    %125 = vector.extract_strided_slice %118 {offsets = [0, 96], sizes = [2, 32], strides = [1, 1]} : vector<2x128xf32> to vector<2x32xf32>
    %126 = math.tanh %125 : vector<2x32xf32>
    %127 = vector.extract_strided_slice %124 {offsets = [0, 0], sizes = [2, 32], strides = [1, 1]} : vector<2x96xf32> to vector<2x32xf32>
    %128 = vector.extract_strided_slice %124 {offsets = [0, 32], sizes = [2, 32], strides = [1, 1]} : vector<2x96xf32> to vector<2x32xf32>
    %129 = vector.extract_strided_slice %124 {offsets = [0, 64], sizes = [2, 32], strides = [1, 1]} : vector<2x96xf32> to vector<2x32xf32>
    %130 = arith.mulf %128, %111 : vector<2x32xf32>
    %131 = arith.mulf %127, %126 : vector<2x32xf32>
    %132 = arith.addf %130, %131 : vector<2x32xf32>
    %133 = math.tanh %132 : vector<2x32xf32>
    %134 = arith.mulf %129, %133 : vector<2x32xf32>
    %135 = vector.extract_strided_slice %6 {offsets = [0, 6, 0], sizes = [2, 1, 128], strides = [1, 1, 1]} : vector<2x8x128xf32> to vector<2x1x128xf32>
    %136 = vector.shape_cast %135 : vector<2x1x128xf32> to vector<2x128xf32>
    %c0_31 = arith.constant 0 : index
    %c0_32 = arith.constant 0 : index
    %137 = vector.load %arg3[%c0_31, %c0_32] : memref<32x128xf32, #tpu.memory_space<vmem>>, vector<32x128xf32>
    %cst_33 = arith.constant dense<0.000000e+00> : vector<2x128xf32>
    %138 = tpu.matmul %134, %137, %cst_33 {dimension_numbers = #tpu.dot_dimension_numbers<[1], [0], [0], [1], [0, 0, 1, 1], [], []>} : vector<2x32xf32>, vector<32x128xf32>, vector<2x128xf32> -> vector<2x128xf32>
    %139 = arith.addf %136, %138 : vector<2x128xf32>
    %140 = vector.extract_strided_slice %139 {offsets = [0, 0], sizes = [2, 96], strides = [1, 1]} : vector<2x128xf32> to vector<2x96xf32>
    %141 = arith.negf %140 : vector<2x96xf32>
    %142 = math.exp %141 : vector<2x96xf32>
    %cst_34 = arith.constant 1.000000e+00 : f32
    %143 = vector.broadcast %cst_34 : f32 to vector<2x96xf32>
    %144 = arith.addf %143, %142 : vector<2x96xf32>
    %145 = arith.divf %143, %144 : vector<2x96xf32>
    %146 = vector.extract_strided_slice %139 {offsets = [0, 96], sizes = [2, 32], strides = [1, 1]} : vector<2x128xf32> to vector<2x32xf32>
    %147 = math.tanh %146 : vector<2x32xf32>
    %148 = vector.extract_strided_slice %145 {offsets = [0, 0], sizes = [2, 32], strides = [1, 1]} : vector<2x96xf32> to vector<2x32xf32>
    %149 = vector.extract_strided_slice %145 {offsets = [0, 32], sizes = [2, 32], strides = [1, 1]} : vector<2x96xf32> to vector<2x32xf32>
    %150 = vector.extract_strided_slice %145 {offsets = [0, 64], sizes = [2, 32], strides = [1, 1]} : vector<2x96xf32> to vector<2x32xf32>
    %151 = arith.mulf %149, %132 : vector<2x32xf32>
    %152 = arith.mulf %148, %147 : vector<2x32xf32>
    %153 = arith.addf %151, %152 : vector<2x32xf32>
    %154 = math.tanh %153 : vector<2x32xf32>
    %155 = arith.mulf %150, %154 : vector<2x32xf32>
    %156 = vector.extract_strided_slice %6 {offsets = [0, 7, 0], sizes = [2, 1, 128], strides = [1, 1, 1]} : vector<2x8x128xf32> to vector<2x1x128xf32>
    %157 = vector.shape_cast %156 : vector<2x1x128xf32> to vector<2x128xf32>
    %c0_35 = arith.constant 0 : index
    %c0_36 = arith.constant 0 : index
    %158 = vector.load %arg3[%c0_35, %c0_36] : memref<32x128xf32, #tpu.memory_space<vmem>>, vector<32x128xf32>
    %cst_37 = arith.constant dense<0.000000e+00> : vector<2x128xf32>
    %159 = tpu.matmul %155, %158, %cst_37 {dimension_numbers = #tpu.dot_dimension_numbers<[1], [0], [0], [1], [0, 0, 1, 1], [], []>} : vector<2x32xf32>, vector<32x128xf32>, vector<2x128xf32> -> vector<2x128xf32>
    %160 = arith.addf %157, %159 : vector<2x128xf32>
    %161 = vector.extract_strided_slice %160 {offsets = [0, 0], sizes = [2, 96], strides = [1, 1]} : vector<2x128xf32> to vector<2x96xf32>
    %162 = arith.negf %161 : vector<2x96xf32>
    %163 = math.exp %162 : vector<2x96xf32>
    %cst_38 = arith.constant 1.000000e+00 : f32
    %164 = vector.broadcast %cst_38 : f32 to vector<2x96xf32>
    %165 = arith.addf %164, %163 : vector<2x96xf32>
    %166 = arith.divf %164, %165 : vector<2x96xf32>
    %167 = vector.extract_strided_slice %160 {offsets = [0, 96], sizes = [2, 32], strides = [1, 1]} : vector<2x128xf32> to vector<2x32xf32>
    %168 = math.tanh %167 : vector<2x32xf32>
    %169 = vector.extract_strided_slice %166 {offsets = [0, 0], sizes = [2, 32], strides = [1, 1]} : vector<2x96xf32> to vector<2x32xf32>
    %170 = vector.extract_strided_slice %166 {offsets = [0, 32], sizes = [2, 32], strides = [1, 1]} : vector<2x96xf32> to vector<2x32xf32>
    %171 = vector.extract_strided_slice %166 {offsets = [0, 64], sizes = [2, 32], strides = [1, 1]} : vector<2x96xf32> to vector<2x32xf32>
    %172 = arith.mulf %170, %153 : vector<2x32xf32>
    %173 = arith.mulf %169, %168 : vector<2x32xf32>
    %174 = arith.addf %172, %173 : vector<2x32xf32>
    %175 = math.tanh %174 : vector<2x32xf32>
    %176 = arith.mulf %171, %175 : vector<2x32xf32>
    %177 = vector.shape_cast %29 : vector<2x32xf32> to vector<2x1x32xf32>
    %178 = vector.shape_cast %50 : vector<2x32xf32> to vector<2x1x32xf32>
    %179 = vector.shape_cast %71 : vector<2x32xf32> to vector<2x1x32xf32>
    %180 = vector.shape_cast %92 : vector<2x32xf32> to vector<2x1x32xf32>
    %181 = vector.shape_cast %113 : vector<2x32xf32> to vector<2x1x32xf32>
    %182 = vector.shape_cast %134 : vector<2x32xf32> to vector<2x1x32xf32>
    %183 = vector.shape_cast %155 : vector<2x32xf32> to vector<2x1x32xf32>
    %184 = vector.shape_cast %176 : vector<2x32xf32> to vector<2x1x32xf32>
    %185 = tpu.concatenate %177, %178, %179, %180, %181, %182, %183, %184 in 1 : vector<2x1x32xf32>, vector<2x1x32xf32>, vector<2x1x32xf32>, vector<2x1x32xf32>, vector<2x1x32xf32>, vector<2x1x32xf32>, vector<2x1x32xf32>, vector<2x1x32xf32> -> vector<2x8x32xf32>
    %186 = vector.shape_cast %185 : vector<2x8x32xf32> to vector<16x32xf32>
    %c0_39 = arith.constant 0 : index
    %c0_40 = arith.constant 0 : index
    %187 = vector.load %arg5[%c0_39, %c0_40] : memref<32x96xf32, #tpu.memory_space<vmem>>, vector<32x96xf32>
    %cst_41 = arith.constant dense<0.000000e+00> : vector<16x96xf32>
    %188 = tpu.matmul %186, %187, %cst_41 {dimension_numbers = #tpu.dot_dimension_numbers<[1], [0], [0], [1], [0, 0, 1, 1], [], []>} : vector<16x32xf32>, vector<32x96xf32>, vector<16x96xf32> -> vector<16x96xf32>
    %189 = vector.extract_strided_slice %188 {offsets = [0, 0], sizes = [16, 64], strides = [1, 1]} : vector<16x96xf32> to vector<16x64xf32>
    %190 = vector.extract_strided_slice %188 {offsets = [0, 64], sizes = [16, 32], strides = [1, 1]} : vector<16x96xf32> to vector<16x32xf32>
    tpu.wait_dma2 semaphore(%arg12 : memref<!tpu.dma_semaphore, #tpu.memory_space<semaphore_mem>>) src(%arg1 : memref<16x36x64xf32, #tpu.memory_space<any>>) dst(%arg11 : memref<16x36x64xf32, #tpu.memory_space<vmem>>)
    %c0_42 = arith.constant 0 : index
    %c0_43 = arith.constant 0 : index
    %c0_44 = arith.constant 0 : index
    %191 = vector.load %arg11[%c0_42, %c0_43, %c0_44] : memref<16x36x64xf32, #tpu.memory_space<vmem>>, vector<16x36x64xf32>
    %192 = vector.shape_cast %189 : vector<16x64xf32> to vector<16x1x64xf32>
    %193 = vector.broadcast %192 : vector<16x1x64xf32> to vector<16x36x64xf32>
    %194 = arith.mulf %191, %193 : vector<16x36x64xf32>
    %cst_45 = arith.constant dense<0.000000e+00> : vector<16x36xf32>
    %195 = vector.multi_reduction <add>, %194, %cst_45 [2] : vector<16x36x64xf32> to vector<16x36xf32>
    %cst_46 = arith.constant dense<0xFF800000> : vector<16xf32>
    %196 = vector.multi_reduction <maximumf>, %195, %cst_46 [1] : vector<16x36xf32> to vector<16xf32>
    %197 = vector.shape_cast %196 : vector<16xf32> to vector<16x1xf32>
    %198 = vector.broadcast %197 : vector<16x1xf32> to vector<16x36xf32>
    %199 = arith.subf %195, %198 : vector<16x36xf32>
    %200 = math.exp %199 : vector<16x36xf32>
    %cst_47 = arith.constant dense<0.000000e+00> : vector<16xf32>
    %201 = vector.multi_reduction <add>, %200, %cst_47 [1] : vector<16x36xf32> to vector<16xf32>
    %202 = vector.shape_cast %201 : vector<16xf32> to vector<16x1xf32>
    %203 = vector.shape_cast %200 : vector<16x36xf32> to vector<16x36x1xf32>
    %204 = vector.broadcast %203 : vector<16x36x1xf32> to vector<16x36x64xf32>
    %205 = arith.mulf %191, %204 : vector<16x36x64xf32>
    %cst_48 = arith.constant dense<0.000000e+00> : vector<16x64xf32>
    %206 = vector.multi_reduction <add>, %205, %cst_48 [1] : vector<16x36x64xf32> to vector<16x64xf32>
    %207 = tpu.reciprocal %202 {approx = true} : vector<16x1xf32> -> vector<16x1xf32>
    %208 = vector.broadcast %207 : vector<16x1xf32> to vector<16x64xf32>
    %209 = arith.mulf %206, %208 : vector<16x64xf32>
    %c0_49 = arith.constant 0 : index
    %c0_50 = arith.constant 0 : index
    %210 = vector.load %arg6[%c0_49, %c0_50] : memref<64x32xf32, #tpu.memory_space<vmem>>, vector<64x32xf32>
    %cst_51 = arith.constant dense<0.000000e+00> : vector<16x32xf32>
    %211 = tpu.matmul %209, %210, %cst_51 {dimension_numbers = #tpu.dot_dimension_numbers<[1], [0], [0], [1], [0, 0, 1, 1], [], []>} : vector<16x64xf32>, vector<64x32xf32>, vector<16x32xf32> -> vector<16x32xf32>
    %212 = arith.addf %211, %190 : vector<16x32xf32>
    %213 = math.tanh %212 : vector<16x32xf32>
    %c0_52 = arith.constant 0 : index
    %c0_53 = arith.constant 0 : index
    %214 = vector.load %arg7[%c0_52, %c0_53] : memref<32x128xf32, #tpu.memory_space<vmem>>, vector<32x128xf32>
    %cst_54 = arith.constant dense<0.000000e+00> : vector<16x128xf32>
    %215 = tpu.matmul %213, %214, %cst_54 {dimension_numbers = #tpu.dot_dimension_numbers<[1], [0], [0], [1], [0, 0, 1, 1], [], []>} : vector<16x32xf32>, vector<32x128xf32>, vector<16x128xf32> -> vector<16x128xf32>
    %c0_55 = arith.constant 0 : index
    %c0_56 = arith.constant 0 : index
    %216 = vector.load %arg9[%c0_55, %c0_56] : memref<1x128xf32, #tpu.memory_space<vmem>>, vector<1x128xf32>
    %217 = vector.broadcast %216 : vector<1x128xf32> to vector<16x128xf32>
    %218 = arith.addf %215, %217 : vector<16x128xf32>
    %219 = vector.shape_cast %218 : vector<16x128xf32> to vector<2x8x128xf32>
    %cst_57 = arith.constant 0.000000e+00 : f32
    %220 = vector.broadcast %cst_57 : f32 to vector<2x32xf32>
    %cst_58 = arith.constant 0.000000e+00 : f32
    %221 = vector.broadcast %cst_58 : f32 to vector<2x32xf32>
    %222 = vector.extract_strided_slice %219 {offsets = [0, 0, 0], sizes = [2, 1, 128], strides = [1, 1, 1]} : vector<2x8x128xf32> to vector<2x1x128xf32>
    %223 = vector.shape_cast %222 : vector<2x1x128xf32> to vector<2x128xf32>
    %c0_59 = arith.constant 0 : index
    %c0_60 = arith.constant 0 : index
    %224 = vector.load %arg8[%c0_59, %c0_60] : memref<32x128xf32, #tpu.memory_space<vmem>>, vector<32x128xf32>
    %cst_61 = arith.constant dense<0.000000e+00> : vector<2x128xf32>
    %225 = tpu.matmul %220, %224, %cst_61 {dimension_numbers = #tpu.dot_dimension_numbers<[1], [0], [0], [1], [0, 0, 1, 1], [], []>} : vector<2x32xf32>, vector<32x128xf32>, vector<2x128xf32> -> vector<2x128xf32>
    %226 = arith.addf %223, %225 : vector<2x128xf32>
    %227 = vector.extract_strided_slice %226 {offsets = [0, 0], sizes = [2, 96], strides = [1, 1]} : vector<2x128xf32> to vector<2x96xf32>
    %228 = arith.negf %227 : vector<2x96xf32>
    %229 = math.exp %228 : vector<2x96xf32>
    %cst_62 = arith.constant 1.000000e+00 : f32
    %230 = vector.broadcast %cst_62 : f32 to vector<2x96xf32>
    %231 = arith.addf %230, %229 : vector<2x96xf32>
    %232 = arith.divf %230, %231 : vector<2x96xf32>
    %233 = vector.extract_strided_slice %226 {offsets = [0, 96], sizes = [2, 32], strides = [1, 1]} : vector<2x128xf32> to vector<2x32xf32>
    %234 = math.tanh %233 : vector<2x32xf32>
    %235 = vector.extract_strided_slice %232 {offsets = [0, 0], sizes = [2, 32], strides = [1, 1]} : vector<2x96xf32> to vector<2x32xf32>
    %236 = vector.extract_strided_slice %232 {offsets = [0, 32], sizes = [2, 32], strides = [1, 1]} : vector<2x96xf32> to vector<2x32xf32>
    %237 = vector.extract_strided_slice %232 {offsets = [0, 64], sizes = [2, 32], strides = [1, 1]} : vector<2x96xf32> to vector<2x32xf32>
    %238 = arith.mulf %236, %221 : vector<2x32xf32>
    %239 = arith.mulf %235, %234 : vector<2x32xf32>
    %240 = arith.addf %238, %239 : vector<2x32xf32>
    %241 = math.tanh %240 : vector<2x32xf32>
    %242 = arith.mulf %237, %241 : vector<2x32xf32>
    %243 = vector.extract_strided_slice %219 {offsets = [0, 1, 0], sizes = [2, 1, 128], strides = [1, 1, 1]} : vector<2x8x128xf32> to vector<2x1x128xf32>
    %244 = vector.shape_cast %243 : vector<2x1x128xf32> to vector<2x128xf32>
    %c0_63 = arith.constant 0 : index
    %c0_64 = arith.constant 0 : index
    %245 = vector.load %arg8[%c0_63, %c0_64] : memref<32x128xf32, #tpu.memory_space<vmem>>, vector<32x128xf32>
    %cst_65 = arith.constant dense<0.000000e+00> : vector<2x128xf32>
    %246 = tpu.matmul %242, %245, %cst_65 {dimension_numbers = #tpu.dot_dimension_numbers<[1], [0], [0], [1], [0, 0, 1, 1], [], []>} : vector<2x32xf32>, vector<32x128xf32>, vector<2x128xf32> -> vector<2x128xf32>
    %247 = arith.addf %244, %246 : vector<2x128xf32>
    %248 = vector.extract_strided_slice %247 {offsets = [0, 0], sizes = [2, 96], strides = [1, 1]} : vector<2x128xf32> to vector<2x96xf32>
    %249 = arith.negf %248 : vector<2x96xf32>
    %250 = math.exp %249 : vector<2x96xf32>
    %cst_66 = arith.constant 1.000000e+00 : f32
    %251 = vector.broadcast %cst_66 : f32 to vector<2x96xf32>
    %252 = arith.addf %251, %250 : vector<2x96xf32>
    %253 = arith.divf %251, %252 : vector<2x96xf32>
    %254 = vector.extract_strided_slice %247 {offsets = [0, 96], sizes = [2, 32], strides = [1, 1]} : vector<2x128xf32> to vector<2x32xf32>
    %255 = math.tanh %254 : vector<2x32xf32>
    %256 = vector.extract_strided_slice %253 {offsets = [0, 0], sizes = [2, 32], strides = [1, 1]} : vector<2x96xf32> to vector<2x32xf32>
    %257 = vector.extract_strided_slice %253 {offsets = [0, 32], sizes = [2, 32], strides = [1, 1]} : vector<2x96xf32> to vector<2x32xf32>
    %258 = vector.extract_strided_slice %253 {offsets = [0, 64], sizes = [2, 32], strides = [1, 1]} : vector<2x96xf32> to vector<2x32xf32>
    %259 = arith.mulf %257, %240 : vector<2x32xf32>
    %260 = arith.mulf %256, %255 : vector<2x32xf32>
    %261 = arith.addf %259, %260 : vector<2x32xf32>
    %262 = math.tanh %261 : vector<2x32xf32>
    %263 = arith.mulf %258, %262 : vector<2x32xf32>
    %264 = vector.extract_strided_slice %219 {offsets = [0, 2, 0], sizes = [2, 1, 128], strides = [1, 1, 1]} : vector<2x8x128xf32> to vector<2x1x128xf32>
    %265 = vector.shape_cast %264 : vector<2x1x128xf32> to vector<2x128xf32>
    %c0_67 = arith.constant 0 : index
    %c0_68 = arith.constant 0 : index
    %266 = vector.load %arg8[%c0_67, %c0_68] : memref<32x128xf32, #tpu.memory_space<vmem>>, vector<32x128xf32>
    %cst_69 = arith.constant dense<0.000000e+00> : vector<2x128xf32>
    %267 = tpu.matmul %263, %266, %cst_69 {dimension_numbers = #tpu.dot_dimension_numbers<[1], [0], [0], [1], [0, 0, 1, 1], [], []>} : vector<2x32xf32>, vector<32x128xf32>, vector<2x128xf32> -> vector<2x128xf32>
    %268 = arith.addf %265, %267 : vector<2x128xf32>
    %269 = vector.extract_strided_slice %268 {offsets = [0, 0], sizes = [2, 96], strides = [1, 1]} : vector<2x128xf32> to vector<2x96xf32>
    %270 = arith.negf %269 : vector<2x96xf32>
    %271 = math.exp %270 : vector<2x96xf32>
    %cst_70 = arith.constant 1.000000e+00 : f32
    %272 = vector.broadcast %cst_70 : f32 to vector<2x96xf32>
    %273 = arith.addf %272, %271 : vector<2x96xf32>
    %274 = arith.divf %272, %273 : vector<2x96xf32>
    %275 = vector.extract_strided_slice %268 {offsets = [0, 96], sizes = [2, 32], strides = [1, 1]} : vector<2x128xf32> to vector<2x32xf32>
    %276 = math.tanh %275 : vector<2x32xf32>
    %277 = vector.extract_strided_slice %274 {offsets = [0, 0], sizes = [2, 32], strides = [1, 1]} : vector<2x96xf32> to vector<2x32xf32>
    %278 = vector.extract_strided_slice %274 {offsets = [0, 32], sizes = [2, 32], strides = [1, 1]} : vector<2x96xf32> to vector<2x32xf32>
    %279 = vector.extract_strided_slice %274 {offsets = [0, 64], sizes = [2, 32], strides = [1, 1]} : vector<2x96xf32> to vector<2x32xf32>
    %280 = arith.mulf %278, %261 : vector<2x32xf32>
    %281 = arith.mulf %277, %276 : vector<2x32xf32>
    %282 = arith.addf %280, %281 : vector<2x32xf32>
    %283 = math.tanh %282 : vector<2x32xf32>
    %284 = arith.mulf %279, %283 : vector<2x32xf32>
    %285 = vector.extract_strided_slice %219 {offsets = [0, 3, 0], sizes = [2, 1, 128], strides = [1, 1, 1]} : vector<2x8x128xf32> to vector<2x1x128xf32>
    %286 = vector.shape_cast %285 : vector<2x1x128xf32> to vector<2x128xf32>
    %c0_71 = arith.constant 0 : index
    %c0_72 = arith.constant 0 : index
    %287 = vector.load %arg8[%c0_71, %c0_72] : memref<32x128xf32, #tpu.memory_space<vmem>>, vector<32x128xf32>
    %cst_73 = arith.constant dense<0.000000e+00> : vector<2x128xf32>
    %288 = tpu.matmul %284, %287, %cst_73 {dimension_numbers = #tpu.dot_dimension_numbers<[1], [0], [0], [1], [0, 0, 1, 1], [], []>} : vector<2x32xf32>, vector<32x128xf32>, vector<2x128xf32> -> vector<2x128xf32>
    %289 = arith.addf %286, %288 : vector<2x128xf32>
    %290 = vector.extract_strided_slice %289 {offsets = [0, 0], sizes = [2, 96], strides = [1, 1]} : vector<2x128xf32> to vector<2x96xf32>
    %291 = arith.negf %290 : vector<2x96xf32>
    %292 = math.exp %291 : vector<2x96xf32>
    %cst_74 = arith.constant 1.000000e+00 : f32
    %293 = vector.broadcast %cst_74 : f32 to vector<2x96xf32>
    %294 = arith.addf %293, %292 : vector<2x96xf32>
    %295 = arith.divf %293, %294 : vector<2x96xf32>
    %296 = vector.extract_strided_slice %289 {offsets = [0, 96], sizes = [2, 32], strides = [1, 1]} : vector<2x128xf32> to vector<2x32xf32>
    %297 = math.tanh %296 : vector<2x32xf32>
    %298 = vector.extract_strided_slice %295 {offsets = [0, 0], sizes = [2, 32], strides = [1, 1]} : vector<2x96xf32> to vector<2x32xf32>
    %299 = vector.extract_strided_slice %295 {offsets = [0, 32], sizes = [2, 32], strides = [1, 1]} : vector<2x96xf32> to vector<2x32xf32>
    %300 = vector.extract_strided_slice %295 {offsets = [0, 64], sizes = [2, 32], strides = [1, 1]} : vector<2x96xf32> to vector<2x32xf32>
    %301 = arith.mulf %299, %282 : vector<2x32xf32>
    %302 = arith.mulf %298, %297 : vector<2x32xf32>
    %303 = arith.addf %301, %302 : vector<2x32xf32>
    %304 = math.tanh %303 : vector<2x32xf32>
    %305 = arith.mulf %300, %304 : vector<2x32xf32>
    %306 = vector.extract_strided_slice %219 {offsets = [0, 4, 0], sizes = [2, 1, 128], strides = [1, 1, 1]} : vector<2x8x128xf32> to vector<2x1x128xf32>
    %307 = vector.shape_cast %306 : vector<2x1x128xf32> to vector<2x128xf32>
    %c0_75 = arith.constant 0 : index
    %c0_76 = arith.constant 0 : index
    %308 = vector.load %arg8[%c0_75, %c0_76] : memref<32x128xf32, #tpu.memory_space<vmem>>, vector<32x128xf32>
    %cst_77 = arith.constant dense<0.000000e+00> : vector<2x128xf32>
    %309 = tpu.matmul %305, %308, %cst_77 {dimension_numbers = #tpu.dot_dimension_numbers<[1], [0], [0], [1], [0, 0, 1, 1], [], []>} : vector<2x32xf32>, vector<32x128xf32>, vector<2x128xf32> -> vector<2x128xf32>
    %310 = arith.addf %307, %309 : vector<2x128xf32>
    %311 = vector.extract_strided_slice %310 {offsets = [0, 0], sizes = [2, 96], strides = [1, 1]} : vector<2x128xf32> to vector<2x96xf32>
    %312 = arith.negf %311 : vector<2x96xf32>
    %313 = math.exp %312 : vector<2x96xf32>
    %cst_78 = arith.constant 1.000000e+00 : f32
    %314 = vector.broadcast %cst_78 : f32 to vector<2x96xf32>
    %315 = arith.addf %314, %313 : vector<2x96xf32>
    %316 = arith.divf %314, %315 : vector<2x96xf32>
    %317 = vector.extract_strided_slice %310 {offsets = [0, 96], sizes = [2, 32], strides = [1, 1]} : vector<2x128xf32> to vector<2x32xf32>
    %318 = math.tanh %317 : vector<2x32xf32>
    %319 = vector.extract_strided_slice %316 {offsets = [0, 0], sizes = [2, 32], strides = [1, 1]} : vector<2x96xf32> to vector<2x32xf32>
    %320 = vector.extract_strided_slice %316 {offsets = [0, 32], sizes = [2, 32], strides = [1, 1]} : vector<2x96xf32> to vector<2x32xf32>
    %321 = vector.extract_strided_slice %316 {offsets = [0, 64], sizes = [2, 32], strides = [1, 1]} : vector<2x96xf32> to vector<2x32xf32>
    %322 = arith.mulf %320, %303 : vector<2x32xf32>
    %323 = arith.mulf %319, %318 : vector<2x32xf32>
    %324 = arith.addf %322, %323 : vector<2x32xf32>
    %325 = math.tanh %324 : vector<2x32xf32>
    %326 = arith.mulf %321, %325 : vector<2x32xf32>
    %327 = vector.extract_strided_slice %219 {offsets = [0, 5, 0], sizes = [2, 1, 128], strides = [1, 1, 1]} : vector<2x8x128xf32> to vector<2x1x128xf32>
    %328 = vector.shape_cast %327 : vector<2x1x128xf32> to vector<2x128xf32>
    %c0_79 = arith.constant 0 : index
    %c0_80 = arith.constant 0 : index
    %329 = vector.load %arg8[%c0_79, %c0_80] : memref<32x128xf32, #tpu.memory_space<vmem>>, vector<32x128xf32>
    %cst_81 = arith.constant dense<0.000000e+00> : vector<2x128xf32>
    %330 = tpu.matmul %326, %329, %cst_81 {dimension_numbers = #tpu.dot_dimension_numbers<[1], [0], [0], [1], [0, 0, 1, 1], [], []>} : vector<2x32xf32>, vector<32x128xf32>, vector<2x128xf32> -> vector<2x128xf32>
    %331 = arith.addf %328, %330 : vector<2x128xf32>
    %332 = vector.extract_strided_slice %331 {offsets = [0, 0], sizes = [2, 96], strides = [1, 1]} : vector<2x128xf32> to vector<2x96xf32>
    %333 = arith.negf %332 : vector<2x96xf32>
    %334 = math.exp %333 : vector<2x96xf32>
    %cst_82 = arith.constant 1.000000e+00 : f32
    %335 = vector.broadcast %cst_82 : f32 to vector<2x96xf32>
    %336 = arith.addf %335, %334 : vector<2x96xf32>
    %337 = arith.divf %335, %336 : vector<2x96xf32>
    %338 = vector.extract_strided_slice %331 {offsets = [0, 96], sizes = [2, 32], strides = [1, 1]} : vector<2x128xf32> to vector<2x32xf32>
    %339 = math.tanh %338 : vector<2x32xf32>
    %340 = vector.extract_strided_slice %337 {offsets = [0, 0], sizes = [2, 32], strides = [1, 1]} : vector<2x96xf32> to vector<2x32xf32>
    %341 = vector.extract_strided_slice %337 {offsets = [0, 32], sizes = [2, 32], strides = [1, 1]} : vector<2x96xf32> to vector<2x32xf32>
    %342 = vector.extract_strided_slice %337 {offsets = [0, 64], sizes = [2, 32], strides = [1, 1]} : vector<2x96xf32> to vector<2x32xf32>
    %343 = arith.mulf %341, %324 : vector<2x32xf32>
    %344 = arith.mulf %340, %339 : vector<2x32xf32>
    %345 = arith.addf %343, %344 : vector<2x32xf32>
    %346 = math.tanh %345 : vector<2x32xf32>
    %347 = arith.mulf %342, %346 : vector<2x32xf32>
    %348 = vector.extract_strided_slice %219 {offsets = [0, 6, 0], sizes = [2, 1, 128], strides = [1, 1, 1]} : vector<2x8x128xf32> to vector<2x1x128xf32>
    %349 = vector.shape_cast %348 : vector<2x1x128xf32> to vector<2x128xf32>
    %c0_83 = arith.constant 0 : index
    %c0_84 = arith.constant 0 : index
    %350 = vector.load %arg8[%c0_83, %c0_84] : memref<32x128xf32, #tpu.memory_space<vmem>>, vector<32x128xf32>
    %cst_85 = arith.constant dense<0.000000e+00> : vector<2x128xf32>
    %351 = tpu.matmul %347, %350, %cst_85 {dimension_numbers = #tpu.dot_dimension_numbers<[1], [0], [0], [1], [0, 0, 1, 1], [], []>} : vector<2x32xf32>, vector<32x128xf32>, vector<2x128xf32> -> vector<2x128xf32>
    %352 = arith.addf %349, %351 : vector<2x128xf32>
    %353 = vector.extract_strided_slice %352 {offsets = [0, 0], sizes = [2, 96], strides = [1, 1]} : vector<2x128xf32> to vector<2x96xf32>
    %354 = arith.negf %353 : vector<2x96xf32>
    %355 = math.exp %354 : vector<2x96xf32>
    %cst_86 = arith.constant 1.000000e+00 : f32
    %356 = vector.broadcast %cst_86 : f32 to vector<2x96xf32>
    %357 = arith.addf %356, %355 : vector<2x96xf32>
    %358 = arith.divf %356, %357 : vector<2x96xf32>
    %359 = vector.extract_strided_slice %352 {offsets = [0, 96], sizes = [2, 32], strides = [1, 1]} : vector<2x128xf32> to vector<2x32xf32>
    %360 = math.tanh %359 : vector<2x32xf32>
    %361 = vector.extract_strided_slice %358 {offsets = [0, 0], sizes = [2, 32], strides = [1, 1]} : vector<2x96xf32> to vector<2x32xf32>
    %362 = vector.extract_strided_slice %358 {offsets = [0, 32], sizes = [2, 32], strides = [1, 1]} : vector<2x96xf32> to vector<2x32xf32>
    %363 = vector.extract_strided_slice %358 {offsets = [0, 64], sizes = [2, 32], strides = [1, 1]} : vector<2x96xf32> to vector<2x32xf32>
    %364 = arith.mulf %362, %345 : vector<2x32xf32>
    %365 = arith.mulf %361, %360 : vector<2x32xf32>
    %366 = arith.addf %364, %365 : vector<2x32xf32>
    %367 = math.tanh %366 : vector<2x32xf32>
    %368 = arith.mulf %363, %367 : vector<2x32xf32>
    %369 = vector.extract_strided_slice %219 {offsets = [0, 7, 0], sizes = [2, 1, 128], strides = [1, 1, 1]} : vector<2x8x128xf32> to vector<2x1x128xf32>
    %370 = vector.shape_cast %369 : vector<2x1x128xf32> to vector<2x128xf32>
    %c0_87 = arith.constant 0 : index
    %c0_88 = arith.constant 0 : index
    %371 = vector.load %arg8[%c0_87, %c0_88] : memref<32x128xf32, #tpu.memory_space<vmem>>, vector<32x128xf32>
    %cst_89 = arith.constant dense<0.000000e+00> : vector<2x128xf32>
    %372 = tpu.matmul %368, %371, %cst_89 {dimension_numbers = #tpu.dot_dimension_numbers<[1], [0], [0], [1], [0, 0, 1, 1], [], []>} : vector<2x32xf32>, vector<32x128xf32>, vector<2x128xf32> -> vector<2x128xf32>
    %373 = arith.addf %370, %372 : vector<2x128xf32>
    %374 = vector.extract_strided_slice %373 {offsets = [0, 0], sizes = [2, 96], strides = [1, 1]} : vector<2x128xf32> to vector<2x96xf32>
    %375 = arith.negf %374 : vector<2x96xf32>
    %376 = math.exp %375 : vector<2x96xf32>
    %cst_90 = arith.constant 1.000000e+00 : f32
    %377 = vector.broadcast %cst_90 : f32 to vector<2x96xf32>
    %378 = arith.addf %377, %376 : vector<2x96xf32>
    %379 = arith.divf %377, %378 : vector<2x96xf32>
    %380 = vector.extract_strided_slice %373 {offsets = [0, 96], sizes = [2, 32], strides = [1, 1]} : vector<2x128xf32> to vector<2x32xf32>
    %381 = math.tanh %380 : vector<2x32xf32>
    %382 = vector.extract_strided_slice %379 {offsets = [0, 0], sizes = [2, 32], strides = [1, 1]} : vector<2x96xf32> to vector<2x32xf32>
    %383 = vector.extract_strided_slice %379 {offsets = [0, 32], sizes = [2, 32], strides = [1, 1]} : vector<2x96xf32> to vector<2x32xf32>
    %384 = vector.extract_strided_slice %379 {offsets = [0, 64], sizes = [2, 32], strides = [1, 1]} : vector<2x96xf32> to vector<2x32xf32>
    %385 = arith.mulf %383, %366 : vector<2x32xf32>
    %386 = arith.mulf %382, %381 : vector<2x32xf32>
    %387 = arith.addf %385, %386 : vector<2x32xf32>
    %388 = math.tanh %387 : vector<2x32xf32>
    %389 = arith.mulf %384, %388 : vector<2x32xf32>
    %390 = vector.shape_cast %242 : vector<2x32xf32> to vector<2x1x32xf32>
    %391 = vector.shape_cast %263 : vector<2x32xf32> to vector<2x1x32xf32>
    %392 = vector.shape_cast %284 : vector<2x32xf32> to vector<2x1x32xf32>
    %393 = vector.shape_cast %305 : vector<2x32xf32> to vector<2x1x32xf32>
    %394 = vector.shape_cast %326 : vector<2x32xf32> to vector<2x1x32xf32>
    %395 = vector.shape_cast %347 : vector<2x32xf32> to vector<2x1x32xf32>
    %396 = vector.shape_cast %368 : vector<2x32xf32> to vector<2x1x32xf32>
    %397 = vector.shape_cast %389 : vector<2x32xf32> to vector<2x1x32xf32>
    %398 = tpu.concatenate %390, %391, %392, %393, %394, %395, %396, %397 in 1 : vector<2x1x32xf32>, vector<2x1x32xf32>, vector<2x1x32xf32>, vector<2x1x32xf32>, vector<2x1x32xf32>, vector<2x1x32xf32>, vector<2x1x32xf32>, vector<2x1x32xf32> -> vector<2x8x32xf32>
    %399 = vector.shape_cast %398 : vector<2x8x32xf32> to vector<16x32xf32>
    %c0_91 = arith.constant 0 : index
    %c0_92 = arith.constant 0 : index
    %400 = vector.load %arg10[%c0_91, %c0_92] : memref<16x32xf32, #tpu.memory_space<vmem>>, vector<16x32xf32>
    tpu.vector_store %arg10[%c0_91, %c0_92], %399 {strides = array<i32>} : memref<16x32xf32, #tpu.memory_space<vmem>>, vector<16x32xf32>,
    return
  }
}

</mosaic_0001>

<bundles_post_ra>
// kernel: tpu_custom_call.1
= control target key start
LH: loop header
LB: loop body
LE: loop exit
PB: predicated region body
PF: predicated region fallthrough
CT: control target
= control target key end

     0   :  { %15 = vsyncpa [#allocation5], 0  ;;  %s7074_s0 = inlined_call_operand.vmem [shape: f32[16,64], index: 0, kind: input, shape index: {}]   ;;  %s7075_s1 = inlined_call_operand.vmem [shape: f32[16,36,64], index: 1, kind: input, shape index: {}]   ;;  %s7076_s2 = inlined_call_operand.vmem [shape: f32[64,128], index: 2, kind: input, shape index: {}]   ;;  %s7077_s3 = inlined_call_operand.vmem [shape: f32[32,128], index: 3, kind: input, shape index: {}]   ;;  %s7078_s4 = inlined_call_operand.vmem [shape: f32[1,128], index: 4, kind: input, shape index: {}]   ;;  %s7079_s5 = inlined_call_operand.vmem [shape: f32[32,96], index: 5, kind: input, shape index: {}]   ;;  %s7080_s6 = inlined_call_operand.vmem [shape: f32[64,32], index: 6, kind: input, shape index: {}]   ;;  %s7081_s7 = inlined_call_operand.vmem [shape: f32[32,128], index: 7, kind: input, shape index: {}]   ;;  %s7082_s8 = inlined_call_operand.vmem [shape: f32[32,128], index: 8, kind: input, shape index: {}]   ;;  %s7083_s9 = inlined_call_operand.vmem [shape: f32[1,128], index: 9, kind: input, shape index: {}]   ;;  %s7084_s10 = inlined_call_operand.hbm [shape: f32[16,32], index: 10, kind: output, shape index: {}]  }
   0x1   :  { %v46_v0 = vld [vmem:[%s7075_s1] sm:$0xff]  ;;  %v48_v1 = vld [vmem:[%s7075_s1 + $0x8] sm:$0xff]  ;;  %v50_v2 = vld [vmem:[%s7075_s1 + $0x10] sm:$0xff] }
   0x2   :  { %47 = vst [vmem:[#allocation2 + $0xf8] sm:$0xff] %v46_v0  ;;  %v52_v3 = vld [vmem:[%s7075_s1 + $0x18] sm:$0xff]  ;;  %v54_v4 = vld [vmem:[%s7075_s1 + $0x28] sm:$0xff]  ;;  %v56_v5 = vld [vmem:[%s7075_s1 + $0x30] sm:$0xff] }
   0x3   :  { %49 = vst [vmem:[#allocation2 + $0x8] sm:$0xff] %v48_v1  ;;  %v58_v6 = vld [vmem:[%s7075_s1 + $0x38] sm:$0xff]  ;;  %v60_v7 = vld [vmem:[%s7075_s1 + $0x40] sm:$0xff]  ;;  %v62_v8 = vld [vmem:[%s7075_s1 + $0x50] sm:$0xff] }
   0x4   :  { %51 = vst [vmem:[#allocation2 + $0x50] sm:$0xff] %v50_v2  ;;  %v64_v9 = vld [vmem:[%s7075_s1 + $0x58] sm:$0xff]  ;;  %v66_v10 = vld [vmem:[%s7075_s1 + $0x60] sm:$0xff]  ;;  %v68_v11 = vld [vmem:[%s7075_s1 + $0x68] sm:$0xff] }
   0x5   :  { %53 = vst [vmem:[#allocation2 + $0x30] sm:$0xff] %v52_v3  ;;  %v70_v12 = vld [vmem:[%s7075_s1 + $0x78] sm:$0xff]  ;;  %v72_v13 = vld [vmem:[%s7075_s1 + $0x80] sm:$0xff]  ;;  %v74_v14 = vld [vmem:[%s7075_s1 + $0x88] sm:$0xff] }
   0x6   :  { %55 = vst [vmem:[#allocation2 + $0x120] sm:$0xff] %v54_v4  ;;  %v76_v15 = vld [vmem:[%s7075_s1 + $0x90] sm:$0xff]  ;;  %v78_v16 = vld [vmem:[%s7075_s1 + $0xa0] sm:$0xff]  ;;  %v80_v17 = vld [vmem:[%s7075_s1 + $0xa8] sm:$0xff] }
   0x7   :  { %57 = vst [vmem:[#allocation2 + $0x128] sm:$0xff] %v56_v5  ;;  %v82_v18 = vld [vmem:[%s7075_s1 + $0xb0] sm:$0xff]  ;;  %v84_v19 = vld [vmem:[%s7075_s1 + $0xb8] sm:$0xff]  ;;  %v86_v20 = vld [vmem:[%s7075_s1 + $0xc8] sm:$0xff] }
   0x8   :  { %59 = vst [vmem:[#allocation2 + $0x88] sm:$0xff] %v58_v6  ;;  %v88_v21 = vld [vmem:[%s7075_s1 + $0xd0] sm:$0xff]  ;;  %v90_v22 = vld [vmem:[%s7075_s1 + $0xd8] sm:$0xff]  ;;  %v92_v23 = vld [vmem:[%s7075_s1 + $0xe0] sm:$0xff] }
   0x9   :  { %61 = vst [vmem:[#allocation2 + $0x168] sm:$0xff] %v60_v7  ;;  %v94_v24 = vld [vmem:[%s7075_s1 + $0xf0] sm:$0xff]  ;;  %v96_v25 = vld [vmem:[%s7075_s1 + $0xf8] sm:$0xff]  ;;  %v98_v26 = vld [vmem:[%s7075_s1 + $0x100] sm:$0xff] }
   0xa   :  { %63 = vst [vmem:[#allocation2 + $0x108] sm:$0xff] %v62_v8  ;;  %v100_v27 = vld [vmem:[%s7075_s1 + $0x108] sm:$0xff]  ;;  %v102_v28 = vld [vmem:[%s7075_s1 + $0x118] sm:$0xff]  ;;  %v104_v29 = vld [vmem:[%s7075_s1 + $0x120] sm:$0xff] }
   0xb   :  { %65 = vst [vmem:[#allocation2 + $0x198] sm:$0xff] %v64_v9  ;;  %v106_v30 = vld [vmem:[%s7075_s1 + $0x128] sm:$0xff]  ;;  %v108_v31 = vld [vmem:[%s7075_s1 + $0x130] sm:$0xff]  ;;  %v110_v32 = vld [vmem:[%s7075_s1 + $0x140] sm:$0xff] }
   0xc   :  { %67 = vst [vmem:[#allocation2 + $0x1a8] sm:$0xff] %v66_v10  ;;  %v112_v33 = vld [vmem:[%s7075_s1 + $0x148] sm:$0xff]  ;;  %v114_v34 = vld [vmem:[%s7075_s1 + $0x150] sm:$0xff]  ;;  %v116_v35 = vld [vmem:[%s7075_s1 + $0x158] sm:$0xff] }
   0xd   :  { %69 = vst [vmem:[#allocation2 + $0x148] sm:$0xff] %v68_v11  ;;  %v118_v36 = vld [vmem:[%s7075_s1 + $0x168] sm:$0xff]  ;;  %v120_v37 = vld [vmem:[%s7075_s1 + $0x170] sm:$0xff]  ;;  %v122_v38 = vld [vmem:[%s7075_s1 + $0x178] sm:$0xff] }
   0xe   :  { %71 = vst [vmem:[#allocation2 + $0xc0] sm:$0xff] %v70_v12  ;;  %v124_v39 = vld [vmem:[%s7075_s1 + $0x180] sm:$0xff]  ;;  %v126_v40 = vld [vmem:[%s7075_s1 + $0x190] sm:$0xff]  ;;  %v128_v41 = vld [vmem:[%s7075_s1 + $0x198] sm:$0xff] }
   0xf   :  { %73 = vst [vmem:[#allocation2 + $0xf0] sm:$0xff] %v72_v13  ;;  %v130_v42 = vld [vmem:[%s7075_s1 + $0x1a0] sm:$0xff]  ;;  %v132_v43 = vld [vmem:[%s7075_s1 + $0x1a8] sm:$0xff]  ;;  %v134_v44 = vld [vmem:[%s7075_s1 + $0x1b8] sm:$0xff] }
  0x10   :  { %75 = vst [vmem:[#allocation2 + $0x190] sm:$0xff] %v74_v14  ;;  %v136_v45 = vld [vmem:[%s7075_s1 + $0x1c0] sm:$0xff]  ;;  %v138_v46 = vld [vmem:[%s7075_s1 + $0x1c8] sm:$0xff]  ;;  %v140_v47 = vld [vmem:[%s7075_s1 + $0x1d0] sm:$0xff] }
  0x11   :  { %77 = vst [vmem:[#allocation2 + $0x20] sm:$0xff] %v76_v15  ;;  %v142_v48 = vld [vmem:[%s7075_s1 + $0x1e0] sm:$0xff]  ;;  %v144_v49 = vld [vmem:[%s7075_s1 + $0x1e8] sm:$0xff]  ;;  %v146_v50 = vld [vmem:[%s7075_s1 + $0x1f0] sm:$0xff] }
  0x12   :  { %79 = vst [vmem:[#allocation2 + $0xa0] sm:$0xff] %v78_v16  ;;  %v148_v51 = vld [vmem:[%s7075_s1 + $0x1f8] sm:$0xff]  ;;  %v150_v52 = vld [vmem:[%s7075_s1 + $0x208] sm:$0xff]  ;;  %v152_v53 = vld [vmem:[%s7075_s1 + $0x210] sm:$0xff] }
  0x13   :  { %81 = vst [vmem:[#allocation2 + $0x38] sm:$0xff] %v80_v17  ;;  %v154_v54 = vld [vmem:[%s7075_s1 + $0x218] sm:$0xff]  ;;  %v156_v55 = vld [vmem:[%s7075_s1 + $0x220] sm:$0xff]  ;;  %v158_v56 = vld [vmem:[%s7075_s1 + $0x230] sm:$0xff] }
  0x14   :  { %83 = vst [vmem:[#allocation2 + $0x10] sm:$0xff] %v82_v18  ;;  %v160_v57 = vld [vmem:[%s7075_s1 + $0x238] sm:$0xff]  ;;  %v162_v58 = vld [vmem:[%s7075_s1 + $0x240] sm:$0xff]  ;;  %v164_v59 = vld [vmem:[%s7075_s1 + $0x248] sm:$0xff] }
  0x15   :  { %85 = vst [vmem:[#allocation2 + $0x1b8] sm:$0xff] %v84_v19  ;;  %v166_v60 = vld [vmem:[%s7075_s1 + $0x258] sm:$0xff]  ;;  %v168_v61 = vld [vmem:[%s7075_s1 + $0x260] sm:$0xff]  ;;  %v170_v62 = vld [vmem:[%s7075_s1 + $0x268] sm:$0xff] }
  0x16   :  { %87 = vst [vmem:[#allocation2 + $0x248] sm:$0xff] %v86_v20  ;;  %v172_v63 = vld [vmem:[%s7075_s1 + $0x270] sm:$0xff]  ;;  %v4259_v0 = vld [vmem:[%s7075_s1 + $0x20] sm:$0xf]  ;;  %v4260_v1 = vld [vmem:[%s7075_s1 + $0x48] sm:$0xf] }
  0x17   :  { %89 = vst [vmem:[#allocation2 + $0x208] sm:$0xff] %v88_v21  ;;  %v4261_v2 = vld [vmem:[%s7075_s1 + $0x70] sm:$0xf]  ;;  %v4262_v3 = vld [vmem:[%s7075_s1 + $0x98] sm:$0xf] }
  0x18   :  { %91 = vst [vmem:[#allocation2 + $0x188] sm:$0xff] %v90_v22  ;;  %v4263_v4 = vld [vmem:[%s7075_s1 + $0xc0] sm:$0xf]  ;;  %v4264_v5 = vld [vmem:[%s7075_s1 + $0xe8] sm:$0xf] }
  0x19   :  { %93 = vst [vmem:[#allocation2 + $0x98] sm:$0xff] %v92_v23  ;;  %v4265_v6 = vld [vmem:[%s7075_s1 + $0x110] sm:$0xf]  ;;  %v4266_v7 = vld [vmem:[%s7075_s1 + $0x138] sm:$0xf] }
  0x1a   :  { %95 = vst [vmem:[#allocation2 + $0x1f0] sm:$0xff] %v94_v24  ;;  %v4267_v8 = vld [vmem:[%s7075_s1 + $0x160] sm:$0xf]  ;;  %v4268_v9 = vld [vmem:[%s7075_s1 + $0x188] sm:$0xf] }
  0x1b   :  { %97 = vst [vmem:[#allocation2 + $0x58] sm:$0xff] %v96_v25  ;;  %v4269_v10 = vld [vmem:[%s7075_s1 + $0x1b0] sm:$0xf]  ;;  %v4270_v11 = vld [vmem:[%s7075_s1 + $0x1d8] sm:$0xf] }
  0x1c   :  { %99 = vst [vmem:[#allocation2 + $0x80] sm:$0xff] %v98_v26  ;;  %v4271_v12 = vld [vmem:[%s7075_s1 + $0x200] sm:$0xf]  ;;  %v4272_v13 = vld [vmem:[%s7075_s1 + $0x228] sm:$0xf] }
  0x1d   :  { %101 = vst [vmem:[#allocation2 + $0x138] sm:$0xff] %v100_v27  ;;  %v4273_v14 = vld [vmem:[%s7075_s1 + $0x250] sm:$0xf]  ;;  %v4274_v15 = vld [vmem:[%s7075_s1 + $0x278] sm:$0xf] }
  0x1e   :  { %103 = vst [vmem:[#allocation2 + $0x1e8] sm:$0xff] %v102_v28 }
  0x1f   :  { %105 = vst [vmem:[#allocation2 + $0x1b0] sm:$0xff] %v104_v29 }
  0x20   :  { %107 = vst [vmem:[#allocation2 + $0xe0] sm:$0xff] %v106_v30 }
  0x21   :  { %109 = vst [vmem:[#allocation2 + $0x228] sm:$0xff] %v108_v31 }
  0x22   :  { %111 = vst [vmem:[#allocation2 + $0x130] sm:$0xff] %v110_v32 }
  0x23   :  { %113 = vst [vmem:[#allocation2 + $0xb8] sm:$0xff] %v112_v33 }
  0x24   :  { %115 = vst [vmem:[#allocation2 + $0x118] sm:$0xff] %v114_v34 }
  0x25   :  { %117 = vst [vmem:[#allocation2 + $0x1f8] sm:$0xff] %v116_v35 }
  0x26   :  { %119 = vst [vmem:[#allocation2 + $0x240] sm:$0xff] %v118_v36 }
  0x27   :  { %121 = vst [vmem:[#allocation2 + $0x258] sm:$0xff] %v120_v37 }
  0x28   :  { %123 = vst [vmem:[#allocation2 + $0x210] sm:$0xff] %v122_v38 }
  0x29   :  { %125 = vst [vmem:[#allocation2 + $0xe8] sm:$0xff] %v124_v39 }
  0x2a   :  { %127 = vst [vmem:[#allocation2] sm:$0xff] %v126_v40 }
  0x2b   :  { %129 = vst [vmem:[#allocation2 + $0x218] sm:$0xff] %v128_v41 }
  0x2c   :  { %131 = vst [vmem:[#allocation2 + $0xb0] sm:$0xff] %v130_v42 }
  0x2d   :  { %133 = vst [vmem:[#allocation2 + $0x250] sm:$0xff] %v132_v43 }
  0x2e   :  { %135 = vst [vmem:[#allocation2 + $0x260] sm:$0xff] %v134_v44 }
  0x2f   :  { %137 = vst [vmem:[#allocation2 + $0x40] sm:$0xff] %v136_v45 }
  0x30   :  { %139 = vst [vmem:[#allocation2 + $0x238] sm:$0xff] %v138_v46 }
  0x31   :  { %141 = vst [vmem:[#allocation2 + $0x18] sm:$0xff] %v140_v47 }
  0x32   :  { %143 = vst [vmem:[#allocation2 + $0x90] sm:$0xff] %v142_v48 }
  0x33   :  { %145 = vst [vmem:[#allocation2 + $0x268] sm:$0xff] %v144_v49 }
  0x34   :  { %147 = vst [vmem:[#allocation2 + $0xc8] sm:$0xff] %v146_v50 }
  0x35   :  { %149 = vst [vmem:[#allocation2 + $0x270] sm:$0xff] %v148_v51 }
  0x36   :  { %151 = vst [vmem:[#allocation2 + $0x68] sm:$0xff] %v150_v52 }
  0x37   :  { %153 = vst [vmem:[#allocation2 + $0x1d8] sm:$0xff] %v152_v53 }
  0x38   :  { %155 = vst [vmem:[#allocation2 + $0x200] sm:$0xff] %v154_v54 }
  0x39   :  { %157 = vst [vmem:[#allocation2 + $0x140] sm:$0xff] %v156_v55 }
  0x3a   :  { %159 = vst [vmem:[#allocation2 + $0x220] sm:$0xff] %v158_v56 }
  0x3b   :  { %161 = vst [vmem:[#allocation2 + $0x1c0] sm:$0xff] %v160_v57 }
  0x3c   :  { %163 = vst [vmem:[#allocation2 + $0x100] sm:$0xff] %v162_v58 }
  0x3d   :  { %165 = vst [vmem:[#allocation2 + $0x278] sm:$0xff] %v164_v59 }
  0x3e   :  { %167 = vst [vmem:[#allocation2 + $0x70] sm:$0xff] %v166_v60 }
  0x3f   :  { %169 = vst [vmem:[#allocation2 + $0x1e0] sm:$0xff] %v168_v61 }
  0x40   :  { %171 = vst [vmem:[#allocation2 + $0x178] sm:$0xff] %v170_v62 }
  0x41   :  { %173 = vst [vmem:[#allocation2 + $0x150] sm:$0xff] %v172_v63 }
  0x42   :  { %185 = vst [vmem:[#allocation2 + $0xd0] sm:$0xf] %v4259_v0 }
  0x43   :  { %187 = vst [vmem:[#allocation2 + $0x78] sm:$0xf] %v4260_v1 }
  0x44   :  { %189 = vst [vmem:[#allocation2 + $0x180] sm:$0xf] %v4261_v2 }
  0x45   :  { %191 = vst [vmem:[#allocation2 + $0x48] sm:$0xf] %v4262_v3 }
  0x46   :  { %193 = vst [vmem:[#allocation2 + $0x160] sm:$0xf] %v4263_v4 }
  0x47   :  { %195 = vst [vmem:[#allocation2 + $0xa8] sm:$0xf] %v4264_v5 }
  0x48   :  { %197 = vst [vmem:[#allocation2 + $0x158] sm:$0xf] %v4265_v6 }
  0x49   :  { %199 = vst [vmem:[#allocation2 + $0x170] sm:$0xf] %v4266_v7 }
  0x4a   :  { %201 = vst [vmem:[#allocation2 + $0x230] sm:$0xf] %v4267_v8 }
  0x4b   :  { %203 = vst [vmem:[#allocation2 + $0x110] sm:$0xf] %v4268_v9 }
  0x4c   :  { %205 = vst [vmem:[#allocation2 + $0x1c8] sm:$0xf] %v4269_v10 }
  0x4d   :  { %207 = vst [vmem:[#allocation2 + $0x1a0] sm:$0xf] %v4270_v11 }
  0x4e   :  { %209 = vst [vmem:[#allocation2 + $0x28] sm:$0xf] %v4271_v12 }
  0x4f   :  { %211 = vst [vmem:[#allocation2 + $0x1d0] sm:$0xf] %v4272_v13 }
  0x50   :  { %213 = vst [vmem:[#allocation2 + $0x60] sm:$0xf] %v4273_v14 }
  0x51   :  { %215 = vst [vmem:[#allocation2 + $0xd8] sm:$0xf] %v4274_v15 }
  0x52   :  { %219 = vsyncadd [#allocation3], 9216  ;;  %v229_v16 = vld [vmem:[%s7076_s2 + $0x38] sm:$0xff]  ;;  %v228_v17 = vld [vmem:[%s7076_s2 + $0x30] sm:$0xff]  ;;  %v7085_v27 = vmov 0.0   ;;  %vm234_vm0 = vcmask 523264  }
  0x53   :  { %249 = vmatpush.msra.mxu0 %v229_v16  ;;  %v227_v18 = vld [vmem:[%s7076_s2 + $0x28] sm:$0xff]  ;;  %v5188_v19 = vld [vmem:[%s7077_s3 + $0x18] sm:$0xff]  ;;  %v5194_v20 = vld [vmem:[%s7077_s3 + $0x10] sm:$0xff]  ;;  %vm375_vm9 = vcmask 1041409   ;;  %vm268_vm10 = vcmask 261120  }
  0x54   :  { %284 = vmatpush.msra.mxu1 %v5188_v19  ;;  %v226_v21 = vld [vmem:[%s7076_s2 + $0x20] sm:$0xff]  ;;  %v5202_v22 = vld [vmem:[%s7077_s3 + $0x8] sm:$0xff]  ;;  %393 = vmatpush.msra.mxu2 %v5188_v19  ;;  %v225_v23 = vld [vmem:[%s7076_s2 + $0x18] sm:$0xff] }
  0x55   :  { %250 = vmatpush.msra.mxu0 %v228_v17  ;;  %507 = vmatpush.msra.mxu3 %v5188_v19  ;;  %v5213_v24 = vld [vmem:[%s7077_s3] sm:$0xff]  ;;  %v224_v25 = vld [vmem:[%s7076_s2 + $0x10] sm:$0xff]  ;;  %v223_v26 = vld [vmem:[%s7076_s2 + $0x8] sm:$0xff] }
  0x56   :  { %285 = vmatpush.msra.mxu1 %v5194_v20  ;;  %394 = vmatpush.msra.mxu2 %v5194_v20  ;;  %v222_v28 = vld [vmem:[%s7076_s2] sm:$0xff]  ;;  %v221_v30 = vld [vmem:[%s7074_s0 + $0x8] sm:$0xff] }
  0x57   :  { %251 = vmatpush.msra.mxu0 %v227_v18  ;;  %508 = vmatpush.msra.mxu3 %v5194_v20  ;;  %v220_v29 = vld [vmem:[%s7074_s0] sm:$0xff]  ;;  %s4875_s0 = smov 32  }
  0x58   :  { %286 = vmatpush.msra.mxu1 %v5202_v22  ;;  %395 = vmatpush.msra.mxu2 %v5202_v22  ;;  %v4337_v33 = vld [vmem:[%s7078_s4] ss:$0 sm:$0xff]  ;;  %s4876_s4 = smov 64  }
  0x59   :  { %252 = vmatpush.msra.mxu0 %v226_v21  ;;  %509 = vmatpush.msra.mxu3 %v5202_v22 }
  0x5a   :  { %287 = vmatpush.msra.mxu1 %v5213_v24  ;;  %396 = vmatpush.msra.mxu2 %v5213_v24 }
  0x5b   :  { %253 = vmatpush.msra.mxu0 %v225_v23  ;;  %288 = vmatmul.f32.vlgmr.msra.gmra.mxu1 %v7085_v27 }
  0x5c   :  { %510 = vmatpush.msra.mxu3 %v5213_v24  ;;  %623 = vmatpush.msrb.mxu1 %v5188_v19 }
  0x5d   :  { %254 = vmatpush.msra.mxu0 %v224_v25  ;;  %739 = vmatpush.msrb.mxu2 %v5188_v19 }
  0x5e   :  { %855 = vmatpush.msrb.mxu3 %v5188_v19  ;;  %624 = vmatpush.msrb.mxu1 %v5194_v20 }
  0x5f   :  { %255 = vmatpush.msra.mxu0 %v223_v26  ;;  %740 = vmatpush.msrb.mxu2 %v5194_v20 }
  0x60   :  { %856 = vmatpush.msrb.mxu3 %v5194_v20  ;;  %625 = vmatpush.msrb.mxu1 %v5202_v22 }
  0x61   :  { %256 = vmatpush.msra.mxu0 %v222_v28  ;;  %741 = vmatpush.msrb.mxu2 %v5202_v22 }
  0x62   :  { %4275 = vmatmul.msk.f32.vlgmr.msra.gmra.mxu0 %vm234_vm0, %v220_v29  ;;  %857 = vmatpush.msrb.mxu3 %v5202_v22 }
  0x63   :  { %626 = vmatpush.msrb.mxu1 %v5213_v24  ;;  %742 = vmatpush.msrb.mxu2 %v5213_v24 }
  0x64   :  { %858 = vmatpush.msrb.mxu3 %v5213_v24 }
  0x65   :  { %971 = vmatpush.msra.mxu1 %v5188_v19 }
  0x67   :  { %972 = vmatpush.msra.mxu1 %v5194_v20 }
  0x69   :  { %973 = vmatpush.msra.mxu1 %v5202_v22 }
  0x6a   :  { %4276 = vmatmul.msk.f32.gmra.mxu0 %vm234_vm0, %v221_v30 }
  0x6b   :  { %974 = vmatpush.msra.mxu1 %v5213_v24 }
  0xd8   :  { %v289_v32 = vpop.f32.mrf.mxu1 }
  0xd9   :  { %v293_v34 = vrot.slane %v289_v32, 1 }
  0xdf   :  { %v258_v31 = vpop.f32.mrf.mxu0 }
  0xe0   :  { %v5263_v38 = vadd.f32 %v4337_v33, %v258_v31 }
  0xe2   :  { %v296_v39 = vadd.f32 %v289_v32, %v5263_v38 }
  0xe4   :  { %v4277_v43 = vmul.f32 -1.442695, %v296_v39 }
  0xe7   :  { %v261_v35 = vpop.f32.mrf.mxu0 }
  0xe8   :  { %v5260_v36 = vadd.f32 %v4337_v33, %v261_v35 }
  0xea   :  { %v297_v37 = vadd.f32 %v293_v34, %v5260_v36 }
  0xec   :  { %4338 = vtanh.f32 %v297_v37  ;;  %v4278_v42 = vmul.f32 -1.442695, %v297_v37 }
  0xed   :  { %4340 = vtanh.f32 %v296_v39 }
  0xee   :  { %4342 = vpow2.f32 %v4278_v42 }
  0xef   :  { %4344 = vpow2.f32 %v4277_v43 }
  0xf2   :  { %v4339_v40 = vpop.eup %4338 }
  0xf3   :  { %344 = vrot.lane.b32.xlu0 %v4339_v40, %s4875_s0  ;;  %v4341_v41 = vpop.eup %4340 }
  0xf4   :  { %v4343_v44 = vpop.eup %4342 }
  0xf5   :  { %v305_v45 = vadd.f32 1.0, %v4343_v44  ;;  %v4345_v46 = vpop.eup %4344 }
  0xf6   :  { %v304_v47 = vadd.f32 1.0, %v4345_v46 }
  0xf7   :  { %4346 = vrcp.f32 %v305_v45  ;;  %v332_v56 = vand.u32 2147483648, %v305_v45  ;;  %vm326_vm2 = vweird.f32 %v305_v45  ;;  %v330_v57 = vand.u32 2147483647, %v305_v45 }
  0xf8   :  { %4348 = vrcp.f32 %v304_v47  ;;  %v317_v1 = vand.u32 2147483648, %v304_v47  ;;  %vm311_vm6 = vweird.f32 %v304_v47  ;;  %v315_v2 = vand.u32 2147483647, %v304_v47 }
  0xf9   :  { %v333_v60 = vor.u32 1.1754944e-38, %v332_v56  ;;  %vm331_vm4 = vcmp.eq.f32.partialorder %v330_v57, 8.507059e+37 }
  0xfa   :  { %v318_v4 = vor.u32 1.1754944e-38, %v317_v1  ;;  %vm316_vm8 = vcmp.eq.f32.partialorder %v315_v2, 8.507059e+37 }
  0xfb   :  { %342 = vrot.lane.b32.xlu0 %v4341_v41, %s4875_s0 }
  0xfd   :  { %v4347_v48 = vpop.eup %4346 }
  0xfe   :  { %v322_v49 = vmul.f32 %v4347_v48, %v305_v45  ;;  %v4349_v51 = vpop.eup %4348  ;;  %vm327_vm1 = vweird.f32 %v4347_v48 }
  0xff   :  { %v307_v53 = vmul.f32 %v4349_v51, %v304_v47  ;;  %vm328_vm3 = vmor %vm326_vm2, %vm327_vm1  ;;  %vm312_vm5 = vweird.f32 %v4349_v51 }
 0x100   :  { %v323_v50 = vsub.f32 1.0, %v322_v49  ;;  %vm313_vm7 = vmor %vm311_vm6, %vm312_vm5 }
 0x101   :  { %v308_v55 = vsub.f32 1.0, %v307_v53 }
 0x102   :  { %v324_v52 = vmul.f32 %v4347_v48, %v323_v50 }
 0x103   :  { %v309_v59 = vmul.f32 %v4349_v51, %v308_v55 }
 0x104   :  { %v325_v54 = vadd.f32 %v4347_v48, %v324_v52 }
 0x105   :  { %v310_v0 = vadd.f32 %v4349_v51, %v309_v59 }
 0x106   :  { %v329_v58 = vsel %vm328_vm3, %v4347_v48, %v325_v54 }
 0x107   :  { %v334_v62 = vsel %vm331_vm4, %v333_v60, %v329_v58  ;;  %v314_v3 = vsel %vm313_vm7, %v4349_v51, %v310_v0 }
 0x108   :  { %v319_v6 = vsel %vm316_vm8, %v318_v4, %v314_v3  ;;  %v339_v8 = vmul.f32 0.0, %v334_v62 }
 0x109   :  { %v338_v11 = vmul.f32 0.0, %v319_v6 }
 0x165   :  { %v345_v61 = vpop.permute.xlu0 %344 }
 0x166   :  { %v349_v63 = vmul.f32 %v345_v61, %v334_v62 }
 0x168   :  { %354 = vrot.lane.b32.xlu1 %v349_v63, %s4875_s0 }
 0x16d   :  { %v343_v5 = vpop.permute.xlu0 %342 }
 0x16e   :  { %v348_v7 = vmul.f32 %v343_v5, %v319_v6 }
 0x170   :  { %352 = vrot.lane.b32.xlu1 %v348_v7, %s4875_s0 }
 0x1da   :  { %v355_v9 = vpop.permute.xlu1 %354 }
 0x1db   :  { %v5270_v10 = vadd.f32 %v355_v9, %v339_v8 }
 0x1dd   :  { %4350 = vtanh.f32 %v5270_v10 }
 0x1e2   :  { %v353_v12 = vpop.permute.xlu1 %352 }
 0x1e3   :  { %v4351_v13 = vpop.eup %4350  ;;  %v5273_v14 = vadd.f32 %v353_v12, %v338_v11 }
 0x1e4   :  { %366 = vrot.lane.b32.xlu2 %v4351_v13, %s4875_s0 }
 0x1e5   :  { %4352 = vtanh.f32 %v5273_v14  ;;  %v449_v3 = vrot.slane %v5273_v14, 7 }
 0x1eb   :  { %v4353_v15 = vpop.eup %4352 }
 0x1ec   :  { %364 = vrot.lane.b32.xlu2 %v4353_v15, %s4875_s0 }
 0x23e   :  { %v367_v16 = vpop.permute.xlu2 %366 }
 0x23f   :  { %v5278_v17 = vmul.f32 %v367_v16, %v334_v62  ;;  %v450_v62 = vrot.slane %v5270_v10, 7 }
 0x241   :  { %v374_v21 = vrot.slane %v5278_v17, 7 }
 0x246   :  { %v365_v18 = vpop.permute.xlu2 %364 }
 0x247   :  { %v5281_v23 = vmul.f32 %v365_v18, %v319_v6 }
 0x249   :  { %v376_v25 = vsel %vm375_vm9, %v374_v21, %v5281_v23 }
 0x24a   :  { %377 = vrot.lane.b32.xlu0 %v376_v25, %s4876_s4 }
 0x2bc   :  { %v378_v26 = vpop.permute.xlu0 %377 }
 0x2bd   :  { %4279 = vmatmul.msk.f32.vlgmr.msra.gmra.mxu2 %vm268_vm10, %v378_v26 }
 0x2be   :  { %1087 = vmatpush.msra.mxu2 %v5188_v19 }
 0x2c0   :  { %1088 = vmatpush.msra.mxu2 %v5194_v20 }
 0x2c2   :  { %1089 = vmatpush.msra.mxu2 %v5202_v22 }
 0x2c4   :  { %1090 = vmatpush.msra.mxu2 %v5213_v24 }
 0x340   :  { %v398_v28 = vpop.f32.mrf.mxu2 }
 0x341   :  { %v402_v29 = vrot.slane %v398_v28, 7  ;;  %v406_v30 = vadd.f32 %v398_v28, %v5260_v36 }
 0x343   :  { %v405_v31 = vadd.f32 %v402_v29, %v5263_v38  ;;  %4354 = vtanh.f32 %v406_v30  ;;  %v4281_v19 = vmul.f32 -1.442695, %v406_v30 }
 0x345   :  { %4356 = vtanh.f32 %v405_v31  ;;  %v4280_v35 = vmul.f32 -1.442695, %v405_v31 }
 0x346   :  { %4358 = vpow2.f32 %v4281_v19 }
 0x349   :  { %v4355_v32 = vpop.eup %4354 }
 0x34a   :  { %459 = vrot.lane.b32.xlu2 %v4355_v32, %s4875_s0 }
 0x34b   :  { %v4357_v33 = vpop.eup %4356 }
 0x34c   :  { %457 = vrot.lane.b32.xlu1 %v4357_v33, %s4875_s0  ;;  %v4359_v20 = vpop.eup %4358 }
 0x34d   :  { %v414_v22 = vadd.f32 1.0, %v4359_v20 }
 0x34f   :  { %4360 = vrcp.f32 %v414_v22  ;;  %v441_v42 = vand.u32 2147483648, %v414_v22  ;;  %vm435_vm12 = vweird.f32 %v414_v22  ;;  %v439_v44 = vand.u32 2147483647, %v414_v22 }
 0x350   :  { %4362 = vpow2.f32 %v4280_v35 }
 0x351   :  { %v442_v46 = vor.u32 1.1754944e-38, %v441_v42  ;;  %vm440_vm14 = vcmp.eq.f32.partialorder %v439_v44, 8.507059e+37 }
 0x355   :  { %v4361_v24 = vpop.eup %4360 }
 0x356   :  { %v431_v34 = vmul.f32 %v4361_v24, %v414_v22  ;;  %v4363_v40 = vpop.eup %4362  ;;  %vm436_vm11 = vweird.f32 %v4361_v24 }
 0x357   :  { %v413_v43 = vadd.f32 1.0, %v4363_v40  ;;  %vm437_vm13 = vmor %vm435_vm12, %vm436_vm11 }
 0x358   :  { %v432_v37 = vsub.f32 1.0, %v431_v34 }
 0x359   :  { %4364 = vrcp.f32 %v413_v43  ;;  %v426_v55 = vand.u32 2147483648, %v413_v43  ;;  %vm420_vm1 = vweird.f32 %v413_v43  ;;  %v424_v56 = vand.u32 2147483647, %v413_v43 }
 0x35a   :  { %v433_v39 = vmul.f32 %v4361_v24, %v432_v37 }
 0x35b   :  { %v427_v58 = vor.u32 1.1754944e-38, %v426_v55  ;;  %vm425_vm3 = vcmp.eq.f32.partialorder %v424_v56, 8.507059e+37 }
 0x35c   :  { %v434_v41 = vadd.f32 %v4361_v24, %v433_v39 }
 0x35e   :  { %v438_v45 = vsel %vm437_vm13, %v4361_v24, %v434_v41 }
 0x35f   :  { %v443_v48 = vsel %vm440_vm14, %v442_v46, %v438_v45  ;;  %v4365_v50 = vpop.eup %4364  ;;  %vm1182_vm14 = vcmask 1040384  }
 0x360   :  { %v416_v51 = vmul.f32 %v4365_v50, %v413_v43  ;;  %vm421_vm15 = vweird.f32 %v4365_v50  ;;  %v454_v63 = vmul.f32 %v450_v62, %v443_v48 }
 0x361   :  { %vm422_vm2 = vmor %vm420_vm1, %vm421_vm15  ;;  %vm7105_vm15 = vcmask 1041408  }
 0x362   :  { %v417_v52 = vsub.f32 1.0, %v416_v51 }
 0x364   :  { %v418_v53 = vmul.f32 %v4365_v50, %v417_v52 }
 0x366   :  { %v419_v54 = vadd.f32 %v4365_v50, %v418_v53 }
 0x368   :  { %v423_v57 = vsel %vm422_vm2, %v4365_v50, %v419_v54 }
 0x369   :  { %v428_v60 = vsel %vm425_vm3, %v427_v58, %v423_v57 }
 0x36a   :  { %v453_v4 = vmul.f32 %v449_v3, %v428_v60 }
 0x3a4   :  { %v460_v47 = vpop.permute.xlu2 %459 }
 0x3a5   :  { %v464_v49 = vmul.f32 %v460_v47, %v443_v48 }
 0x3a7   :  { %469 = vrot.lane.b32.xlu1 %v464_v49, %s4875_s0 }
 0x3be   :  { %v458_v59 = vpop.permute.xlu1 %457 }
 0x3bf   :  { %v463_v61 = vmul.f32 %v458_v59, %v428_v60 }
 0x3c1   :  { %467 = vrot.lane.b32.xlu0 %v463_v61, %s4875_s0 }
 0x419   :  { %v470_v0 = vpop.permute.xlu1 %469 }
 0x41a   :  { %v5298_v1 = vadd.f32 %v470_v0, %v454_v63 }
 0x41c   :  { %4366 = vtanh.f32 %v5298_v1  ;;  %v565_v58 = vrot.slane %v5298_v1, 7 }
 0x422   :  { %v4367_v2 = vpop.eup %4366 }
 0x423   :  { %481 = vrot.lane.b32.xlu0 %v4367_v2, %s4875_s0 }
 0x433   :  { %v468_v5 = vpop.permute.xlu0 %467 }
 0x434   :  { %v5303_v6 = vadd.f32 %v468_v5, %v453_v4 }
 0x436   :  { %4368 = vtanh.f32 %v5303_v6  ;;  %v564_v57 = vrot.slane %v5303_v6, 7 }
 0x43c   :  { %v4369_v7 = vpop.eup %4368 }
 0x43d   :  { %479 = vrot.lane.b32.xlu2 %v4369_v7, %s4875_s0 }
 0x495   :  { %v482_v8 = vpop.permute.xlu0 %481 }
 0x496   :  { %v5309_v11 = vmul.f32 %v482_v8, %v443_v48 }
 0x497   :  { %v480_v9 = vpop.permute.xlu2 %479 }
 0x498   :  { %v5307_v10 = vmul.f32 %v480_v9, %v428_v60  ;;  %v1184_v8 = vsel %vm1182_vm14, %v5278_v17, %v5309_v11 }
 0x49a   :  { %v489_v12 = vrot.slane %v5307_v10, 1  ;;  %v1183_v6 = vsel %vm1182_vm14, %v5281_v23, %v5307_v10 }
 0x49c   :  { %v490_v13 = vsel %vm375_vm9, %v5309_v11, %v489_v12 }
 0x49d   :  { %491 = vrot.lane.b32.xlu1 %v490_v13, %s4876_s4 }
 0x50f   :  { %v492_v14 = vpop.permute.xlu1 %491 }
 0x510   :  { %4282 = vmatmul.msk.f32.vlgmr.msra.gmra.mxu3 %vm268_vm10, %v492_v14 }
 0x593   :  { %v512_v15 = vpop.f32.mrf.mxu3 }
 0x594   :  { %v516_v16 = vrot.slane %v512_v15, 6  ;;  %v517_v18 = vrot.slane %v512_v15, 7 }
 0x596   :  { %v520_v21 = vadd.f32 %v516_v16, %v5263_v38  ;;  %v521_v25 = vadd.f32 %v517_v18, %v5260_v36 }
 0x598   :  { %4370 = vtanh.f32 %v520_v21  ;;  %v4283_v29 = vmul.f32 -1.442695, %v520_v21  ;;  %v4284_v33 = vmul.f32 -1.442695, %v521_v25 }
 0x599   :  { %4372 = vtanh.f32 %v521_v25 }
 0x59a   :  { %4374 = vpow2.f32 %v4283_v29 }
 0x59e   :  { %v4371_v26 = vpop.eup %4370 }
 0x59f   :  { %v4373_v28 = vpop.eup %4372  ;;  %572 = vrot.lane.b32.xlu2 %v4371_v26, %s4875_s0 }
 0x5a0   :  { %574 = vrot.lane.b32.xlu0 %v4373_v28, %s4875_s0  ;;  %v4375_v30 = vpop.eup %4374 }
 0x5a1   :  { %v528_v31 = vadd.f32 1.0, %v4375_v30 }
 0x5a3   :  { %4376 = vrcp.f32 %v528_v31  ;;  %v541_v37 = vand.u32 2147483648, %v528_v31  ;;  %vm535_vm5 = vweird.f32 %v528_v31  ;;  %v539_v39 = vand.u32 2147483647, %v528_v31 }
 0x5a4   :  { %4378 = vpow2.f32 %v4284_v33 }
 0x5a5   :  { %v542_v41 = vor.u32 1.1754944e-38, %v541_v37  ;;  %vm540_vm7 = vcmp.eq.f32.partialorder %v539_v39, 8.507059e+37 }
 0x5a9   :  { %v4377_v32 = vpop.eup %4376 }
 0x5aa   :  { %v531_v19 = vmul.f32 %v4377_v32, %v528_v31  ;;  %v4379_v24 = vpop.eup %4378  ;;  %vm536_vm4 = vweird.f32 %v4377_v32 }
 0x5ab   :  { %v529_v34 = vadd.f32 1.0, %v4379_v24  ;;  %vm537_vm6 = vmor %vm535_vm5, %vm536_vm4 }
 0x5ac   :  { %v532_v20 = vsub.f32 1.0, %v531_v19 }
 0x5ad   :  { %4380 = vrcp.f32 %v529_v34  ;;  %v556_v50 = vand.u32 2147483648, %v529_v34  ;;  %vm550_vm11 = vweird.f32 %v529_v34  ;;  %v554_v51 = vand.u32 2147483647, %v529_v34 }
 0x5ae   :  { %v533_v22 = vmul.f32 %v4377_v32, %v532_v20 }
 0x5af   :  { %v557_v53 = vor.u32 1.1754944e-38, %v556_v50  ;;  %vm555_vm13 = vcmp.eq.f32.partialorder %v554_v51, 8.507059e+37 }
 0x5b0   :  { %v534_v35 = vadd.f32 %v4377_v32, %v533_v22 }
 0x5b2   :  { %v538_v40 = vsel %vm537_vm6, %v4377_v32, %v534_v35 }
 0x5b3   :  { %v543_v43 = vsel %vm540_vm7, %v542_v41, %v538_v40  ;;  %v4381_v45 = vpop.eup %4380 }
 0x5b4   :  { %v546_v46 = vmul.f32 %v4381_v45, %v529_v34  ;;  %vm551_vm8 = vweird.f32 %v4381_v45  ;;  %v568_v59 = vmul.f32 %v564_v57, %v543_v43 }
 0x5b5   :  { %vm552_vm12 = vmor %vm550_vm11, %vm551_vm8  ;;  %vm7104_vm11 = vcmask 1042432  }
 0x5b6   :  { %v547_v47 = vsub.f32 1.0, %v546_v46 }
 0x5b8   :  { %v548_v48 = vmul.f32 %v4381_v45, %v547_v47 }
 0x5ba   :  { %v549_v49 = vadd.f32 %v4381_v45, %v548_v48 }
 0x5bc   :  { %v553_v52 = vsel %vm552_vm12, %v4381_v45, %v549_v49 }
 0x5bd   :  { %v558_v55 = vsel %vm555_vm13, %v557_v53, %v553_v52 }
 0x5be   :  { %v569_v60 = vmul.f32 %v565_v58, %v558_v55 }
 0x5f9   :  { %v573_v42 = vpop.permute.xlu2 %572 }
 0x5fa   :  { %v578_v44 = vmul.f32 %v573_v42, %v543_v43 }
 0x5fc   :  { %582 = vrot.lane.b32.xlu1 %v578_v44, %s4875_s0 }
 0x612   :  { %v575_v54 = vpop.permute.xlu0 %574 }
 0x613   :  { %v579_v56 = vmul.f32 %v575_v54, %v558_v55 }
 0x615   :  { %584 = vrot.lane.b32.xlu2 %v579_v56, %s4875_s0 }
 0x66e   :  { %v583_v61 = vpop.permute.xlu1 %582 }
 0x66f   :  { %v585_v62 = vpop.permute.xlu2 %584  ;;  %v5324_v63 = vadd.f32 %v583_v61, %v568_v59 }
 0x670   :  { %v5326_v0 = vadd.f32 %v585_v62, %v569_v60 }
 0x671   :  { %4382 = vtanh.f32 %v5324_v63 }
 0x672   :  { %4384 = vtanh.f32 %v5326_v0  ;;  %v681_v60 = vrot.slane %v5326_v0, 7 }
 0x677   :  { %v4383_v2 = vpop.eup %4382 }
 0x678   :  { %v4385_v3 = vpop.eup %4384  ;;  %594 = vrot.lane.b32.xlu0 %v4383_v2, %s4875_s0 }
 0x679   :  { %596 = vrot.lane.b32.xlu1 %v4385_v3, %s4875_s0 }
 0x6ea   :  { %v595_v1 = vpop.permute.xlu0 %594 }
 0x6eb   :  { %v597_v4 = vpop.permute.xlu1 %596  ;;  %v600_v5 = vmul.f32 %v595_v1, %v543_v43 }
 0x6ec   :  { %v601_v7 = vmul.f32 %v597_v4, %v558_v55  ;;  %v680_v55 = vrot.slane %v5324_v63, 7 }
 0x6ed   :  { %v604_v9 = vrot.slane %v600_v5, 2  ;;  %v5339_v12 = vsel %vm7105_vm15, %v1183_v6, %v600_v5 }
 0x6ee   :  { %v605_v13 = vrot.slane %v601_v7, 1  ;;  %v5342_v14 = vsel %vm7105_vm15, %v1184_v8, %v601_v7 }
 0x6f0   :  { %v606_v15 = vsel %vm375_vm9, %v605_v13, %v604_v9 }
 0x6f1   :  { %607 = vrot.lane.b32.xlu2 %v606_v15, %s4876_s4 }
 0x74b   :  { %v608_v16 = vpop.permute.xlu2 %607 }
 0x74c   :  { %4285 = vmatmul.msk.f32.vlgmr.msrb.gmra.mxu1 %vm268_vm10, %v608_v16 }
 0x7c9   :  { %v628_v23 = vpop.f32.mrf.mxu1 }
 0x7ca   :  { %v632_v10 = vrot.slane %v628_v23, 5  ;;  %v633_v18 = vrot.slane %v628_v23, 6 }
 0x7cc   :  { %v636_v17 = vadd.f32 %v632_v10, %v5263_v38  ;;  %v637_v11 = vadd.f32 %v633_v18, %v5260_v36 }
 0x7ce   :  { %4386 = vtanh.f32 %v636_v17  ;;  %v4286_v26 = vmul.f32 -1.442695, %v636_v17  ;;  %v4287_v28 = vmul.f32 -1.442695, %v637_v11 }
 0x7cf   :  { %4388 = vtanh.f32 %v637_v11 }
 0x7d0   :  { %4390 = vpow2.f32 %v4286_v26 }
 0x7d1   :  { %4392 = vpow2.f32 %v4287_v28 }
 0x7d4   :  { %v4387_v21 = vpop.eup %4386 }
 0x7d5   :  { %v4389_v25 = vpop.eup %4388  ;;  %688 = vrot.lane.b32.xlu0 %v4387_v21, %s4875_s0 }
 0x7d6   :  { %690 = vrot.lane.b32.xlu1 %v4389_v25, %s4875_s0  ;;  %v4391_v29 = vpop.eup %4390 }
 0x7d7   :  { %v4393_v30 = vpop.eup %4392  ;;  %v644_v31 = vadd.f32 1.0, %v4391_v29 }
 0x7d8   :  { %v645_v32 = vadd.f32 1.0, %v4393_v30 }
 0x7d9   :  { %4394 = vrcp.f32 %v644_v31  ;;  %v657_v41 = vand.u32 2147483648, %v644_v31  ;;  %vm651_vm3 = vweird.f32 %v644_v31  ;;  %v655_v43 = vand.u32 2147483647, %v644_v31 }
 0x7da   :  { %4396 = vrcp.f32 %v645_v32  ;;  %v672_v42 = vand.u32 2147483648, %v645_v32  ;;  %vm666_vm4 = vweird.f32 %v645_v32  ;;  %v670_v44 = vand.u32 2147483647, %v645_v32 }
 0x7db   :  { %v658_v47 = vor.u32 1.1754944e-38, %v657_v41  ;;  %vm656_vm7 = vcmp.eq.f32.partialorder %v655_v43, 8.507059e+37 }
 0x7dc   :  { %v673_v48 = vor.u32 1.1754944e-38, %v672_v42  ;;  %vm671_vm8 = vcmp.eq.f32.partialorder %v670_v44, 8.507059e+37 }
 0x7df   :  { %v4395_v33 = vpop.eup %4394 }
 0x7e0   :  { %v4397_v19 = vpop.eup %4396  ;;  %v647_v20 = vmul.f32 %v4395_v33, %v644_v31  ;;  %vm652_vm1 = vweird.f32 %v4395_v33 }
 0x7e1   :  { %v662_v22 = vmul.f32 %v4397_v19, %v645_v32  ;;  %vm667_vm2 = vweird.f32 %v4397_v19  ;;  %vm653_vm5 = vmor %vm651_vm3, %vm652_vm1 }
 0x7e2   :  { %v648_v24 = vsub.f32 1.0, %v647_v20  ;;  %vm668_vm6 = vmor %vm666_vm4, %vm667_vm2 }
 0x7e3   :  { %v663_v34 = vsub.f32 1.0, %v662_v22 }
 0x7e4   :  { %v649_v35 = vmul.f32 %v4395_v33, %v648_v24 }
 0x7e5   :  { %v664_v37 = vmul.f32 %v4397_v19, %v663_v34 }
 0x7e6   :  { %v650_v39 = vadd.f32 %v4395_v33, %v649_v35 }
 0x7e7   :  { %v665_v40 = vadd.f32 %v4397_v19, %v664_v37 }
 0x7e8   :  { %v654_v45 = vsel %vm653_vm5, %v4395_v33, %v650_v39 }
 0x7e9   :  { %v669_v46 = vsel %vm668_vm6, %v4397_v19, %v665_v40  ;;  %v659_v50 = vsel %vm656_vm7, %v658_v47, %v654_v45  ;;  %vm7103_vm7 = vcmask 1043456  }
 0x7ea   :  { %v674_v52 = vsel %vm671_vm8, %v673_v48, %v669_v46  ;;  %v684_v56 = vmul.f32 %v680_v55, %v659_v50 }
 0x7eb   :  { %v685_v61 = vmul.f32 %v681_v60, %v674_v52 }
 0x847   :  { %v689_v49 = vpop.permute.xlu0 %688 }
 0x848   :  { %v691_v51 = vpop.permute.xlu1 %690  ;;  %v694_v53 = vmul.f32 %v689_v49, %v659_v50 }
 0x849   :  { %v695_v54 = vmul.f32 %v691_v51, %v674_v52 }
 0x84a   :  { %698 = vrot.lane.b32.xlu2 %v694_v53, %s4875_s0 }
 0x84b   :  { %700 = vrot.lane.b32.xlu0 %v695_v54, %s4875_s0 }
 0x8a4   :  { %v699_v57 = vpop.permute.xlu2 %698 }
 0x8a5   :  { %v5354_v58 = vadd.f32 %v699_v57, %v684_v56 }
 0x8a7   :  { %4398 = vtanh.f32 %v5354_v58  ;;  %v796_v56 = vrot.slane %v5354_v58, 7 }
 0x8ad   :  { %v4399_v59 = vpop.eup %4398 }
 0x8ae   :  { %710 = vrot.lane.b32.xlu1 %v4399_v59, %s4875_s0 }
 0x8bd   :  { %v701_v62 = vpop.permute.xlu0 %700 }
 0x8be   :  { %v5359_v2 = vadd.f32 %v701_v62, %v685_v61 }
 0x8c0   :  { %4400 = vtanh.f32 %v5359_v2  ;;  %v797_v51 = vrot.slane %v5359_v2, 7 }
 0x8c6   :  { %v4401_v3 = vpop.eup %4400 }
 0x8c7   :  { %712 = vrot.lane.b32.xlu2 %v4401_v3, %s4875_s0 }
 0x920   :  { %v711_v63 = vpop.permute.xlu1 %710 }
 0x921   :  { %v713_v1 = vpop.permute.xlu2 %712  ;;  %v716_v4 = vmul.f32 %v711_v63, %v659_v50 }
 0x922   :  { %v717_v5 = vmul.f32 %v713_v1, %v674_v52 }
 0x923   :  { %v720_v6 = vrot.slane %v716_v4, 3  ;;  %v5365_v7 = vsel %vm7104_vm11, %v5339_v12, %v716_v4 }
 0x924   :  { %v721_v0 = vrot.slane %v717_v5, 2  ;;  %v5369_v8 = vsel %vm7104_vm11, %v5342_v14, %v717_v5 }
 0x926   :  { %v722_v9 = vsel %vm375_vm9, %v721_v0, %v720_v6 }
 0x927   :  { %723 = vrot.lane.b32.xlu0 %v722_v9, %s4876_s4 }
 0x999   :  { %v724_v13 = vpop.permute.xlu0 %723 }
 0x99a   :  { %4288 = vmatmul.msk.f32.vlgmr.msrb.gmra.mxu2 %vm268_vm10, %v724_v13 }
 0xa1d   :  { %v744_v15 = vpop.f32.mrf.mxu2 }
 0xa1e   :  { %v748_v16 = vrot.slane %v744_v15, 4  ;;  %v749_v23 = vrot.slane %v744_v15, 5 }
 0xa20   :  { %v752_v10 = vadd.f32 %v748_v16, %v5263_v38  ;;  %v753_v12 = vadd.f32 %v749_v23, %v5260_v36 }
 0xa22   :  { %4402 = vtanh.f32 %v752_v10  ;;  %v4290_v14 = vmul.f32 -1.442695, %v753_v12  ;;  %v4289_v26 = vmul.f32 -1.442695, %v752_v10 }
 0xa23   :  { %4404 = vtanh.f32 %v753_v12 }
 0xa24   :  { %4406 = vpow2.f32 %v4290_v14 }
 0xa28   :  { %v4403_v18 = vpop.eup %4402 }
 0xa29   :  { %v4405_v17 = vpop.eup %4404  ;;  %804 = vrot.lane.b32.xlu1 %v4403_v18, %s4875_s0 }
 0xa2a   :  { %806 = vrot.lane.b32.xlu2 %v4405_v17, %s4875_s0  ;;  %v4407_v11 = vpop.eup %4406 }
 0xa2b   :  { %v761_v21 = vadd.f32 1.0, %v4407_v11 }
 0xa2d   :  { %4408 = vrcp.f32 %v761_v21  ;;  %v788_v19 = vand.u32 2147483648, %v761_v21  ;;  %vm782_vm13 = vweird.f32 %v761_v21  ;;  %v786_v20 = vand.u32 2147483647, %v761_v21 }
 0xa2e   :  { %4410 = vpow2.f32 %v4289_v26 }
 0xa2f   :  { %v789_v24 = vor.u32 1.1754944e-38, %v788_v19  ;;  %vm787_vm2 = vcmp.eq.f32.partialorder %v786_v20, 8.507059e+37 }
 0xa33   :  { %v4409_v25 = vpop.eup %4408 }
 0xa34   :  { %v778_v28 = vmul.f32 %v4409_v25, %v761_v21  ;;  %v4411_v30 = vpop.eup %4410  ;;  %vm783_vm12 = vweird.f32 %v4409_v25 }
 0xa35   :  { %v760_v32 = vadd.f32 1.0, %v4411_v30  ;;  %vm784_vm1 = vmor %vm782_vm13, %vm783_vm12 }
 0xa36   :  { %v779_v29 = vsub.f32 1.0, %v778_v28 }
 0xa37   :  { %4412 = vrcp.f32 %v760_v32  ;;  %v773_v44 = vand.u32 2147483648, %v760_v32  ;;  %vm767_vm4 = vweird.f32 %v760_v32  ;;  %v771_v45 = vand.u32 2147483647, %v760_v32 }
 0xa38   :  { %v780_v31 = vmul.f32 %v4409_v25, %v779_v29 }
 0xa39   :  { %v774_v47 = vor.u32 1.1754944e-38, %v773_v44  ;;  %vm772_vm6 = vcmp.eq.f32.partialorder %v771_v45, 8.507059e+37 }
 0xa3a   :  { %v781_v33 = vadd.f32 %v4409_v25, %v780_v31 }
 0xa3c   :  { %v785_v22 = vsel %vm784_vm1, %v4409_v25, %v781_v33 }
 0xa3d   :  { %v790_v35 = vsel %vm787_vm2, %v789_v24, %v785_v22  ;;  %v4413_v37 = vpop.eup %4412 }
 0xa3e   :  { %v763_v40 = vmul.f32 %v4413_v37, %v760_v32  ;;  %vm768_vm3 = vweird.f32 %v4413_v37  ;;  %v801_v52 = vmul.f32 %v797_v51, %v790_v35 }
 0xa3f   :  { %vm769_vm5 = vmor %vm767_vm4, %vm768_vm3 }
 0xa40   :  { %v764_v41 = vsub.f32 1.0, %v763_v40 }
 0xa42   :  { %v765_v42 = vmul.f32 %v4413_v37, %v764_v41 }
 0xa44   :  { %v766_v43 = vadd.f32 %v4413_v37, %v765_v42 }
 0xa46   :  { %v770_v46 = vsel %vm769_vm5, %v4413_v37, %v766_v43 }
 0xa47   :  { %v775_v49 = vsel %vm772_vm6, %v774_v47, %v770_v46  ;;  %vm7102_vm6 = vcmask 1044480  }
 0xa48   :  { %v800_v57 = vmul.f32 %v796_v56, %v775_v49 }
 0xa84   :  { %v807_v34 = vpop.permute.xlu2 %806 }
 0xa85   :  { %v811_v39 = vmul.f32 %v807_v34, %v790_v35 }
 0xa87   :  { %816 = vrot.lane.b32.xlu1 %v811_v39, %s4875_s0 }
 0xa9b   :  { %v805_v48 = vpop.permute.xlu1 %804 }
 0xa9c   :  { %v810_v50 = vmul.f32 %v805_v48, %v775_v49 }
 0xa9e   :  { %814 = vrot.lane.b32.xlu0 %v810_v50, %s4875_s0 }
 0xaf9   :  { %v817_v53 = vpop.permute.xlu1 %816 }
 0xafa   :  { %v5381_v54 = vadd.f32 %v817_v53, %v801_v52 }
 0xafc   :  { %4414 = vtanh.f32 %v5381_v54  ;;  %v913_v48 = vrot.slane %v5381_v54, 7 }
 0xb02   :  { %v4415_v55 = vpop.eup %4414 }
 0xb03   :  { %828 = vrot.lane.b32.xlu0 %v4415_v55, %s4875_s0 }
 0xb10   :  { %v815_v59 = vpop.permute.xlu0 %814 }
 0xb11   :  { %v5386_v60 = vadd.f32 %v815_v59, %v800_v57 }
 0xb13   :  { %4416 = vtanh.f32 %v5386_v60  ;;  %v912_v47 = vrot.slane %v5386_v60, 7 }
 0xb19   :  { %v4417_v61 = vpop.eup %4416 }
 0xb1a   :  { %826 = vrot.lane.b32.xlu2 %v4417_v61, %s4875_s0 }
 0xb74   :  { %v827_v62 = vpop.permute.xlu2 %826 }
 0xb75   :  { %v829_v2 = vpop.permute.xlu0 %828  ;;  %v832_v3 = vmul.f32 %v827_v62, %v775_v49 }
 0xb76   :  { %v833_v63 = vmul.f32 %v829_v2, %v790_v35 }
 0xb77   :  { %v836_v1 = vrot.slane %v832_v3, 4  ;;  %v5392_v4 = vsel %vm7103_vm7, %v5365_v7, %v832_v3 }
 0xb78   :  { %v837_v58 = vrot.slane %v833_v63, 3  ;;  %v5396_v5 = vsel %vm7103_vm7, %v5369_v8, %v833_v63 }
 0xb7a   :  { %v838_v6 = vsel %vm375_vm9, %v837_v58, %v836_v1 }
 0xb7b   :  { %839 = vrot.lane.b32.xlu1 %v838_v6, %s4876_s4 }
 0xbed   :  { %v840_v0 = vpop.permute.xlu1 %839 }
 0xbee   :  { %4291 = vmatmul.msk.f32.vlgmr.msrb.gmra.mxu3 %vm268_vm10, %v840_v0 }
 0xc71   :  { %v860_v9 = vpop.f32.mrf.mxu3 }
 0xc72   :  { %v864_v13 = vrot.slane %v860_v9, 3  ;;  %v865_v15 = vrot.slane %v860_v9, 4 }
 0xc74   :  { %v868_v16 = vadd.f32 %v864_v13, %v5263_v38  ;;  %v869_v7 = vadd.f32 %v865_v15, %v5260_v36 }
 0xc76   :  { %4418 = vtanh.f32 %v868_v16  ;;  %v4292_v8 = vmul.f32 -1.442695, %v868_v16  ;;  %v4293_v14 = vmul.f32 -1.442695, %v869_v7 }
 0xc77   :  { %4420 = vtanh.f32 %v869_v7 }
 0xc78   :  { %4422 = vpow2.f32 %v4292_v8 }
 0xc7c   :  { %v4419_v23 = vpop.eup %4418 }
 0xc7d   :  { %v4421_v10 = vpop.eup %4420  ;;  %920 = vrot.lane.b32.xlu2 %v4419_v23, %s4875_s0 }
 0xc7e   :  { %922 = vrot.lane.b32.xlu0 %v4421_v10, %s4875_s0  ;;  %v4423_v12 = vpop.eup %4422 }
 0xc7f   :  { %v876_v18 = vadd.f32 1.0, %v4423_v12 }
 0xc81   :  { %4424 = vrcp.f32 %v876_v18  ;;  %v889_v30 = vand.u32 2147483648, %v876_v18  ;;  %vm883_vm12 = vweird.f32 %v876_v18  ;;  %v887_v31 = vand.u32 2147483647, %v876_v18 }
 0xc82   :  { %4426 = vpow2.f32 %v4293_v14 }
 0xc83   :  { %v890_v33 = vor.u32 1.1754944e-38, %v889_v30  ;;  %vm888_vm1 = vcmp.eq.f32.partialorder %v887_v31, 8.507059e+37 }
 0xc87   :  { %v4425_v17 = vpop.eup %4424 }
 0xc88   :  { %v879_v11 = vmul.f32 %v4425_v17, %v876_v18  ;;  %v4427_v26 = vpop.eup %4426  ;;  %vm884_vm8 = vweird.f32 %v4425_v17 }
 0xc89   :  { %v877_v28 = vadd.f32 1.0, %v4427_v26  ;;  %vm885_vm13 = vmor %vm883_vm12, %vm884_vm8 }
 0xc8a   :  { %v880_v21 = vsub.f32 1.0, %v879_v11 }
 0xc8b   :  { %4428 = vrcp.f32 %v877_v28  ;;  %v904_v40 = vand.u32 2147483648, %v877_v28  ;;  %vm898_vm3 = vweird.f32 %v877_v28  ;;  %v902_v41 = vand.u32 2147483647, %v877_v28 }
 0xc8c   :  { %v881_v25 = vmul.f32 %v4425_v17, %v880_v21 }
 0xc8d   :  { %v905_v43 = vor.u32 1.1754944e-38, %v904_v40  ;;  %vm903_vm5 = vcmp.eq.f32.partialorder %v902_v41, 8.507059e+37 }
 0xc8e   :  { %v882_v29 = vadd.f32 %v4425_v17, %v881_v25 }
 0xc90   :  { %v886_v32 = vsel %vm885_vm13, %v4425_v17, %v882_v29 }
 0xc91   :  { %v891_v20 = vsel %vm888_vm1, %v890_v33, %v886_v32  ;;  %v4429_v24 = vpop.eup %4428 }
 0xc92   :  { %v894_v34 = vmul.f32 %v4429_v24, %v877_v28  ;;  %vm899_vm2 = vweird.f32 %v4429_v24  ;;  %v916_v49 = vmul.f32 %v912_v47, %v891_v20 }
 0xc93   :  { %vm900_vm4 = vmor %vm898_vm3, %vm899_vm2 }
 0xc94   :  { %v895_v35 = vsub.f32 1.0, %v894_v34 }
 0xc96   :  { %v896_v37 = vmul.f32 %v4429_v24, %v895_v35 }
 0xc98   :  { %v897_v39 = vadd.f32 %v4429_v24, %v896_v37 }
 0xc9a   :  { %v901_v42 = vsel %vm900_vm4, %v4429_v24, %v897_v39 }
 0xc9b   :  { %v906_v45 = vsel %vm903_vm5, %v905_v43, %v901_v42 }
 0xc9c   :  { %v917_v50 = vmul.f32 %v913_v48, %v906_v45 }
 0xcd7   :  { %v921_v19 = vpop.permute.xlu2 %920 }
 0xcd8   :  { %v926_v22 = vmul.f32 %v921_v19, %v891_v20 }
 0xcda   :  { %930 = vrot.lane.b32.xlu1 %v926_v22, %s4875_s0 }
 0xcf0   :  { %v923_v44 = vpop.permute.xlu0 %922 }
 0xcf1   :  { %v927_v46 = vmul.f32 %v923_v44, %v906_v45 }
 0xcf3   :  { %932 = vrot.lane.b32.xlu2 %v927_v46, %s4875_s0 }
 0xd4c   :  { %v931_v51 = vpop.permute.xlu1 %930 }
 0xd4d   :  { %v933_v52 = vpop.permute.xlu2 %932  ;;  %v5409_v53 = vadd.f32 %v931_v51, %v916_v49 }
 0xd4e   :  { %v5411_v55 = vadd.f32 %v933_v52, %v917_v50 }
 0xd4f   :  { %4430 = vtanh.f32 %v5409_v53  ;;  %v1028_v43 = vrot.slane %v5409_v53, 7 }
 0xd50   :  { %4432 = vtanh.f32 %v5411_v55  ;;  %v1029_v48 = vrot.slane %v5411_v55, 7 }
 0xd55   :  { %v4431_v56 = vpop.eup %4430 }
 0xd56   :  { %v4433_v57 = vpop.eup %4432  ;;  %942 = vrot.lane.b32.xlu0 %v4431_v56, %s4875_s0 }
 0xd57   :  { %944 = vrot.lane.b32.xlu1 %v4433_v57, %s4875_s0 }
 0xdc8   :  { %v943_v54 = vpop.permute.xlu0 %942 }
 0xdc9   :  { %v945_v59 = vpop.permute.xlu1 %944  ;;  %v948_v60 = vmul.f32 %v943_v54, %v891_v20 }
 0xdca   :  { %v949_v61 = vmul.f32 %v945_v59, %v906_v45 }
 0xdcb   :  { %v952_v62 = vrot.slane %v948_v60, 5  ;;  %v5419_v2 = vsel %vm7102_vm6, %v5392_v4, %v948_v60 }
 0xdcc   :  { %v953_v3 = vrot.slane %v949_v61, 4  ;;  %v5423_v63 = vsel %vm7102_vm6, %v5396_v5, %v949_v61 }
 0xdce   :  { %v954_v1 = vsel %vm375_vm9, %v953_v3, %v952_v62 }
 0xdcf   :  { %955 = vrot.lane.b32.xlu2 %v954_v1, %s4876_s4 }
 0xe29   :  { %v956_v58 = vpop.permute.xlu2 %955 }
 0xe2a   :  { %4294 = vmatmul.msk.f32.vlgmr.msra.gmra.mxu1 %vm268_vm10, %v956_v58 }
 0xea7   :  { %v976_v6 = vpop.f32.mrf.mxu1 }
 0xea8   :  { %v980_v0 = vrot.slane %v976_v6, 2  ;;  %v981_v9 = vrot.slane %v976_v6, 3 }
 0xeaa   :  { %v984_v13 = vadd.f32 %v980_v0, %v5263_v38  ;;  %v985_v4 = vadd.f32 %v981_v9, %v5260_v36 }
 0xeac   :  { %4434 = vtanh.f32 %v984_v13  ;;  %v4295_v5 = vmul.f32 -1.442695, %v984_v13  ;;  %v4296_v7 = vmul.f32 -1.442695, %v985_v4 }
 0xead   :  { %4436 = vtanh.f32 %v985_v4 }
 0xeae   :  { %4438 = vpow2.f32 %v4295_v5 }
 0xeaf   :  { %4440 = vpow2.f32 %v4296_v7 }
 0xeb2   :  { %v4435_v15 = vpop.eup %4434 }
 0xeb3   :  { %v4437_v16 = vpop.eup %4436  ;;  %1036 = vrot.lane.b32.xlu0 %v4435_v15, %s4875_s0 }
 0xeb4   :  { %1038 = vrot.lane.b32.xlu1 %v4437_v16, %s4875_s0  ;;  %v4439_v23 = vpop.eup %4438 }
 0xeb5   :  { %v4441_v10 = vpop.eup %4440  ;;  %v992_v8 = vadd.f32 1.0, %v4439_v23 }
 0xeb6   :  { %v993_v12 = vadd.f32 1.0, %v4441_v10 }
 0xeb7   :  { %4442 = vrcp.f32 %v992_v8  ;;  %v1005_v31 = vand.u32 2147483648, %v992_v8  ;;  %vm999_vm13 = vweird.f32 %v992_v8  ;;  %v1003_v33 = vand.u32 2147483647, %v992_v8 }
 0xeb8   :  { %4444 = vrcp.f32 %v993_v12  ;;  %v1020_v32 = vand.u32 2147483648, %v993_v12  ;;  %vm1014_vm1 = vweird.f32 %v993_v12  ;;  %v1018_v19 = vand.u32 2147483647, %v993_v12 }
 0xeb9   :  { %v1006_v24 = vor.u32 1.1754944e-38, %v1005_v31  ;;  %vm1004_vm4 = vcmp.eq.f32.partialorder %v1003_v33, 8.507059e+37 }
 0xeba   :  { %v1021_v34 = vor.u32 1.1754944e-38, %v1020_v32  ;;  %vm1019_vm5 = vcmp.eq.f32.partialorder %v1018_v19, 8.507059e+37 }
 0xebd   :  { %v4443_v18 = vpop.eup %4442 }
 0xebe   :  { %v4445_v17 = vpop.eup %4444  ;;  %v995_v14 = vmul.f32 %v4443_v18, %v992_v8  ;;  %vm1000_vm8 = vweird.f32 %v4443_v18 }
 0xebf   :  { %v1010_v11 = vmul.f32 %v4445_v17, %v993_v12  ;;  %vm1015_vm12 = vweird.f32 %v4445_v17  ;;  %vm1001_vm2 = vmor %vm999_vm13, %vm1000_vm8  ;;  %vm7087_vm8 = vcmask 1045504  }
 0xec0   :  { %v996_v21 = vsub.f32 1.0, %v995_v14  ;;  %vm1016_vm3 = vmor %vm1014_vm1, %vm1015_vm12 }
 0xec1   :  { %v1011_v25 = vsub.f32 1.0, %v1010_v11 }
 0xec2   :  { %v997_v26 = vmul.f32 %v4443_v18, %v996_v21 }
 0xec3   :  { %v1012_v28 = vmul.f32 %v4445_v17, %v1011_v25 }
 0xec4   :  { %v998_v29 = vadd.f32 %v4443_v18, %v997_v26 }
 0xec5   :  { %v1013_v30 = vadd.f32 %v4445_v17, %v1012_v28 }
 0xec6   :  { %v1002_v20 = vsel %vm1001_vm2, %v4443_v18, %v998_v29 }
 0xec7   :  { %v1017_v22 = vsel %vm1016_vm3, %v4445_v17, %v1013_v30  ;;  %v1007_v37 = vsel %vm1004_vm4, %v1006_v24, %v1002_v20 }
 0xec8   :  { %v1022_v40 = vsel %vm1019_vm5, %v1021_v34, %v1017_v22  ;;  %v1032_v44 = vmul.f32 %v1028_v43, %v1007_v37 }
 0xec9   :  { %v1033_v49 = vmul.f32 %v1029_v48, %v1022_v40 }
 0xf25   :  { %v1037_v35 = vpop.permute.xlu0 %1036 }
 0xf26   :  { %v1039_v39 = vpop.permute.xlu1 %1038  ;;  %v1042_v41 = vmul.f32 %v1037_v35, %v1007_v37 }
 0xf27   :  { %v1043_v42 = vmul.f32 %v1039_v39, %v1022_v40 }
 0xf28   :  { %1046 = vrot.lane.b32.xlu2 %v1042_v41, %s4875_s0 }
 0xf29   :  { %1048 = vrot.lane.b32.xlu0 %v1043_v42, %s4875_s0 }
 0xf82   :  { %v1047_v45 = vpop.permute.xlu2 %1046 }
 0xf83   :  { %v5435_v46 = vadd.f32 %v1047_v45, %v1032_v44 }
 0xf85   :  { %4446 = vtanh.f32 %v5435_v46  ;;  %v1144_v42 = vrot.slane %v5435_v46, 7  ;;  %v1206_v46 = vld [vmem:[%s7079_s5 + $0x18] sm:$0xff] }
 0xf86   :  { %1229 = vmatpush.msra.mxu3 %v1206_v46 }
 0xf8b   :  { %v4447_v47 = vpop.eup %4446 }
 0xf8c   :  { %1058 = vrot.lane.b32.xlu1 %v4447_v47, %s4875_s0 }
 0xf9b   :  { %v1049_v50 = vpop.permute.xlu0 %1048 }
 0xf9c   :  { %v5440_v51 = vadd.f32 %v1049_v50, %v1033_v49 }
 0xf9e   :  { %4448 = vtanh.f32 %v5440_v51  ;;  %v1145_v35 = vrot.slane %v5440_v51, 7 }
 0xfa4   :  { %v4449_v52 = vpop.eup %4448 }
 0xfa5   :  { %1060 = vrot.lane.b32.xlu2 %v4449_v52, %s4875_s0 }
 0xffe   :  { %v1059_v53 = vpop.permute.xlu1 %1058 }
 0xfff   :  { %v1061_v56 = vpop.permute.xlu2 %1060  ;;  %v1064_v57 = vmul.f32 %v1059_v53, %v1007_v37 }
0x1000   :  { %v1065_v54 = vmul.f32 %v1061_v56, %v1022_v40  ;;  %v1205_v56 = vld [vmem:[%s7079_s5 + $0x10] sm:$0xff] }
0x1001   :  { %v1068_v59 = vrot.slane %v1064_v57, 6  ;;  %v5446_v60 = vsel %vm7087_vm8, %v5419_v2, %v1064_v57  ;;  %v1204_v57 = vld [vmem:[%s7079_s5 + $0x8] sm:$0xff]  ;;  %1230 = vmatpush.msra.mxu3 %v1205_v56 }
0x1002   :  { %v1069_v55 = vrot.slane %v1065_v54, 5  ;;  %v5450_v61 = vsel %vm7087_vm8, %v5423_v63, %v1065_v54  ;;  %v1203_v54 = vld [vmem:[%s7079_s5] sm:$0xff] }
0x1003   :  { %1231 = vmatpush.msra.mxu3 %v1204_v57 }
0x1004   :  { %v1070_v62 = vsel %vm375_vm9, %v1069_v55, %v1068_v59 }
0x1005   :  { %1071 = vrot.lane.b32.xlu0 %v1070_v62, %s4876_s4  ;;  %1232 = vmatpush.msra.mxu3 %v1203_v54 }
0x1077   :  { %v1072_v3 = vpop.permute.xlu0 %1071 }
0x1078   :  { %4297 = vmatmul.msk.f32.vlgmr.msra.gmra.mxu2 %vm268_vm10, %v1072_v3 }
0x10fb   :  { %v1092_v1 = vpop.f32.mrf.mxu2 }
0x10fc   :  { %v1096_v58 = vrot.slane %v1092_v1, 1  ;;  %v1097_v6 = vrot.slane %v1092_v1, 2 }
0x10fe   :  { %v1100_v0 = vadd.f32 %v1096_v58, %v5263_v38  ;;  %v1101_v2 = vadd.f32 %v1097_v6, %v5260_v36 }
0x1100   :  { %4450 = vtanh.f32 %v1100_v0  ;;  %v4299_v63 = vmul.f32 -1.442695, %v1101_v2  ;;  %v4298_v5 = vmul.f32 -1.442695, %v1100_v0 }
0x1101   :  { %4452 = vtanh.f32 %v1101_v2 }
0x1102   :  { %4454 = vpow2.f32 %v4299_v63 }
0x1106   :  { %v4451_v9 = vpop.eup %4450 }
0x1107   :  { %v4453_v13 = vpop.eup %4452  ;;  %1152 = vrot.lane.b32.xlu1 %v4451_v9, %s4875_s0 }
0x1108   :  { %1154 = vrot.lane.b32.xlu2 %v4453_v13, %s4875_s0  ;;  %v4455_v4 = vpop.eup %4454 }
0x1109   :  { %v1109_v15 = vadd.f32 1.0, %v4455_v4 }
0x110b   :  { %4456 = vrcp.f32 %v1109_v15  ;;  %v1136_v12 = vand.u32 2147483648, %v1109_v15  ;;  %vm1130_vm13 = vweird.f32 %v1109_v15  ;;  %v1134_v18 = vand.u32 2147483647, %v1109_v15 }
0x110c   :  { %4458 = vpow2.f32 %v4298_v5 }
0x110d   :  { %v1137_v14 = vor.u32 1.1754944e-38, %v1136_v12  ;;  %vm1135_vm2 = vcmp.eq.f32.partialorder %v1134_v18, 8.507059e+37 }
0x1111   :  { %v4457_v16 = vpop.eup %4456 }
0x1112   :  { %v1126_v7 = vmul.f32 %v4457_v16, %v1109_v15  ;;  %v4459_v23 = vpop.eup %4458  ;;  %vm1131_vm12 = vweird.f32 %v4457_v16 }
0x1113   :  { %v1108_v10 = vadd.f32 1.0, %v4459_v23  ;;  %vm1132_vm1 = vmor %vm1130_vm13, %vm1131_vm12  ;;  %vm7086_vm13 = vcmask 1046528  }
0x1114   :  { %v1127_v38 = vsub.f32 1.0, %v1126_v7 }
0x1115   :  { %4460 = vrcp.f32 %v1108_v10  ;;  %v1121_v32 = vand.u32 2147483648, %v1108_v10  ;;  %vm1115_vm4 = vweird.f32 %v1108_v10  ;;  %v1119_v33 = vand.u32 2147483647, %v1108_v10 }
0x1116   :  { %v1128_v36 = vmul.f32 %v4457_v16, %v1127_v38 }
0x1117   :  { %v1122_v20 = vor.u32 1.1754944e-38, %v1121_v32  ;;  %vm1120_vm12 = vcmp.eq.f32.partialorder %v1119_v33, 8.507059e+37 }
0x1118   :  { %v1129_v8 = vadd.f32 %v4457_v16, %v1128_v36 }
0x111a   :  { %v1133_v17 = vsel %vm1132_vm1, %v4457_v16, %v1129_v8 }
0x111b   :  { %v1138_v21 = vsel %vm1135_vm2, %v1137_v14, %v1133_v17  ;;  %v4461_v25 = vpop.eup %4460 }
0x111c   :  { %v1111_v28 = vmul.f32 %v4461_v25, %v1108_v10  ;;  %vm1116_vm3 = vweird.f32 %v4461_v25  ;;  %v1149_v37 = vmul.f32 %v1145_v35, %v1138_v21 }
0x111d   :  { %vm1117_vm5 = vmor %vm1115_vm4, %vm1116_vm3 }
0x111e   :  { %v1112_v29 = vsub.f32 1.0, %v1111_v28 }
0x1120   :  { %v1113_v30 = vmul.f32 %v4461_v25, %v1112_v29 }
0x1122   :  { %v1114_v31 = vadd.f32 %v4461_v25, %v1113_v30 }
0x1124   :  { %v1118_v19 = vsel %vm1117_vm5, %v4461_v25, %v1114_v31 }
0x1125   :  { %v1123_v24 = vsel %vm1120_vm12, %v1122_v20, %v1118_v19 }
0x1126   :  { %v1148_v43 = vmul.f32 %v1144_v42, %v1123_v24 }
0x1162   :  { %v1155_v11 = vpop.permute.xlu2 %1154 }
0x1163   :  { %v1159_v26 = vmul.f32 %v1155_v11, %v1138_v21 }
0x1165   :  { %1164 = vrot.lane.b32.xlu1 %v1159_v26, %s4875_s0 }
0x1179   :  { %v1153_v22 = vpop.permute.xlu1 %1152 }
0x117a   :  { %v1158_v34 = vmul.f32 %v1153_v22, %v1123_v24 }
0x117c   :  { %1162 = vrot.lane.b32.xlu0 %v1158_v34, %s4875_s0 }
0x11d7   :  { %v1165_v39 = vpop.permute.xlu1 %1164 }
0x11d8   :  { %v1169_v40 = vadd.f32 %v1165_v39, %v1149_v37 }
0x11da   :  { %4462 = vtanh.f32 %v1169_v40 }
0x11e0   :  { %v4463_v41 = vpop.eup %4462 }
0x11e1   :  { %1176 = vrot.lane.b32.xlu0 %v4463_v41, %s4875_s0 }
0x11ee   :  { %v1163_v44 = vpop.permute.xlu0 %1162 }
0x11ef   :  { %v1168_v45 = vadd.f32 %v1163_v44, %v1148_v43 }
0x11f1   :  { %4464 = vtanh.f32 %v1168_v45 }
0x11f7   :  { %v4465_v47 = vpop.eup %4464 }
0x11f8   :  { %1174 = vrot.lane.b32.xlu2 %v4465_v47, %s4875_s0 }
0x1252   :  { %v1175_v48 = vpop.permute.xlu2 %1174 }
0x1253   :  { %v1177_v49 = vpop.permute.xlu0 %1176  ;;  %v1180_v50 = vmul.f32 %v1175_v48, %v1123_v24 }
0x1254   :  { %v1181_v51 = vmul.f32 %v1177_v49, %v1138_v21 }
0x1255   :  { %v1201_v52 = vsel %vm7086_vm13, %v5446_v60, %v1180_v50 }
0x1256   :  { %v1202_v53 = vsel %vm7086_vm13, %v5450_v61, %v1181_v51  ;;  %1209 = vrot.lane.b32.xlu1 %v1201_v52, %s4876_s4 }
0x1257   :  { %1211 = vrot.lane.b32.xlu2 %v1202_v53, %s4876_s4 }
0x12b1   :  { %v1212_v60 = vpop.permute.xlu2 %1211 }
0x12c8   :  { %v1210_v59 = vpop.permute.xlu1 %1209 }
0x12c9   :  { %4300 = vmatmul.msk.f32.vlgmr.msra.gmra.mxu3 %vm268_vm10, %v1210_v59 }
0x12d1   :  { %4301 = vmatmul.msk.f32.gmra.mxu3 %vm268_vm10, %v1212_v60 }
0x134c   :  { %v5485_v55 = vpop.f32.mrf.mxu3 }
0x134d   :  { %7143 = vst [vmem:[#allocation9_spill] sm:$0xff] %v5485_v55 }
0x1354   :  { %v5487_v61 = vpop.f32.mrf.mxu3 }
0x1355   :  { %7144 = vst [vmem:[#allocation10_spill] sm:$0xff] %v5487_v61 }
0x1356   :  { %4870 = dma.done.wait [#allocation3], 9216 }
0x1357   :  { %4871 = vsyncadd [#allocation3], 4294958080  ;;  %v1326_v62 = vrot.slane %v5485_v55, 1  ;;  %v1340_v1 = vperm.slane %v5485_v55, 0  ;;  %v1249_v58 = vld [vmem:[#allocation2 + $0x120] sm:$0xff]  ;;  %v1246_v6 = vld [vmem:[#allocation2 + $0x50] sm:$0xff] }
0x1358   :  { %v1244_v0 = vld [vmem:[#allocation2 + $0xf8] sm:$0xff]  ;;  %v1250_v63 = vld [vmem:[#allocation2 + $0x128] sm:$0xff]  ;;  %v1327_v36 = vrot.slane %v5485_v55, 2  ;;  %v1247_v11 = vld [vmem:[#allocation2 + $0x30] sm:$0xff]  ;;  %v1328_v28 = vrot.slane %v5485_v55, 3  ;;  %v1329_v47 = vrot.slane %v5485_v55, 4 }
0x1359   :  { %v1341_v3 = vperm.slane %v1326_v62, 0  ;;  %v1374_v9 = vmul.f32 %v1340_v1, %v1246_v6  ;;  %v1372_v13 = vmul.f32 %v1340_v1, %v1244_v0  ;;  %v1251_v4 = vld [vmem:[#allocation2 + $0x88] sm:$0xff]  ;;  %v1255_v14 = vld [vmem:[#allocation2 + $0x198] sm:$0xff]  ;;  %v1375_v26 = vmul.f32 %v1340_v1, %v1247_v11  ;;  %v1259_v20 = vld [vmem:[#allocation2 + $0xc0] sm:$0xff]  ;;  %s4233_s14 = sshll.u32 %s7084_s10, 4  ;;  %s4879_s15 = smov 128   ;;  %s4234_s14 = int_to_ptr.hbm [resolvable:$true] %s4233_s14 }
0x135a   :  { %v1245_v7 = vld [vmem:[#allocation2 + $0x8] sm:$0xff]  ;;  %v1342_v18 = vperm.slane %v1327_v36, 0  ;;  %v5501_v32 = vperm.slane %v1328_v28, 0  ;;  %v1248_v41 = vld [vmem:[#allocation2 + $0xd0] sm:$0xf]  ;;  %vm1464_vm1 = vcmask 519168  }
0x135b   :  { %v1377_v2 = vmul.f32 %v1341_v3, %v1249_v58  ;;  %v1458_v16 = vsel %vm234_vm0, %v1374_v9, 0.0  ;;  %v1452_v5 = vsel %vm234_vm0, %v1372_v13, 0.0  ;;  %v1378_v38 = vmul.f32 %v1341_v3, %v1250_v63  ;;  %v1254_v21 = vld [vmem:[#allocation2 + $0x108] sm:$0xff]  ;;  %v1253_v42 = vld [vmem:[#allocation2 + $0x78] sm:$0xf]  ;;  %v1260_v43 = vld [vmem:[#allocation2 + $0xf0] sm:$0xff] }
0x135c   :  { %1459 = vadd.xlane.f32.xlu2 %v1458_v16  ;;  %1453 = vadd.xlane.f32.xlu0 %v1452_v5  ;;  %v1379_v23 = vmul.f32 %v1341_v3, %v1251_v4  ;;  %v1373_v10 = vmul.f32 %v1340_v1, %v1245_v7  ;;  %v1383_v25 = vmul.f32 %v1342_v18, %v1255_v14  ;;  %v1461_v31 = vsel %vm234_vm0, %v1375_v26, 0.0  ;;  %v1256_v19 = vld [vmem:[#allocation2 + $0x1a8] sm:$0xff]  ;;  %v1261_v53 = vld [vmem:[#allocation2 + $0x190] sm:$0xff]  ;;  %v1264_v46 = vld [vmem:[#allocation2 + $0xa0] sm:$0xff]  ;;  %s4880_s16 = smov 8  }
0x135d   :  { %v1468_v15 = vsel %vm234_vm0, %v1377_v2, 0.0  ;;  %v1471_v8 = vsel %vm234_vm0, %v1378_v38, 0.0  ;;  %v1382_v29 = vmul.f32 %v1342_v18, %v1254_v21  ;;  %v1252_v22 = vld [vmem:[#allocation2 + $0x168] sm:$0xff]  ;;  %v1384_v24 = vmul.f32 %v1342_v18, %v1256_v19  ;;  %v1262_v58 = vld [vmem:[#allocation2 + $0x20] sm:$0xff]  ;;  %v1265_v6 = vld [vmem:[#allocation2 + $0x38] sm:$0xff] }
0x135e   :  { %1469 = vadd.xlane.f32.xlu1 %v1468_v15  ;;  %v1474_v12 = vsel %vm234_vm0, %v1379_v23, 0.0  ;;  %v1455_v17 = vsel %vm234_vm0, %v1373_v10, 0.0  ;;  %v1486_v30 = vsel %vm234_vm0, %v1383_v25, 0.0  ;;  %v1387_v34 = vmul.f32 %v5501_v32, %v1259_v20  ;;  %v1257_v56 = vld [vmem:[#allocation2 + $0x148] sm:$0xff]  ;;  %v1266_v38 = vld [vmem:[#allocation2 + $0x10] sm:$0xff]  ;;  %v1275_v19 = vld [vmem:[#allocation2 + $0x58] sm:$0xff] }
0x135f   :  { %v1483_v33 = vsel %vm234_vm0, %v1382_v29, 0.0  ;;  %v1380_v35 = vmul.f32 %v1341_v3, %v1252_v22  ;;  %v1489_v37 = vsel %vm234_vm0, %v1384_v24, 0.0  ;;  %v1376_v44 = vmul.f32 %v1340_v1, %v1248_v41  ;;  %v1258_v1 = vld [vmem:[#allocation2 + $0x180] sm:$0xf]  ;;  %v1269_v5 = vld [vmem:[#allocation2 + $0x248] sm:$0xff]  ;;  %v1274_v22 = vld [vmem:[#allocation2 + $0x1f0] sm:$0xff] }
0x1360   :  { %v1498_v39 = vsel %vm234_vm0, %v1387_v34, 0.0  ;;  %v1381_v45 = vmul.f32 %v1341_v3, %v1253_v42  ;;  %v1388_v48 = vmul.f32 %v5501_v32, %v1260_v43  ;;  %v1344_v51 = vperm.slane %v1329_v47, 0  ;;  %v1270_v7 = vld [vmem:[#allocation2 + $0x208] sm:$0xff]  ;;  %v1268_v20 = vld [vmem:[#allocation2 + $0x160] sm:$0xf] }
0x1361   :  { %v1477_v40 = vsel %vm234_vm0, %v1380_v35, 0.0  ;;  %v1465_v49 = vsel %vm1464_vm1, %v1376_v44, 0.0  ;;  %v1389_v57 = vmul.f32 %v5501_v32, %v1261_v53  ;;  %v1385_v59 = vmul.f32 %v1342_v18, %v1257_v56  ;;  %v1271_v14 = vld [vmem:[#allocation2 + $0x188] sm:$0xff]  ;;  %v1276_v42 = vld [vmem:[#allocation2 + $0x80] sm:$0xff]  ;;  %v1272_v44 = vld [vmem:[#allocation2 + $0x98] sm:$0xff] }
0x1362   :  { %v1480_v50 = vsel %vm1464_vm1, %v1381_v45, 0.0  ;;  %v1501_v52 = vsel %vm234_vm0, %v1388_v48, 0.0  ;;  %v1392_v54 = vmul.f32 %v1344_v51, %v1264_v46  ;;  %v1386_v0 = vmul.f32 %v1342_v18, %v1258_v1  ;;  %v1263_v11 = vld [vmem:[#allocation2 + $0x48] sm:$0xf]  ;;  %v1277_v53 = vld [vmem:[#allocation2 + $0x138] sm:$0xff]  ;;  %v1280_v46 = vld [vmem:[#allocation2 + $0x1b0] sm:$0xff] }
0x1363   :  { %v1504_v60 = vsel %vm234_vm0, %v1389_v57, 0.0  ;;  %v1492_v3 = vsel %vm234_vm0, %v1385_v59, 0.0  ;;  %v1390_v2 = vmul.f32 %v5501_v32, %v1262_v58  ;;  %v1330_v9 = vrot.slane %v5485_v55, 5  ;;  %v1279_v43 = vld [vmem:[#allocation2 + $0x1e8] sm:$0xff]  ;;  %v1281_v58 = vld [vmem:[#allocation2 + $0xe0] sm:$0xff] }
0x1364   :  { %1475 = vadd.xlane.f32.xlu2 %v1474_v12  ;;  %1456 = vadd.xlane.f32.xlu0 %v1455_v17  ;;  %v1513_v62 = vsel %vm234_vm0, %v1392_v54, 0.0  ;;  %v1393_v13 = vmul.f32 %v1344_v51, %v1265_v6  ;;  %v1495_v63 = vsel %vm1464_vm1, %v1386_v0, 0.0  ;;  %v1394_v10 = vmul.f32 %v1344_v51, %v1266_v38  ;;  %v1267_v17 = vld [vmem:[#allocation2 + $0x1b8] sm:$0xff]  ;;  %v1282_v1 = vld [vmem:[#allocation2 + $0x228] sm:$0xff]  ;;  %v1284_v38 = vld [vmem:[#allocation2 + $0x130] sm:$0xff] }
0x1365   :  { %v1507_v4 = vsel %vm234_vm0, %v1390_v2, 0.0  ;;  %v1345_v15 = vperm.slane %v1330_v9, 0  ;;  %v1395_v21 = vmul.f32 %v1344_v51, %v1267_v17  ;;  %v1331_v26 = vrot.slane %v5485_v55, 6  ;;  %v1283_v17 = vld [vmem:[#allocation2 + $0x170] sm:$0xf] }
0x1366   :  { %1472 = vadd.xlane.f32.xlu1 %v1471_v8  ;;  %v1516_v16 = vsel %vm234_vm0, %v1393_v13, 0.0  ;;  %v1519_v18 = vsel %vm234_vm0, %v1394_v10, 0.0  ;;  %v1391_v28 = vmul.f32 %v5501_v32, %v1263_v11  ;;  %v1396_v34 = vmul.f32 %v1344_v51, %v1268_v20  ;;  %v1290_v11 = vld [vmem:[#allocation2 + $0x258] sm:$0xff] }
0x1367   :  { %v1397_v23 = vmul.f32 %v1345_v15, %v1269_v5  ;;  %v1398_v36 = vmul.f32 %v1345_v15, %v1270_v7  ;;  %v1399_v25 = vmul.f32 %v1345_v15, %v1271_v14  ;;  %v1522_v29 = vsel %vm234_vm0, %v1395_v21, 0.0  ;;  %v1285_v5 = vld [vmem:[#allocation2 + $0xb8] sm:$0xff]  ;;  %v1289_v7 = vld [vmem:[#allocation2 + $0x240] sm:$0xff] }
0x1368   :  { %v1332_v35 = vrot.slane %v5485_v55, 7  ;;  %v1400_v48 = vmul.f32 %v1345_v15, %v1272_v44  ;;  %v1333_v2 = vrot.slane %v5487_v61, 1  ;;  %v1286_v14 = vld [vmem:[#allocation2 + $0x118] sm:$0xff]  ;;  %v1296_v44 = vld [vmem:[#allocation2 + $0xb0] sm:$0xff]  ;;  %vm1778_vm2 = vcmask 130112  }
0x1369   :  { %v1528_v8 = vsel %vm234_vm0, %v1397_v23, 0.0  ;;  %v1531_v12 = vsel %vm234_vm0, %v1398_v36, 0.0  ;;  %v1295_v20 = vld [vmem:[#allocation2 + $0x218] sm:$0xff]  ;;  %vm1782_vm3 = vcmask 195712   ;;  %vm1786_vm4 = vcmask 261312  }
0x136a   :  { %v1537_v51 = vsel %vm234_vm0, %v1400_v48, 0.0  ;;  %vm1790_vm5 = vcmask 326912   ;;  %vm1928_vm12 = vcmask 1042434   ;;  %vm1930_vm13 = vcmask 1043459  }
0x136b   :  { %vm1932_vm8 = vcmask 1044484   ;;  %vm1934_vm6 = vcmask 1045509   ;;  %vm1936_vm7 = vcmask 1046534   ;;  %vm1938_vm11 = vcmask 1047559  }
0x136c   :  { %1462 = vadd.xlane.f32.xlu2 %v1461_v31  ;;  %1484 = vadd.xlane.f32.xlu0 %v1483_v33  ;;  %v1346_v31 = vperm.slane %v1331_v26, 0  ;;  %v1510_v33 = vsel %vm1464_vm1, %v1391_v28, 0.0  ;;  %v1334_v26 = vrot.slane %v5487_v61, 2  ;;  %vm1949_vm15 = vcmask 293888  }
0x136e   :  { %1487 = vadd.xlane.f32.xlu1 %v1486_v30  ;;  %v1534_v30 = vsel %vm234_vm0, %v1399_v25, 0.0  ;;  %v1403_v24 = vmul.f32 %v1346_v31, %v1275_v19  ;;  %v1404_v45 = vmul.f32 %v1346_v31, %v1276_v42  ;;  %v1405_v57 = vmul.f32 %v1346_v31, %v1277_v53  ;;  %v1294_v19 = vld [vmem:[#allocation2] sm:$0xff] }
0x1370   :  { %v1546_v32 = vsel %vm234_vm0, %v1403_v24, 0.0 }
0x1374   :  { %1499 = vadd.xlane.f32.xlu2 %v1498_v39  ;;  %1478 = vadd.xlane.f32.xlu0 %v1477_v40  ;;  %v1525_v39 = vsel %vm1464_vm1, %v1396_v34, 0.0  ;;  %v1347_v40 = vperm.slane %v1332_v35, 0 }
0x1376   :  { %1490 = vadd.xlane.f32.xlu1 %v1489_v37  ;;  %v1402_v37 = vmul.f32 %v1346_v31, %v1274_v22  ;;  %v1407_v47 = vmul.f32 %v1347_v40, %v1279_v43  ;;  %v1408_v54 = vmul.f32 %v1347_v40, %v1280_v46  ;;  %v1410_v0 = vmul.f32 %v1347_v40, %v1282_v1  ;;  %v1291_v22 = vld [vmem:[#allocation2 + $0x210] sm:$0xff]  ;;  %v1292_v43 = vld [vmem:[#allocation2 + $0xe8] sm:$0xff] }
0x1377   :  { %v1409_v9 = vmul.f32 %v1347_v40, %v1281_v58  ;;  %v1411_v21 = vmul.f32 %v1347_v40, %v1283_v17 }
0x1378   :  { %v1543_v41 = vsel %vm234_vm0, %v1402_v37, 0.0 }
0x137c   :  { %1481 = vadd.xlane.f32.xlu2 %v1480_v50  ;;  %1502 = vadd.xlane.f32.xlu0 %v1501_v52  ;;  %v1558_v50 = vsel %vm234_vm0, %v1407_v47, 0.0  ;;  %v1273_v52 = vld [vmem:[#allocation2 + $0xa8] sm:$0xf] }
0x137d   :  { %v1401_v56 = vmul.f32 %v1345_v15, %v1273_v52  ;;  %v5546_v15 = vperm.slane %v1333_v2, 0 }
0x137e   :  { %1466 = vadd.xlane.f32.xlu1 %v1465_v49  ;;  %v1549_v49 = vsel %vm234_vm0, %v1404_v45, 0.0  ;;  %v1287_v45 = vld [vmem:[#allocation2 + $0x1f8] sm:$0xff] }
0x137f   :  { %v1540_v59 = vsel %vm1464_vm1, %v1401_v56, 0.0  ;;  %v1417_v36 = vmul.f32 %v5546_v15, %v1289_v7  ;;  %v1418_v28 = vmul.f32 %v5546_v15, %v1290_v11  ;;  %v1419_v35 = vmul.f32 %v5546_v15, %v1291_v22  ;;  %v1293_v7 = vld [vmem:[#allocation2 + $0x110] sm:$0xf] }
0x1380   :  { %v1420_v47 = vmul.f32 %v5546_v15, %v1292_v43 }
0x1381   :  { %v1594_v42 = vsel %vm234_vm0, %v1419_v35, 0.0 }
0x1382   :  { %v1597_v46 = vsel %vm234_vm0, %v1420_v47, 0.0 }
0x1384   :  { %1514 = vadd.xlane.f32.xlu2 %v1513_v62  ;;  %1493 = vadd.xlane.f32.xlu0 %v1492_v3  ;;  %v1561_v62 = vsel %vm234_vm0, %v1408_v54, 0.0  ;;  %v1278_v3 = vld [vmem:[#allocation2 + $0x158] sm:$0xf] }
0x1385   :  { %v1406_v6 = vmul.f32 %v1346_v31, %v1278_v3  ;;  %v5560_v31 = vperm.slane %v1334_v26, 0  ;;  %v1304_v26 = vld [vmem:[#allocation2 + $0x90] sm:$0xff] }
0x1386   :  { %1505 = vadd.xlane.f32.xlu1 %v1504_v60  ;;  %v1552_v60 = vsel %vm234_vm0, %v1405_v57, 0.0 }
0x1387   :  { %v1555_v13 = vsel %vm1464_vm1, %v1406_v6, 0.0  ;;  %v1422_v24 = vmul.f32 %v5560_v31, %v1294_v19  ;;  %v1423_v34 = vmul.f32 %v5560_v31, %v1295_v20  ;;  %v1424_v48 = vmul.f32 %v5560_v31, %v1296_v44 }
0x1389   :  { %v1603_v40 = vsel %vm234_vm0, %v1422_v24, 0.0  ;;  %v1609_v56 = vsel %vm234_vm0, %v1424_v48, 0.0 }
0x138c   :  { %1508 = vadd.xlane.f32.xlu2 %v1507_v4  ;;  %1517 = vadd.xlane.f32.xlu0 %v1516_v16  ;;  %v5544_v4 = vperm.slane %v5487_v61, 0  ;;  %v1564_v16 = vsel %vm234_vm0, %v1409_v9, 0.0 }
0x138e   :  { %1496 = vadd.xlane.f32.xlu1 %v1495_v63  ;;  %v1567_v63 = vsel %vm234_vm0, %v1410_v0, 0.0  ;;  %v1413_v23 = vmul.f32 %v5544_v4, %v1285_v5  ;;  %v1412_v10 = vmul.f32 %v5544_v4, %v1284_v38  ;;  %v1414_v25 = vmul.f32 %v5544_v4, %v1286_v14  ;;  %v1301_v5 = vld [vmem:[#allocation2 + $0x238] sm:$0xff] }
0x1394   :  { %1532 = vadd.xlane.f32.xlu2 %v1531_v12  ;;  %1520 = vadd.xlane.f32.xlu0 %v1519_v18  ;;  %v1588_v12 = vsel %vm234_vm0, %v1417_v36, 0.0  ;;  %v1573_v18 = vsel %vm234_vm0, %v1412_v10, 0.0  ;;  %v1421_v36 = vmul.f32 %v5546_v15, %v1293_v7 }
0x1396   :  { %1529 = vadd.xlane.f32.xlu1 %v1528_v8  ;;  %v1576_v8 = vsel %vm234_vm0, %v1413_v23, 0.0  ;;  %v1336_v23 = vrot.slane %v5487_v61, 4  ;;  %v1600_v11 = vsel %vm1464_vm1, %v1421_v36, 0.0 }
0x1398   :  { %v5614_v14 = vperm.slane %v1336_v23, 0 }
0x139c   :  { %1535 = vadd.xlane.f32.xlu2 %v1534_v30  ;;  %1511 = vadd.xlane.f32.xlu0 %v1510_v33  ;;  %v1579_v30 = vsel %vm234_vm0, %v1414_v25, 0.0  ;;  %v1591_v33 = vsel %vm234_vm0, %v1418_v28, 0.0  ;;  %v1298_v25 = vld [vmem:[#allocation2 + $0x1c8] sm:$0xf] }
0x139d   :  { %v1426_v28 = vmul.f32 %v5560_v31, %v1298_v25 }
0x139e   :  { %1523 = vadd.xlane.f32.xlu1 %v1522_v29  ;;  %v1570_v29 = vsel %vm1464_vm1, %v1411_v21, 0.0  ;;  %v1305_v21 = vld [vmem:[#allocation2 + $0x268] sm:$0xff] }
0x139f   :  { %v1433_v15 = vmul.f32 %v5614_v14, %v1305_v21  ;;  %v1615_v24 = vsel %vm1464_vm1, %v1426_v28, 0.0  ;;  %v1312_v28 = vld [vmem:[#allocation2 + $0x140] sm:$0xff] }
0x13a1   :  { %v1636_v22 = vsel %vm234_vm0, %v1433_v15, 0.0 }
0x13a4   :  { %1526 = vadd.xlane.f32.xlu2 %v1525_v39  ;;  %1544 = vadd.xlane.f32.xlu0 %v1543_v41  ;;  %v1606_v41 = vsel %vm234_vm0, %v1423_v34, 0.0 }
0x13a6   :  { %1547 = vadd.xlane.f32.xlu1 %v1546_v32 }
0x13ac   :  { %1559 = vadd.xlane.f32.xlu2 %v1558_v50  ;;  %1538 = vadd.xlane.f32.xlu0 %v1537_v51  ;;  %v1415_v50 = vmul.f32 %v5544_v4, %v1287_v45 }
0x13ae   :  { %1550 = vadd.xlane.f32.xlu1 %v1549_v49  ;;  %v1335_v49 = vrot.slane %v5487_v61, 3  ;;  %v1582_v54 = vsel %vm234_vm0, %v1415_v50, 0.0 }
0x13b0   :  { %v5587_v57 = vperm.slane %v1335_v49, 0 }
0x13b2   :  { %v1429_v38 = vmul.f32 %v5587_v57, %v1301_v5 }
0x13b4   :  { %1553 = vadd.xlane.f32.xlu2 %v1552_v60  ;;  %1562 = vadd.xlane.f32.xlu0 %v1561_v62  ;;  %v1288_v60 = vld [vmem:[#allocation2 + $0x230] sm:$0xf]  ;;  %v1299_v62 = vld [vmem:[#allocation2 + $0x260] sm:$0xff]  ;;  %v1624_v17 = vsel %vm234_vm0, %v1429_v38, 0.0 }
0x13b5   :  { %v1416_v1 = vmul.f32 %v5544_v4, %v1288_v60  ;;  %v1427_v58 = vmul.f32 %v5587_v57, %v1299_v62  ;;  %v1311_v38 = vld [vmem:[#allocation2 + $0x200] sm:$0xff] }
0x13b6   :  { %1541 = vadd.xlane.f32.xlu1 %v1540_v59  ;;  %v1300_v59 = vld [vmem:[#allocation2 + $0x40] sm:$0xff] }
0x13b7   :  { %v1428_v3 = vmul.f32 %v5587_v57, %v1300_v59  ;;  %v1310_v59 = vld [vmem:[#allocation2 + $0x1d8] sm:$0xff] }
0x13b9   :  { %v1621_v9 = vsel %vm234_vm0, %v1428_v3, 0.0  ;;  %v1338_v3 = vrot.slane %v5487_v61, 6 }
0x13bb   :  { %v1354_v5 = vperm.slane %v1338_v3, 0 }
0x13bc   :  { %1568 = vadd.xlane.f32.xlu2 %v1567_v63  ;;  %1565 = vadd.xlane.f32.xlu0 %v1564_v16  ;;  %v1618_v63 = vsel %vm234_vm0, %v1427_v58, 0.0  ;;  %v1297_v16 = vld [vmem:[#allocation2 + $0x250] sm:$0xff] }
0x13bd   :  { %v1425_v4 = vmul.f32 %v5560_v31, %v1297_v16  ;;  %v1309_v31 = vld [vmem:[#allocation2 + $0x68] sm:$0xff] }
0x13be   :  { %1556 = vadd.xlane.f32.xlu1 %v1555_v13  ;;  %v1585_v13 = vsel %vm1464_vm1, %v1416_v1, 0.0 }
0x13c4   :  { %1589 = vadd.xlane.f32.xlu2 %v1588_v12  ;;  %1574 = vadd.xlane.f32.xlu0 %v1573_v18  ;;  %v1612_v18 = vsel %vm234_vm0, %v1425_v4, 0.0  ;;  %v1315_v4 = vld [vmem:[#allocation2 + $0x1c0] sm:$0xff] }
0x13c5   :  { %v1443_v36 = vmul.f32 %v1354_v5, %v1315_v4  ;;  %v1318_v4 = vld [vmem:[#allocation2 + $0x60] sm:$0xf] }
0x13c6   :  { %1577 = vadd.xlane.f32.xlu1 %v1576_v8 }
0x13cc   :  { %1580 = vadd.xlane.f32.xlu2 %v1579_v30  ;;  %1592 = vadd.xlane.f32.xlu0 %v1591_v33  ;;  %v1432_v30 = vmul.f32 %v5614_v14, %v1304_v26  ;;  %v1666_v26 = vsel %vm234_vm0, %v1443_v36, 0.0  ;;  %v1773_v36 = vlaneseq }
0x13ce   :  { %1571 = vadd.xlane.f32.xlu1 %v1570_v29  ;;  %v1337_v29 = vrot.slane %v5487_v61, 5  ;;  %v1633_v35 = vsel %vm234_vm0, %v1432_v30, 0.0  ;;  %v1308_v30 = vld [vmem:[#allocation2 + $0x28] sm:$0xf] }
0x13cf   :  { %v5568_v32 = vpop.xlane.xlu2 %1459  ;;  %v5570_v39 = vpop.xlane.xlu0 %1453 }
0x13d0   :  { %v5629_v34 = vperm.slane %v1337_v29, 0  ;;  %v1316_v29 = vld [vmem:[#allocation2 + $0x100] sm:$0xff] }
0x13d1   :  { %v5566_v37 = vpop.xlane.xlu1 %1469 }
0x13d2   :  { %v1437_v43 = vmul.f32 %v5629_v34, %v1309_v31  ;;  %v1438_v1 = vmul.f32 %v5629_v34, %v1310_v59 }
0x13d4   :  { %1607 = vadd.xlane.f32.xlu2 %v1606_v41  ;;  %1595 = vadd.xlane.f32.xlu0 %v1594_v42  ;;  %v1302_v41 = vld [vmem:[#allocation2 + $0x18] sm:$0xff]  ;;  %v1648_v50 = vsel %vm234_vm0, %v1437_v43, 0.0  ;;  %v1651_v7 = vsel %vm234_vm0, %v1438_v1, 0.0 }
0x13d5   :  { %v1430_v44 = vmul.f32 %v5587_v57, %v1302_v41 }
0x13d6   :  { %1604 = vadd.xlane.f32.xlu1 %v1603_v40  ;;  %v1306_v40 = vld [vmem:[#allocation2 + $0xc8] sm:$0xff] }
0x13d7   :  { %v5581_v52 = vpop.xlane.xlu2 %1475  ;;  %v5583_v53 = vpop.xlane.xlu0 %1456  ;;  %v1434_v42 = vmul.f32 %v5614_v14, %v1306_v40  ;;  %v1436_v40 = vmul.f32 %v5614_v14, %v1308_v30  ;;  %v5697_v30 = vand.u32 127, %v1773_v36 }
0x13d9   :  { %v5579_v51 = vpop.xlane.xlu1 %1472  ;;  %v1639_v49 = vsel %vm234_vm0, %v1434_v42, 0.0 }
0x13dc   :  { %1610 = vadd.xlane.f32.xlu2 %v1609_v56  ;;  %1583 = vadd.xlane.f32.xlu0 %v1582_v54  ;;  %v1303_v56 = vld [vmem:[#allocation2 + $0x1a0] sm:$0xf]  ;;  %v1307_v54 = vld [vmem:[#allocation2 + $0x270] sm:$0xff] }
0x13dd   :  { %v1431_v60 = vmul.f32 %v5587_v57, %v1303_v56  ;;  %v1435_v62 = vmul.f32 %v5614_v14, %v1307_v54  ;;  %v1314_v57 = vld [vmem:[#allocation2 + $0x220] sm:$0xff]  ;;  %v1313_v56 = vld [vmem:[#allocation2 + $0x1d0] sm:$0xf] }
0x13de   :  { %1598 = vadd.xlane.f32.xlu1 %v1597_v46  ;;  %v1627_v46 = vsel %vm234_vm0, %v1430_v44, 0.0  ;;  %v1442_v23 = vmul.f32 %v1354_v5, %v1314_v57  ;;  %v1319_v54 = vld [vmem:[#allocation2 + $0x70] sm:$0xff]  ;;  %v1441_v59 = vmul.f32 %v5629_v34, %v1313_v56  ;;  %v1321_v57 = vld [vmem:[#allocation2 + $0x178] sm:$0xff]  ;;  %v1775_v56 = vperm.slane %v5570_v39, %v5697_v30 }
0x13df   :  { %v5595_v0 = vpop.xlane.xlu2 %1462  ;;  %v5597_v2 = vpop.xlane.xlu0 %1484  ;;  %v1642_v16 = vsel %vm234_vm0, %v1435_v62, 0.0 }
0x13e0   :  { %v1663_v25 = vsel %vm234_vm0, %v1442_v23, 0.0  ;;  %v1446_v23 = vmul.f32 %v1354_v5, %v1318_v4 }
0x13e1   :  { %v5593_v6 = vpop.xlane.xlu1 %1487 }
0x13e4   :  { %1586 = vadd.xlane.f32.xlu2 %v1585_v13  ;;  %1619 = vadd.xlane.f32.xlu0 %v1618_v63  ;;  %v1630_v63 = vsel %vm1464_vm1, %v1431_v60, 0.0 }
0x13e6   :  { %1622 = vadd.xlane.f32.xlu1 %v1621_v9 }
0x13e7   :  { %v5608_v8 = vpop.xlane.xlu2 %1499  ;;  %v5610_v12 = vpop.xlane.xlu0 %1478 }
0x13e9   :  { %v5606_v10 = vpop.xlane.xlu1 %1490 }
0x13ec   :  { %1625 = vadd.xlane.f32.xlu2 %v1624_v17  ;;  %1601 = vadd.xlane.f32.xlu0 %v1600_v11 }
0x13ee   :  { %1613 = vadd.xlane.f32.xlu1 %v1612_v18  ;;  %v1439_v18 = vmul.f32 %v5629_v34, %v1311_v38  ;;  %v1317_v38 = vld [vmem:[#allocation2 + $0x278] sm:$0xff] }
0x13ef   :  { %v5623_v19 = vpop.xlane.xlu2 %1481  ;;  %v5625_v20 = vpop.xlane.xlu0 %1502 }
0x13f0   :  { %7145 = vst [vmem:[#allocation11_spill] sm:$0xff] %v5623_v19  ;;  %v1654_v15 = vsel %vm234_vm0, %v1439_v18, 0.0  ;;  %v1445_v18 = vmul.f32 %v1354_v5, %v1317_v38 }
0x13f1   :  { %v5621_v33 = vpop.xlane.xlu1 %1466 }
0x13f4   :  { %1616 = vadd.xlane.f32.xlu2 %v1615_v24  ;;  %1634 = vadd.xlane.f32.xlu0 %v1633_v35  ;;  %v1444_v24 = vmul.f32 %v1354_v5, %v1316_v29  ;;  %v1339_v35 = vrot.slane %v5487_v61, 7  ;;  %v1675_v29 = vsel %vm1464_vm1, %v1446_v23, 0.0 }
0x13f6   :  { %1637 = vadd.xlane.f32.xlu1 %v1636_v22  ;;  %v1440_v22 = vmul.f32 %v5629_v34, %v1312_v28  ;;  %v1669_v44 = vsel %vm234_vm0, %v1444_v24, 0.0  ;;  %v1323_v24 = vld [vmem:[#allocation2 + $0xd8] sm:$0xf] }
0x13f7   :  { %v5637_v47 = vpop.xlane.xlu2 %1514  ;;  %v5639_v48 = vpop.xlane.xlu0 %1493 }
0x13f8   :  { %7147 = vst [vmem:[#allocation13_spill] sm:$0xff] %v5637_v47  ;;  %v1657_v43 = vsel %vm234_vm0, %v1440_v22, 0.0  ;;  %v1672_v22 = vsel %vm234_vm0, %v1445_v18, 0.0 }
0x13f9   :  { %v5635_v45 = vpop.xlane.xlu1 %1505 }
0x13fa   :  { %7146 = vst [vmem:[#allocation12_spill] sm:$0xff] %v5635_v45 }
0x13fc   :  { %1649 = vadd.xlane.f32.xlu2 %v1648_v50  ;;  %1628 = vadd.xlane.f32.xlu0 %v1627_v46  ;;  %v1645_v50 = vsel %vm1464_vm1, %v1436_v40, 0.0  ;;  %v1320_v46 = vld [vmem:[#allocation2 + $0x1e0] sm:$0xff]  ;;  %v5701_v40 = vadd.s32 4294967288, %v5697_v30 }
0x13fe   :  { %1640 = vadd.xlane.f32.xlu1 %v1639_v49  ;;  %v1355_v49 = vperm.slane %v1339_v35, 0  ;;  %v1322_v35 = vld [vmem:[#allocation2 + $0x150] sm:$0xff] }
0x13ff   :  { %v5650_v9 = vpop.xlane.xlu2 %1508  ;;  %v5652_v13 = vpop.xlane.xlu0 %1517 }
0x1400   :  { %7149 = vst [vmem:[#allocation15_spill] sm:$0xff] %v5650_v9  ;;  %v1448_v14 = vmul.f32 %v1355_v49, %v1320_v46  ;;  %v1447_v60 = vmul.f32 %v1355_v49, %v1319_v54  ;;  %v1449_v34 = vmul.f32 %v1355_v49, %v1321_v57  ;;  %v1451_v5 = vmul.f32 %v1355_v49, %v1323_v24 }
0x1401   :  { %v5648_v58 = vpop.xlane.xlu1 %1496  ;;  %v1793_v54 = vperm.slane %v5579_v51, %v5701_v40 }
0x1402   :  { %7148 = vst [vmem:[#allocation14_spill] sm:$0xff] %v5648_v58  ;;  %v1684_v28 = vsel %vm234_vm0, %v1449_v34, 0.0 }
0x1404   :  { %1643 = vadd.xlane.f32.xlu2 %v1642_v16  ;;  %1652 = vadd.xlane.f32.xlu0 %v1651_v7  ;;  %v1660_v16 = vsel %vm1464_vm1, %v1441_v59, 0.0  ;;  %v1678_v7 = vsel %vm234_vm0, %v1447_v60, 0.0  ;;  %v5717_v59 = vadd.s32 4294967272, %v5697_v30  ;;  %v5722_v60 = vadd.s32 4294967264, %v5697_v30 }
0x1406   :  { %1631 = vadd.xlane.f32.xlu1 %v1630_v63  ;;  %v1681_v63 = vsel %vm234_vm0, %v1448_v14, 0.0  ;;  %v1777_v14 = vperm.slane %v5583_v53, %v5701_v40  ;;  %v1785_v23 = vperm.slane %v5595_v0, %v5717_v59  ;;  %v1797_v36 = vperm.slane %v5610_v12, %v5717_v59 }
0x1407   :  { %v5660_v11 = vpop.xlane.xlu2 %1532  ;;  %v5662_v21 = vpop.xlane.xlu0 %1520  ;;  %v1789_v18 = vperm.slane %v5621_v33, %v5722_v60 }
0x1408   :  { %7151 = vst [vmem:[#allocation17_spill] sm:$0xff] %v5660_v11  ;;  %v1779_v34 = vsel %vm1778_vm2, %v1777_v14, %v1775_v56 }
0x1409   :  { %v5658_v17 = vpop.xlane.xlu1 %1529  ;;  %7152 = vst [vmem:[#allocation18_spill] sm:$0xff] %v5662_v21 }
0x140a   :  { %7150 = vst [vmem:[#allocation16_spill] sm:$0xff] %v5658_v17 }
0x140c   :  { %1667 = vadd.xlane.f32.xlu2 %v1666_v26  ;;  %1655 = vadd.xlane.f32.xlu0 %v1654_v15 }
0x140e   :  { %1664 = vadd.xlane.f32.xlu1 %v1663_v25 }
0x140f   :  { %v5672_v41 = vpop.xlane.xlu2 %1535  ;;  %v5674_v42 = vpop.xlane.xlu0 %1511 }
0x1410   :  { %7154 = vst [vmem:[#allocation20_spill] sm:$0xff] %v5672_v41 }
0x1411   :  { %v5670_v31 = vpop.xlane.xlu1 %1523  ;;  %7155 = vst [vmem:[#allocation21_spill] sm:$0xff] %v5674_v42 }
0x1412   :  { %7153 = vst [vmem:[#allocation19_spill] sm:$0xff] %v5670_v31 }
0x1414   :  { %1670 = vadd.xlane.f32.xlu2 %v1669_v44  ;;  %1646 = vadd.xlane.f32.xlu0 %v1645_v50  ;;  %v5704_v44 = vadd.s32 4294967280, %v5697_v30 }
0x1416   :  { %1658 = vadd.xlane.f32.xlu1 %v1657_v43  ;;  %v1450_v43 = vmul.f32 %v1355_v49, %v1322_v35  ;;  %v1781_v57 = vperm.slane %v5568_v32, %v5704_v44  ;;  %v1795_v4 = vperm.slane %v5581_v52, %v5704_v44  ;;  %v1802_v35 = vperm.slane %v5593_v6, %v5701_v40 }
0x1417   :  { %v5682_v3 = vpop.xlane.xlu2 %1526  ;;  %v5684_v1 = vpop.xlane.xlu0 %1544 }
0x1418   :  { %7157 = vst [vmem:[#allocation23_spill] sm:$0xff] %v5682_v3  ;;  %v1826_v55 = vperm.slane %v5682_v3, %v5722_v60 }
0x1419   :  { %v5680_v62 = vpop.xlane.xlu1 %1547  ;;  %7158 = vst [vmem:[#allocation24_spill] sm:$0xff] %v5684_v1 }
0x141a   :  { %7156 = vst [vmem:[#allocation22_spill] sm:$0xff] %v5680_v62 }
0x141c   :  { %1661 = vadd.xlane.f32.xlu2 %v1660_v16  ;;  %1679 = vadd.xlane.f32.xlu0 %v1678_v7  ;;  %v1792_v16 = vperm.slane %v5566_v37, %v5697_v30  ;;  %v1687_v7 = vsel %vm234_vm0, %v1450_v43, 0.0  ;;  %v1801_v43 = vperm.slane %v5597_v2, %v5697_v30 }
0x141e   :  { %1682 = vadd.xlane.f32.xlu1 %v1681_v63  ;;  %v1690_v63 = vsel %vm1464_vm1, %v1451_v5, 0.0  ;;  %v1794_v38 = vsel %vm1778_vm2, %v1793_v54, %v1792_v16  ;;  %v1783_v5 = vsel %vm1782_vm3, %v1781_v57, %v1779_v34  ;;  %v1806_v34 = vperm.slane %v5639_v48, %v5717_v59 }
0x141f   :  { %v5691_v26 = vpop.xlane.xlu2 %1559  ;;  %v5693_v15 = vpop.xlane.xlu0 %1538  ;;  %v1796_v24 = vsel %vm1782_vm3, %v1795_v4, %v1794_v38  ;;  %v1787_v14 = vsel %vm1786_vm4, %v1785_v23, %v1783_v5  ;;  %v1813_v38 = vperm.slane %v5635_v45, %v5704_v44  ;;  %v1819_v23 = vperm.slane %v5637_v47, %v5697_v30 }
0x1420   :  { %7160 = vst [vmem:[#allocation26_spill] sm:$0xff] %v5691_v26  ;;  %v1798_v16 = vsel %vm1786_vm4, %v1797_v36, %v1796_v24  ;;  %v1791_v4 = vsel %vm1790_vm5, %v1789_v18, %v1787_v14  ;;  %v1808_v36 = vperm.slane %v5648_v58, %v5722_v60  ;;  %v1820_v24 = vperm.slane %v5652_v13, %v5701_v40 }
0x1421   :  { %v5689_v25 = vpop.xlane.xlu1 %1550  ;;  %7161 = vst [vmem:[#allocation27_spill] sm:$0xff] %v5693_v15  ;;  %v1803_v18 = vsel %vm1778_vm2, %v1802_v35, %v1801_v43  ;;  %v1828_v35 = vperm.slane %v5658_v17, %v5697_v30  ;;  %v1829_v43 = vperm.slane %v5660_v11, %v5701_v40 }
0x1422   :  { %7159 = vst [vmem:[#allocation25_spill] sm:$0xff] %v5689_v25  ;;  %v1821_v61 = vsel %vm1778_vm2, %v1820_v24, %v1819_v23  ;;  %v1831_v23 = vperm.slane %v5672_v41, %v5704_v44  ;;  %v1838_v24 = vperm.slane %v5680_v62, %v5701_v40 }
0x1424   :  { %1676 = vadd.xlane.f32.xlu2 %v1675_v29  ;;  %1673 = vadd.xlane.f32.xlu0 %v1672_v22  ;;  %v1810_v29 = vperm.slane %v5608_v8, %v5697_v30  ;;  %v1811_v22 = vperm.slane %v5625_v20, %v5701_v40 }
0x1426   :  { %1685 = vadd.xlane.f32.xlu1 %v1684_v28  ;;  %v1799_v28 = vperm.slane %v5623_v19, %v5722_v60  ;;  %v1812_v27 = vsel %vm1778_vm2, %v1811_v22, %v1810_v29  ;;  %v1815_v22 = vperm.slane %v5650_v9, %v5717_v59 }
0x1427   :  { %v5708_v46 = vpop.xlane.xlu2 %1553  ;;  %v5719_v49 = vpop.xlane.xlu0 %1562  ;;  %v1814_v14 = vsel %vm1782_vm3, %v1813_v38, %v1812_v27  ;;  %v1824_v27 = vperm.slane %v5670_v31, %v5717_v59 }
0x1428   :  { %7163 = vst [vmem:[#allocation29_spill] sm:$0xff] %v5708_v46  ;;  %v1800_v57 = vsel %vm1790_vm5, %v1799_v28, %v1798_v16  ;;  %v1842_v31 = vperm.slane %v5708_v46, %v5717_v59 }
0x1429   :  { %v5706_v50 = vpop.xlane.xlu1 %1541  ;;  %7164 = vst [vmem:[#allocation30_spill] sm:$0xff] %v5719_v49  ;;  %v1927_v5 = vsel %vm375_vm9, %v1800_v57, %v1791_v4  ;;  %v1846_v4 = vperm.slane %v5691_v26, %v5697_v30  ;;  %v1847_v57 = vperm.slane %v5719_v49, %v5701_v40  ;;  %v1840_v26 = vperm.slane %v5689_v25, %v5704_v44 }
0x142a   :  { %7162 = vst [vmem:[#allocation28_spill] sm:$0xff] %v5706_v50  ;;  %v1833_v49 = vperm.slane %v5693_v15, %v5717_v59  ;;  %v1835_v62 = vperm.slane %v5706_v50, %v5722_v60 }
0x142b   :  { %v1848_v25 = vsel %vm1778_vm2, %v1847_v57, %v1846_v4 }
0x142c   :  { %1688 = vadd.xlane.f32.xlu0 %v1687_v7 }
0x142e   :  { %1691 = vadd.xlane.f32.xlu1 %v1690_v63  ;;  %v1804_v63 = vperm.slane %v5606_v10, %v5704_v44 }
0x142f   :  { %v5754_v54 = vpop.xlane.xlu2 %1568  ;;  %v5760_v7 = vpop.xlane.xlu0 %1565 }
0x1430   :  { %7166 = vst [vmem:[#allocation32_spill] sm:$0xff] %v5754_v54  ;;  %v1805_v28 = vsel %vm1782_vm3, %v1804_v63, %v1803_v18  ;;  %v1822_v63 = vperm.slane %v5662_v21, %v5704_v44  ;;  %v1837_v18 = vperm.slane %v5684_v1, %v5697_v30 }
0x1431   :  { %v5752_v56 = vpop.xlane.xlu1 %1556  ;;  %7167 = vst [vmem:[#allocation33_spill] sm:$0xff] %v5760_v7  ;;  %v1807_v29 = vsel %vm1786_vm4, %v1806_v34, %v1805_v28 }
0x1432   :  { %7165 = vst [vmem:[#allocation31_spill] sm:$0xff] %v5752_v56  ;;  %v1809_v16 = vsel %vm1790_vm5, %v1808_v36, %v1807_v29  ;;  %v1817_v36 = vperm.slane %v5674_v42, %v5722_v60  ;;  %v1816_v29 = vsel %vm1786_vm4, %v1815_v22, %v1814_v14  ;;  %v1849_v14 = vperm.slane %v5760_v7, %v5704_v44 }
0x1433   :  { %v1929_v41 = vsel %vm1928_vm12, %v1809_v16, %v1927_v5  ;;  %v1830_v22 = vsel %vm1778_vm2, %v1829_v43, %v1828_v35  ;;  %v1823_v3 = vsel %vm1782_vm3, %v1822_v63, %v1821_v61  ;;  %v1844_v15 = vperm.slane %v5752_v56, %v5722_v60 }
0x1434   :  { %v1825_v5 = vsel %vm1786_vm4, %v1824_v27, %v1823_v3  ;;  %v1832_v16 = vsel %vm1782_vm3, %v1831_v23, %v1830_v22  ;;  %v1818_v50 = vsel %vm1790_vm5, %v1817_v36, %v1816_v29  ;;  %v1839_v46 = vsel %vm1778_vm2, %v1838_v24, %v1837_v18 }
0x1435   :  { %v1827_v11 = vsel %vm1790_vm5, %v1826_v55, %v1825_v5  ;;  %v1841_v7 = vsel %vm1782_vm3, %v1840_v26, %v1839_v46  ;;  %v1834_v35 = vsel %vm1786_vm4, %v1833_v49, %v1832_v16  ;;  %v1851_v61 = vperm.slane %v5754_v54, %v5717_v59 }
0x1436   :  { %v1836_v43 = vsel %vm1790_vm5, %v1835_v62, %v1834_v35  ;;  %v1843_v63 = vsel %vm1786_vm4, %v1842_v31, %v1841_v7  ;;  %v1850_v3 = vsel %vm1782_vm3, %v1849_v14, %v1848_v25  ;;  %v1931_v27 = vsel %vm1930_vm13, %v1818_v50, %v1929_v41 }
0x1437   :  { %v5798_v34 = vpop.xlane.xlu2 %1589  ;;  %v5808_v28 = vpop.xlane.xlu0 %1574  ;;  %v1845_v55 = vsel %vm1790_vm5, %v1844_v15, %v1843_v63  ;;  %v1933_v62 = vsel %vm1932_vm8, %v1827_v11, %v1931_v27  ;;  %v1852_v31 = vsel %vm1786_vm4, %v1851_v61, %v1850_v3 }
0x1438   :  { %7169 = vst [vmem:[#allocation35_spill] sm:$0xff] %v5798_v34  ;;  %v1935_v25 = vsel %vm1934_vm6, %v1836_v43, %v1933_v62  ;;  %v1864_v54 = vperm.slane %v5798_v34, %v5697_v30  ;;  %v1855_v1 = vperm.slane %v5808_v28, %v5697_v30 }
0x1439   :  { %v5796_v38 = vpop.xlane.xlu1 %1577  ;;  %7170 = vst [vmem:[#allocation36_spill] sm:$0xff] %v5808_v28  ;;  %v1937_v50 = vsel %vm1936_vm7, %v1845_v55, %v1935_v25 }
0x143a   :  { %7168 = vst [vmem:[#allocation34_spill] sm:$0xff] %v5796_v38  ;;  %v1856_v17 = vperm.slane %v5796_v38, %v5701_v40 }
0x143f   :  { %v5844_v57 = vpop.xlane.xlu2 %1580  ;;  %v5849_v46 = vpop.xlane.xlu0 %1592 }
0x1440   :  { %7172 = vst [vmem:[#allocation38_spill] sm:$0xff] %v5844_v57  ;;  %v1865_v56 = vperm.slane %v5849_v46, %v5701_v40  ;;  %v1858_v9 = vperm.slane %v5844_v57, %v5704_v44 }
0x1441   :  { %v5842_v4 = vpop.xlane.xlu1 %1571  ;;  %7173 = vst [vmem:[#allocation39_spill] sm:$0xff] %v5849_v46 }
0x1442   :  { %7171 = vst [vmem:[#allocation37_spill] sm:$0xff] %v5842_v4  ;;  %v1853_v26 = vperm.slane %v5842_v4, %v5722_v60 }
0x1444   :  { %v1854_v41 = vsel %vm1790_vm5, %v1853_v26, %v1852_v31 }
0x1445   :  { %v1939_v15 = vsel %vm1938_vm11, %v1854_v41, %v1937_v50 }
0x1446   :  { %v1950_v49 = vsel %vm1949_vm15, %v1939_v15, -inf }
0x1447   :  { %1951 = vmax.xlane.f32.xlu2 %v1950_v49  ;;  %v5860_v23 = vpop.xlane.xlu2 %1607  ;;  %v5862_v11 = vpop.xlane.xlu0 %1595 }
0x1448   :  { %7175 = vst [vmem:[#allocation41_spill] sm:$0xff] %v5860_v23  ;;  %v1874_v42 = vperm.slane %v5860_v23, %v5701_v40  ;;  %v1867_v34 = vperm.slane %v5862_v11, %v5704_v44 }
0x1449   :  { %v5858_v7 = vpop.xlane.xlu1 %1604  ;;  %7176 = vst [vmem:[#allocation42_spill] sm:$0xff] %v5862_v11  ;;  %v1857_v11 = vsel %vm1778_vm2, %v1856_v17, %v1855_v1 }
0x144a   :  { %7174 = vst [vmem:[#allocation40_spill] sm:$0xff] %v5858_v7  ;;  %v1873_v58 = vperm.slane %v5858_v7, %v5697_v30  ;;  %v1866_v7 = vsel %vm1778_vm2, %v1865_v56, %v1864_v54  ;;  %v1859_v21 = vsel %vm1782_vm3, %v1858_v9, %v1857_v11 }
0x144c   :  { %v1875_v19 = vsel %vm1778_vm2, %v1874_v42, %v1873_v58 }
0x144f   :  { %v5866_v24 = vpop.xlane.xlu2 %1610  ;;  %v5868_v18 = vpop.xlane.xlu0 %1583 }
0x1450   :  { %v1860_v45 = vperm.slane %v5868_v18, %v5717_v59 }
0x1451   :  { %v5864_v36 = vpop.xlane.xlu1 %1598 }
0x1452   :  { %7177 = vst [vmem:[#allocation43_spill] sm:$0xff] %v5864_v36  ;;  %v1869_v23 = vperm.slane %v5864_v36, %v5717_v59  ;;  %v1868_v36 = vsel %vm1782_vm3, %v1867_v34, %v1866_v7  ;;  %v1861_v58 = vsel %vm1786_vm4, %v1860_v45, %v1859_v21 }
0x1454   :  { %v1870_v9 = vsel %vm1786_vm4, %v1869_v23, %v1868_v36 }
0x1457   :  { %v5872_v14 = vpop.xlane.xlu2 %1586  ;;  %v5874_v22 = vpop.xlane.xlu0 %1619 }
0x1458   :  { %7179 = vst [vmem:[#allocation45_spill] sm:$0xff] %v5872_v14  ;;  %v1882_v46 = vperm.slane %v5874_v22, %v5697_v30 }
0x1459   :  { %v5870_v29 = vpop.xlane.xlu1 %1622  ;;  %7180 = vst [vmem:[#allocation46_spill] sm:$0xff] %v5874_v22  ;;  %v1862_v22 = vperm.slane %v5872_v14, %v5722_v60 }
0x145a   :  { %7178 = vst [vmem:[#allocation44_spill] sm:$0xff] %v5870_v29  ;;  %v1883_v38 = vperm.slane %v5870_v29, %v5701_v40  ;;  %v1876_v29 = vperm.slane %v5866_v24, %v5704_v44 }
0x145c   :  { %v1884_v17 = vsel %vm1778_vm2, %v1883_v38, %v1882_v46  ;;  %v1877_v34 = vsel %vm1782_vm3, %v1876_v29, %v1875_v19  ;;  %v1863_v38 = vsel %vm1790_vm5, %v1862_v22, %v1861_v58 }
0x145f   :  { %v5878_v16 = vpop.xlane.xlu2 %1625  ;;  %v5880_v35 = vpop.xlane.xlu0 %1601 }
0x1460   :  { %v1885_v54 = vperm.slane %v5878_v16, %v5704_v44  ;;  %v1871_v21 = vperm.slane %v5880_v35, %v5722_v60 }
0x1461   :  { %v5876_v5 = vpop.xlane.xlu1 %1613 }
0x1462   :  { %v1878_v56 = vperm.slane %v5876_v5, %v5717_v59  ;;  %v1886_v45 = vsel %vm1782_vm3, %v1885_v54, %v1884_v17 }
0x1464   :  { %v1879_v23 = vsel %vm1786_vm4, %v1878_v56, %v1877_v34 }
0x1467   :  { %v5884_v43 = vpop.xlane.xlu2 %1616  ;;  %v5886_v63 = vpop.xlane.xlu0 %1634 }
0x1468   :  { %v1891_v14 = vperm.slane %v5886_v63, %v5697_v30  ;;  %v1880_v36 = vperm.slane %v5884_v43, %v5722_v60 }
0x1469   :  { %v5882_v61 = vpop.xlane.xlu1 %1637 }
0x146a   :  { %v1892_v1 = vperm.slane %v5882_v61, %v5701_v40 }
0x146c   :  { %v1893_v19 = vsel %vm1778_vm2, %v1892_v1, %v1891_v14 }
0x146f   :  { %v5890_v27 = vpop.xlane.xlu2 %1649  ;;  %v5892_v55 = vpop.xlane.xlu0 %1628 }
0x1470   :  { %7182 = vst [vmem:[#allocation48_spill] sm:$0xff] %v5890_v27  ;;  %v1900_v42 = vperm.slane %v5890_v27, %v5697_v30  ;;  %v1887_v22 = vperm.slane %v5892_v55, %v5717_v59 }
0x1471   :  { %v5888_v3 = vpop.xlane.xlu1 %1640 }
0x1472   :  { %7181 = vst [vmem:[#allocation47_spill] sm:$0xff] %v5888_v3  ;;  %v1894_v29 = vperm.slane %v5888_v3, %v5704_v44 }
0x1477   :  { %v5896_v62 = vpop.xlane.xlu2 %1643  ;;  %v5898_v31 = vpop.xlane.xlu0 %1652 }
0x1478   :  { %7184 = vst [vmem:[#allocation50_spill] sm:$0xff] %v5896_v62  ;;  %v1901_v11 = vperm.slane %v5898_v31, %v5701_v40  ;;  %v1896_v17 = vperm.slane %v5896_v62, %v5717_v59 }
0x1479   :  { %v5894_v26 = vpop.xlane.xlu1 %1631 }
0x147a   :  { %7183 = vst [vmem:[#allocation49_spill] sm:$0xff] %v5894_v26  ;;  %v1889_v56 = vperm.slane %v5894_v26, %v5722_v60  ;;  %v1902_v58 = vsel %vm1778_vm2, %v1901_v11, %v1900_v42 }
0x147f   :  { %v5902_v41 = vpop.xlane.xlu2 %1667  ;;  %v5904_v50 = vpop.xlane.xlu0 %1655 }
0x1480   :  { %7186 = vst [vmem:[#allocation52_spill] sm:$0xff] %v5902_v41  ;;  %v1910_v7 = vperm.slane %v5902_v41, %v5701_v40  ;;  %v1903_v34 = vperm.slane %v5904_v50, %v5704_v44 }
0x1481   :  { %v5900_v25 = vpop.xlane.xlu1 %1664  ;;  %7187 = vst [vmem:[#allocation53_spill] sm:$0xff] %v5904_v50 }
0x1482   :  { %7185 = vst [vmem:[#allocation51_spill] sm:$0xff] %v5900_v25  ;;  %v1909_v46 = vperm.slane %v5900_v25, %v5697_v30 }
0x1484   :  { %v1911_v1 = vsel %vm1778_vm2, %v1910_v7, %v1909_v46  ;;  %v1872_v46 = vsel %vm1790_vm5, %v1871_v21, %v1870_v9  ;;  %v1881_v7 = vsel %vm1790_vm5, %v1880_v36, %v1879_v23  ;;  %v1904_v9 = vsel %vm1782_vm3, %v1903_v34, %v1902_v58 }
0x1487   :  { %v5908_v49 = vpop.xlane.xlu2 %1670  ;;  %v5910_v4 = vpop.xlane.xlu0 %1646 }
0x1488   :  { %7189 = vst [vmem:[#allocation55_spill] sm:$0xff] %v5908_v49  ;;  %v1912_v14 = vperm.slane %v5908_v49, %v5704_v44  ;;  %v1898_v62 = vperm.slane %v5910_v4, %v5722_v60  ;;  %v4877_v49 = vmov 0  }
0x1489   :  { %v5906_v15 = vpop.xlane.xlu1 %1658  ;;  %7190 = vst [vmem:[#allocation56_spill] sm:$0xff] %v5910_v4  ;;  %4468 = vset.pattern.permute.xlu0 %v4877_v49  ;;  %4467 = vset.pattern.permute.xlu2 %v4877_v49  ;;  %v1895_v4 = vsel %vm1782_vm3, %v1894_v29, %v1893_v19 }
0x148a   :  { %7188 = vst [vmem:[#allocation54_spill] sm:$0xff] %v5906_v15  ;;  %v1905_v41 = vperm.slane %v5906_v15, %v5717_v59  ;;  %4466 = vset.pattern.permute.xlu1 %v4877_v49  ;;  %v1913_v50 = vsel %vm1782_vm3, %v1912_v14, %v1911_v1  ;;  %v1897_v3 = vsel %vm1786_vm4, %v1896_v17, %v1895_v4 }
0x148b   :  { %v1940_v49 = vsel %vm375_vm9, %v1872_v46, %v1863_v38  ;;  %v1899_v36 = vsel %vm1790_vm5, %v1898_v62, %v1897_v3 }
0x148c   :  { %v1906_v21 = vsel %vm1786_vm4, %v1905_v41, %v1904_v9 }
0x148f   :  { %v5934_v28 = vpop.xlane.xlu2 %1661  ;;  %v5936_v57 = vpop.xlane.xlu0 %1679 }
0x1490   :  { %7192 = vst [vmem:[#allocation58_spill] sm:$0xff] %v5936_v57  ;;  %v1918_v11 = vperm.slane %v5936_v57, %v5697_v30  ;;  %v1907_v15 = vperm.slane %v5934_v28, %v5722_v60 }
0x1491   :  { %v5926_v47 = vpop.xlane.xlu1 %1682 }
0x1492   :  { %7191 = vst [vmem:[#allocation57_spill] sm:$0xff] %v5926_v47  ;;  %v1919_v42 = vperm.slane %v5926_v47, %v5701_v40  ;;  %v1908_v4 = vsel %vm1790_vm5, %v1907_v15, %v1906_v21 }
0x1494   :  { %v1920_v19 = vsel %vm1778_vm2, %v1919_v42, %v1918_v11 }
0x1497   :  { %v5987_v54 = vpop.xlane.xlu0 %1673  ;;  %v6001_v26 = vpop.xlane.xlu2 %1676 }
0x1498   :  { %7193 = vst [vmem:[#allocation59_spill] sm:$0xff] %v5987_v54  ;;  %v1914_v25 = vperm.slane %v5987_v54, %v5717_v59  ;;  %v1888_v54 = vsel %vm1786_vm4, %v1887_v22, %v1886_v45  ;;  %v1916_v57 = vperm.slane %v6001_v26, %v5722_v60  ;;  %v1941_v22 = vsel %vm1928_vm12, %v1881_v7, %v1940_v49 }
0x1499   :  { %v5978_v27 = vpop.xlane.xlu1 %1685  ;;  %v1890_v47 = vsel %vm1790_vm5, %v1889_v56, %v1888_v54 }
0x149a   :  { %v1921_v23 = vperm.slane %v5978_v27, %v5704_v44  ;;  %v1915_v45 = vsel %vm1786_vm4, %v1914_v25, %v1913_v50  ;;  %v1942_v25 = vsel %vm1930_vm13, %v1890_v47, %v1941_v22 }
0x149b   :  { %v1917_v3 = vsel %vm1790_vm5, %v1916_v57, %v1915_v45  ;;  %v1943_v50 = vsel %vm1932_vm8, %v1899_v36, %v1942_v25 }
0x149c   :  { %v1922_v62 = vsel %vm1782_vm3, %v1921_v23, %v1920_v19  ;;  %v1944_v15 = vsel %vm1934_vm6, %v1908_v4, %v1943_v50 }
0x149d   :  { %v1945_v58 = vsel %vm1936_vm7, %v1917_v3, %v1944_v15 }
0x149f   :  { %v6032_v56 = vpop.xlane.xlu0 %1688 }
0x14a0   :  { %v1923_v41 = vperm.slane %v6032_v56, %v5717_v59 }
0x14a1   :  { %v6028_v29 = vpop.xlane.xlu1 %1691 }
0x14a2   :  { %v1925_v54 = vperm.slane %v6028_v29, %v5722_v60  ;;  %v1924_v38 = vsel %vm1786_vm4, %v1923_v41, %v1922_v62 }
0x14a4   :  { %v1926_v17 = vsel %vm1790_vm5, %v1925_v54, %v1924_v38 }
0x14a5   :  { %v1946_v34 = vsel %vm1938_vm11, %v1926_v17, %v1945_v58 }
0x14a6   :  { %v1953_v47 = vsel %vm1949_vm15, %v1946_v34, -inf }
0x14a7   :  { %1954 = vmax.xlane.f32.xlu0 %v1953_v47 }
0x14ba   :  { %v6048_v14 = vpop.xlane.xlu2 %1951 }
0x14bb   :  { %v6051_v57 = vperm.slane %v6048_v14, 0  ;;  %v6054_v1 = vperm.slane %v6048_v14, 1  ;;  %v6072_v19 = vperm.slane %v6048_v14, 3  ;;  %v6087_v34 = vperm.slane %v6048_v14, 4 }
0x14bd   :  { %v1991_v42 = vsub.f32 %v5583_v53, %v6051_v57  ;;  %v1990_v11 = vsub.f32 %v5570_v39, %v6051_v57  ;;  %v1995_v46 = vsub.f32 %v5566_v37, %v6054_v1  ;;  %v1996_v45 = vsub.f32 %v5579_v51, %v6054_v1 }
0x14be   :  { %v1992_v49 = vsub.f32 %v5568_v32, %v6051_v57  ;;  %v1998_v53 = vsub.f32 %v5610_v12, %v6054_v1  ;;  %v6069_v39 = vperm.slane %v6048_v14, 2  ;;  %v1997_v32 = vsub.f32 %v5581_v52, %v6054_v1 }
0x14bf   :  { %v2072_v7 = vmul.f32 1.442695, %v1991_v42  ;;  %v2070_v9 = vmul.f32 1.442695, %v1990_v11  ;;  %v2080_v23 = vmul.f32 1.442695, %v1995_v46  ;;  %v2006_v54 = vsub.f32 %v5625_v20, %v6072_v19 }
0x14c0   :  { %v2082_v21 = vmul.f32 1.442695, %v1996_v45  ;;  %v2074_v37 = vmul.f32 1.442695, %v1992_v49  ;;  %v2086_v22 = vmul.f32 1.442695, %v1998_v53  ;;  %v2000_v12 = vsub.f32 %v5597_v2, %v6069_v39 }
0x14c1   :  { %4470 = vpow2.f32 %v2072_v7  ;;  %v2084_v25 = vmul.f32 1.442695, %v1997_v32  ;;  %v2102_v62 = vmul.f32 1.442695, %v2006_v54  ;;  %v2001_v52 = vsub.f32 %v5593_v6, %v6069_v39  ;;  %v7198_v54 = vld [vmem:[#allocation21_spill] sm:$0xff] }
0x14c2   :  { %4472 = vpow2.f32 %v2070_v9  ;;  %v2090_v41 = vmul.f32 1.442695, %v2000_v12  ;;  %v1993_v2 = vsub.f32 %v5595_v0, %v6051_v57  ;;  %v2003_v20 = vsub.f32 %v5639_v48, %v6069_v39 }
0x14c3   :  { %4474 = vpow2.f32 %v2080_v23  ;;  %v2092_v15 = vmul.f32 1.442695, %v2001_v52  ;;  %v2002_v6 = vsub.f32 %v5606_v10, %v6069_v39  ;;  %v2005_v0 = vsub.f32 %v5608_v8, %v6072_v19  ;;  %v7194_v8 = vld [vmem:[#allocation11_spill] sm:$0xff] }
0x14c4   :  { %4476 = vpow2.f32 %v2082_v21  ;;  %v2076_v17 = vmul.f32 1.442695, %v1993_v2  ;;  %v2096_v47 = vmul.f32 1.442695, %v2003_v20  ;;  %v2011_v48 = vsub.f32 %v5652_v13, %v6087_v34  ;;  %v7195_v13 = vld [vmem:[#allocation18_spill] sm:$0xff] }
0x14c5   :  { %4478 = vpow2.f32 %v2074_v37  ;;  %v2094_v46 = vmul.f32 1.442695, %v2002_v6  ;;  %v2100_v7 = vmul.f32 1.442695, %v2005_v0  ;;  %v1994_v10 = vsub.f32 %v5621_v33, %v6051_v57  ;;  %v7196_v33 = vld [vmem:[#allocation12_spill] sm:$0xff]  ;;  %v7199_v20 = vld [vmem:[#allocation14_spill] sm:$0xff] }
0x14c6   :  { %4480 = vpow2.f32 %v2086_v22  ;;  %v2112_v23 = vmul.f32 1.442695, %v2011_v48  ;;  %v1999_v53 = vsub.f32 %v7194_v8, %v6054_v1  ;;  %v2012_v21 = vsub.f32 %v7195_v13, %v6087_v34  ;;  %v7197_v1 = vld [vmem:[#allocation13_spill] sm:$0xff] }
0x14c7   :  { %v4471_v36 = vpop.eup %4470  ;;  %4482 = vpow2.f32 %v2084_v25  ;;  %v2078_v37 = vmul.f32 1.442695, %v1994_v10  ;;  %v2007_v57 = vsub.f32 %v7196_v33, %v6072_v19  ;;  %v2010_v12 = vsub.f32 %v7197_v1, %v6087_v34 }
0x14c8   :  { %v4473_v4 = vpop.eup %4472  ;;  %2314 = vperm.xlu2 %4467, %v4471_v36   ;;  %4484 = vpow2.f32 %v2090_v41  ;;  %v2088_v36 = vmul.f32 1.442695, %v1999_v53  ;;  %v2009_v25 = vsub.f32 %v7198_v54, %v6072_v19 }
0x14c9   :  { %v4475_v51 = vpop.eup %4474  ;;  %2311 = vperm.xlu1 %4466, %v4473_v4   ;;  %4486 = vpow2.f32 %v2102_v62  ;;  %v2114_v4 = vmul.f32 1.442695, %v2012_v21  ;;  %v2104_v41 = vmul.f32 1.442695, %v2007_v57  ;;  %v6126_v21 = vperm.slane %v6048_v14, 7  ;;  %v7207_v57 = vld [vmem:[#allocation30_spill] sm:$0xff] }
0x14ca   :  { %2326 = vperm.xlu0 %4468, %v4475_v51   ;;  %v4477_v3 = vpop.eup %4476  ;;  %4488 = vpow2.f32 %v2092_v15  ;;  %v2004_v15 = vsub.f32 %v7199_v20, %v6069_v39  ;;  %v7202_v39 = vld [vmem:[#allocation16_spill] sm:$0xff]  ;;  %v7210_v20 = vld [vmem:[#allocation33_spill] sm:$0xff] }
0x14cb   :  { %v4479_v50 = vpop.eup %4478  ;;  %4490 = vpow2.f32 %v2076_v17  ;;  %v7200_v17 = vld [vmem:[#allocation15_spill] sm:$0xff]  ;;  %v2026_v1 = vsub.f32 %v7207_v57, %v6126_v21 }
0x14cc   :  { %v4481_v38 = vpop.eup %4480  ;;  %4492 = vpow2.f32 %v2096_v47  ;;  %v7201_v47 = vld [vmem:[#allocation24_spill] sm:$0xff]  ;;  %v2098_v6 = vmul.f32 1.442695, %v2004_v15  ;;  %v2027_v15 = vsub.f32 %v7210_v20, %v6126_v21 }
0x14cd   :  { %v4483_v58 = vpop.eup %4482  ;;  %4494 = vpow2.f32 %v2094_v46 }
0x14ce   :  { %v4485_v42 = vpop.eup %4484  ;;  %4496 = vpow2.f32 %v2100_v7 }
0x14cf   :  { %v4487_v11 = vpop.eup %4486  ;;  %4498 = vpow2.f32 %v2112_v23 }
0x14d0   :  { %2329 = vperm.xlu2 %4467, %v4477_v3   ;;  %v4489_v9 = vpop.eup %4488  ;;  %4500 = vpow2.f32 %v2078_v37  ;;  %v2110_v3 = vmul.f32 1.442695, %v2010_v12 }
0x14d1   :  { %2317 = vperm.xlu1 %4466, %v4479_v50   ;;  %v4491_v45 = vpop.eup %4490  ;;  %4502 = vpow2.f32 %v2088_v36  ;;  %v6108_v50 = vperm.slane %v6048_v14, 6 }
0x14d2   :  { %2335 = vperm.xlu0 %4468, %v4481_v38   ;;  %v4493_v49 = vpop.eup %4492  ;;  %4504 = vpow2.f32 %v2114_v4  ;;  %v2108_v38 = vmul.f32 1.442695, %v2009_v25  ;;  %v7205_v4 = vld [vmem:[#allocation19_spill] sm:$0xff]  ;;  %v2142_v25 = vmul.f32 1.442695, %v2026_v1 }
0x14d3   :  { %v4495_v22 = vpop.eup %4494  ;;  %4506 = vpow2.f32 %v2104_v41  ;;  %v7216_v1 = vld [vmem:[#allocation31_spill] sm:$0xff] }
0x14d4   :  { %v4497_v51 = vpop.eup %4496  ;;  %4508 = vpow2.f32 %v2110_v3 }
0x14d5   :  { %v4499_v32 = vpop.eup %4498  ;;  %4510 = vpow2.f32 %v2108_v38 }
0x14d6   :  { %v4501_v62 = vpop.eup %4500  ;;  %4512 = vpow2.f32 %v2098_v6 }
0x14d7   :  { %v4503_v52 = vpop.eup %4502 }
0x14d8   :  { %2332 = vperm.xlu2 %4467, %v4483_v58   ;;  %v4505_v2 = vpop.eup %4504  ;;  %v2008_v58 = vsub.f32 %v7200_v17, %v6072_v19  ;;  %v7203_v19 = vld [vmem:[#allocation17_spill] sm:$0xff] }
0x14d9   :  { %2341 = vperm.xlu1 %4466, %v4485_v42   ;;  %v2020_v42 = vsub.f32 %v7201_v47, %v6108_v50  ;;  %v4507_v48 = vpop.eup %4506 }
0x14da   :  { %2359 = vperm.xlu0 %4468, %v4487_v11   ;;  %v6117_v11 = vperm.slane %v6048_v14, 5  ;;  %v2106_v0 = vmul.f32 1.442695, %v2008_v58  ;;  %v4509_v7 = vpop.eup %4508 }
0x14db   :  { %v2130_v46 = vmul.f32 1.442695, %v2020_v42  ;;  %v2144_v42 = vmul.f32 1.442695, %v2027_v15 }
0x14dc   :  { %v2015_v23 = vsub.f32 %v7202_v39, %v6117_v11  ;;  %4514 = vpow2.f32 %v2106_v0 }
0x14dd   :  { %4516 = vpow2.f32 %v2130_v46 }
0x14de   :  { %v2120_v8 = vmul.f32 1.442695, %v2015_v23 }
0x14e0   :  { %2344 = vperm.xlu2 %4467, %v4489_v9   ;;  %v4511_v9 = vpop.eup %4510  ;;  %4518 = vpow2.f32 %v2120_v8  ;;  %v7214_v8 = vld [vmem:[#allocation29_spill] sm:$0xff] }
0x14e1   :  { %2320 = vperm.xlu1 %4466, %v4491_v45   ;;  %v2016_v45 = vsub.f32 %v7203_v19, %v6117_v11  ;;  %v4513_v13 = vpop.eup %4512 }
0x14e2   :  { %2350 = vperm.xlu0 %4468, %v4493_v49   ;;  %v7204_v49 = vld [vmem:[#allocation27_spill] sm:$0xff]  ;;  %v4515_v36 = vpop.eup %4514 }
0x14e3   :  { %v2018_v10 = vsub.f32 %v7204_v49, %v6117_v11  ;;  %v2122_v53 = vmul.f32 1.442695, %v2016_v45  ;;  %v7213_v49 = vld [vmem:[#allocation28_spill] sm:$0xff] }
0x14e5   :  { %v2126_v37 = vmul.f32 1.442695, %v2018_v10  ;;  %4520 = vpow2.f32 %v2122_v53  ;;  %v2019_v10 = vsub.f32 %v7213_v49, %v6117_v11  ;;  %v2023_v53 = vsub.f32 %v7214_v8, %v6108_v50  ;;  %v7223_v49 = vld [vmem:[#allocation38_spill] sm:$0xff] }
0x14e7   :  { %4522 = vpow2.f32 %v2126_v37 }
0x14e8   :  { %2347 = vperm.xlu2 %4467, %v4495_v22   ;;  %v4517_v22 = vpop.eup %4516 }
0x14e9   :  { %2356 = vperm.xlu1 %4466, %v4497_v51   ;;  %v2013_v51 = vsub.f32 %v7205_v4, %v6087_v34  ;;  %v4519_v54 = vpop.eup %4518 }
0x14ea   :  { %2374 = vperm.xlu0 %4468, %v4499_v32   ;;  %v7206_v32 = vld [vmem:[#allocation20_spill] sm:$0xff] }
0x14eb   :  { %v2017_v33 = vsub.f32 %v7206_v32, %v6117_v11  ;;  %v2116_v14 = vmul.f32 1.442695, %v2013_v51  ;;  %v4521_v41 = vpop.eup %4520  ;;  %v7215_v32 = vld [vmem:[#allocation36_spill] sm:$0xff] }
0x14ed   :  { %v2124_v12 = vmul.f32 1.442695, %v2017_v33  ;;  %v4523_v3 = vpop.eup %4522  ;;  %4524 = vpow2.f32 %v2116_v14  ;;  %v2024_v14 = vsub.f32 %v7216_v1, %v6108_v50 }
0x14ef   :  { %4526 = vpow2.f32 %v2124_v12 }
0x14f0   :  { %2323 = vperm.xlu2 %4467, %v4501_v62   ;;  %v7208_v62 = vld [vmem:[#allocation22_spill] sm:$0xff]  ;;  %4528 = vpow2.f32 %v2142_v25 }
0x14f1   :  { %2338 = vperm.xlu1 %4466, %v4503_v52   ;;  %v2021_v38 = vsub.f32 %v7208_v62, %v6108_v50  ;;  %v7209_v52 = vld [vmem:[#allocation23_spill] sm:$0xff]  ;;  %v2138_v62 = vmul.f32 1.442695, %v2024_v14  ;;  %v7225_v14 = vld [vmem:[#allocation41_spill] sm:$0xff] }
0x14f2   :  { %2377 = vperm.xlu0 %4468, %v4505_v2   ;;  %v2014_v2 = vsub.f32 %v7209_v52, %v6087_v34  ;;  %v7212_v34 = vld [vmem:[#allocation26_spill] sm:$0xff] }
0x14f3   :  { %v2132_v17 = vmul.f32 1.442695, %v2021_v38  ;;  %v4525_v47 = vpop.eup %4524 }
0x14f4   :  { %v2118_v58 = vmul.f32 1.442695, %v2014_v2 }
0x14f5   :  { %v4527_v6 = vpop.eup %4526  ;;  %4530 = vpow2.f32 %v2132_v17 }
0x14f6   :  { %v4529_v0 = vpop.eup %4528  ;;  %4532 = vpow2.f32 %v2118_v58 }
0x14f7   :  { %4534 = vpow2.f32 %v2144_v42 }
0x14f8   :  { %2362 = vperm.xlu2 %4467, %v4507_v48   ;;  %v7211_v48 = vld [vmem:[#allocation25_spill] sm:$0xff] }
0x14f9   :  { %2371 = vperm.xlu1 %4466, %v4509_v7   ;;  %v2022_v46 = vsub.f32 %v7211_v48, %v6108_v50  ;;  %v2025_v7 = vsub.f32 %v7212_v34, %v6126_v21  ;;  %v7219_v50 = vld [vmem:[#allocation34_spill] sm:$0xff] }
0x14fa   :  { %2368 = vperm.xlu0 %4468, %v4511_v9  }
0x14fb   :  { %v2134_v9 = vmul.f32 1.442695, %v2022_v46  ;;  %v2140_v39 = vmul.f32 1.442695, %v2025_v7  ;;  %v4531_v23 = vpop.eup %4530 }
0x14fc   :  { %v4533_v19 = vpop.eup %4532 }
0x14fd   :  { %v4535_v45 = vpop.eup %4534  ;;  %4536 = vpow2.f32 %v2134_v9 }
0x14fe   :  { %4538 = vpow2.f32 %v2140_v39 }
0x1500   :  { %2353 = vperm.xlu2 %4467, %v4513_v13  }
0x1501   :  { %2365 = vperm.xlu1 %4466, %v4515_v36   ;;  %v2128_v36 = vmul.f32 1.442695, %v2019_v10 }
0x1502   :  { %2401 = vperm.xlu0 %4468, %v4517_v22   ;;  %v2136_v22 = vmul.f32 1.442695, %v2023_v53 }
0x1503   :  { %v4537_v4 = vpop.eup %4536  ;;  %4540 = vpow2.f32 %v2128_v36 }
0x1504   :  { %v4539_v11 = vpop.eup %4538  ;;  %4542 = vpow2.f32 %v2136_v22 }
0x1508   :  { %2386 = vperm.xlu2 %4467, %v4519_v54   ;;  %v7217_v54 = vld [vmem:[#allocation32_spill] sm:$0xff] }
0x1509   :  { %2389 = vperm.xlu1 %4466, %v4521_v41   ;;  %v2028_v25 = vsub.f32 %v7217_v54, %v6126_v21  ;;  %v7218_v41 = vld [vmem:[#allocation39_spill] sm:$0xff]  ;;  %v4541_v52 = vpop.eup %4540 }
0x150a   :  { %2395 = vperm.xlu0 %4468, %v4523_v3   ;;  %v4543_v20 = vpop.eup %4542 }
0x150b   :  { %v2146_v38 = vmul.f32 1.442695, %v2028_v25 }
0x1510   :  { %2380 = vperm.xlu2 %4467, %v4525_v47   ;;  %v7220_v47 = vld [vmem:[#allocation35_spill] sm:$0xff] }
0x1511   :  { %2392 = vperm.xlu1 %4466, %v4527_v6   ;;  %v7221_v6 = vld [vmem:[#allocation42_spill] sm:$0xff] }
0x1512   :  { %2419 = vperm.xlu0 %4468, %v4529_v0  }
0x1518   :  { %2404 = vperm.xlu2 %4467, %v4531_v23   ;;  %v7222_v23 = vld [vmem:[#allocation37_spill] sm:$0xff] }
0x1519   :  { %2383 = vperm.xlu1 %4466, %v4533_v19   ;;  %v2029_v19 = vsub.f32 %v7222_v23, %v6126_v21 }
0x151a   :  { %2422 = vperm.xlu0 %4468, %v4535_v45   ;;  %v6148_v13 = vpop.xlane.xlu0 %1954 }
0x151b   :  { %v6151_v37 = vperm.slane %v6148_v13, 0  ;;  %v6154_v51 = vperm.slane %v6148_v13, 1  ;;  %v6183_v53 = vperm.slane %v6148_v13, 2  ;;  %v2148_v36 = vmul.f32 1.442695, %v2029_v19 }
0x151c   :  { %v6205_v19 = vperm.slane %v6148_v13, 4 }
0x151d   :  { %v2030_v33 = vsub.f32 %v7215_v32, %v6151_v37  ;;  %v2036_v3 = vsub.f32 %v7218_v41, %v6154_v51  ;;  %v2031_v17 = vsub.f32 %v7219_v50, %v6151_v37  ;;  %v2035_v42 = vsub.f32 %v7220_v47, %v6154_v51  ;;  %v7226_v41 = vld [vmem:[#allocation46_spill] sm:$0xff] }
0x151e   :  { %v2037_v0 = vsub.f32 %v7221_v6, %v6154_v51  ;;  %v2032_v10 = vsub.f32 %v7223_v49, %v6151_v37  ;;  %v2033_v8 = vsub.f32 %v5868_v18, %v6151_v37  ;;  %v6186_v32 = vperm.slane %v6148_v13, 3  ;;  %v4769_v47 = vld [vmem:[#allocation2 + $0xf8] sm:$0xff] }
0x151f   :  { %v2150_v57 = vmul.f32 1.442695, %v2030_v33  ;;  %v2162_v2 = vmul.f32 1.442695, %v2036_v3  ;;  %v2152_v48 = vmul.f32 1.442695, %v2031_v17  ;;  %v2041_v54 = vsub.f32 %v7225_v14, %v6183_v53 }
0x1520   :  { %2407 = vperm.xlu2 %4467, %v4537_v4   ;;  %v2160_v46 = vmul.f32 1.442695, %v2035_v42  ;;  %v2164_v7 = vmul.f32 1.442695, %v2037_v0  ;;  %v2154_v22 = vmul.f32 1.442695, %v2032_v10  ;;  %v2045_v3 = vsub.f32 %v7226_v41, %v6186_v32 }
0x1521   :  { %2416 = vperm.xlu1 %4466, %v4539_v11   ;;  %4544 = vpow2.f32 %v2150_v57  ;;  %v2156_v21 = vmul.f32 1.442695, %v2033_v8  ;;  %v7224_v57 = vld [vmem:[#allocation40_spill] sm:$0xff]  ;;  %v2172_v6 = vmul.f32 1.442695, %v2041_v54  ;;  %v2042_v0 = vsub.f32 %v5866_v24, %v6183_v53 }
0x1522   :  { %v6160_v12 = vpop.permute.xlu2 %2314  ;;  %4546 = vpow2.f32 %v2138_v62  ;;  %v2040_v1 = vsub.f32 %v7224_v57, %v6183_v53  ;;  %v4766_v62 = vld [vmem:[#allocation2 + $0x8] sm:$0xff]  ;;  %v2039_v57 = vsub.f32 %v5880_v35, %v6154_v51 }
0x1523   :  { %4548 = vpow2.f32 %v2146_v38  ;;  %v2797_v38 = vmul.f32 %v4766_v62, %v6160_v12  ;;  %v2551_v49 = vperm.slane %v6160_v12, %v5701_v40  ;;  %v4770_v8 = vld [vmem:[#allocation2 + $0x88] sm:$0xff]  ;;  %v4771_v62 = vld [vmem:[#allocation2 + $0x50] sm:$0xff] }
0x1524   :  { %4550 = vpow2.f32 %v2162_v2  ;;  %v4767_v2 = vld [vmem:[#allocation2 + $0x128] sm:$0xff]  ;;  %v2170_v17 = vmul.f32 1.442695, %v2040_v1 }
0x1525   :  { %4552 = vpow2.f32 %v2152_v48  ;;  %v2877_v10 = vsel %vm234_vm0, %v2797_v38, 0.0 }
0x1526   :  { %4554 = vpow2.f32 %v2160_v46 }
0x1527   :  { %v4545_v15 = vpop.eup %4544  ;;  %4556 = vpow2.f32 %v2164_v7  ;;  %v2180_v7 = vmul.f32 1.442695, %v2045_v3 }
0x1528   :  { %2398 = vperm.xlu2 %4467, %v4541_v52   ;;  %2431 = vperm.xlu0 %4468, %v4545_v15   ;;  %v4547_v34 = vpop.eup %4546  ;;  %4558 = vpow2.f32 %v2148_v36  ;;  %v4768_v15 = vld [vmem:[#allocation2 + $0x120] sm:$0xff] }
0x1529   :  { %2410 = vperm.xlu1 %4466, %v4543_v20   ;;  %v4549_v9 = vpop.eup %4548  ;;  %4560 = vpow2.f32 %v2154_v22 }
0x152a   :  { %v6168_v58 = vpop.permute.xlu2 %2329  ;;  %v4551_v39 = vpop.eup %4550  ;;  %4562 = vpow2.f32 %v2156_v21 }
0x152b   :  { %v4553_v4 = vpop.eup %4552  ;;  %v2802_v20 = vmul.f32 %v4767_v2, %v6168_v58  ;;  %v2560_v22 = vperm.slane %v6168_v58, %v5701_v40  ;;  %4564 = vpow2.f32 %v2170_v17  ;;  %v2174_v58 = vmul.f32 1.442695, %v2042_v0 }
0x152c   :  { %v4555_v33 = vpop.eup %4554  ;;  %4566 = vpow2.f32 %v2172_v6 }
0x152d   :  { %v4557_v11 = vpop.eup %4556  ;;  %4568 = vpow2.f32 %v2180_v7 }
0x152e   :  { %v4559_v48 = vpop.eup %4558 }
0x152f   :  { %v4561_v23 = vpop.eup %4560 }
0x1530   :  { %2413 = vperm.xlu2 %4467, %v4547_v34   ;;  %2449 = vperm.xlu0 %4468, %v4551_v39   ;;  %v4563_v36 = vpop.eup %4562 }
0x1531   :  { %2425 = vperm.xlu1 %4466, %v4549_v9   ;;  %v7227_v9 = vld [vmem:[#allocation43_spill] sm:$0xff] }
0x1532   :  { %v6176_v45 = vpop.permute.xlu2 %2332  ;;  %v2038_v39 = vsub.f32 %v7227_v9, %v6154_v51  ;;  %v4772_v51 = vld [vmem:[#allocation2 + $0x168] sm:$0xff] }
0x1533   :  { %v2803_v24 = vmul.f32 %v4770_v8, %v6176_v45 }
0x1534   :  { %v2166_v54 = vmul.f32 1.442695, %v2038_v39  ;;  %v7228_v39 = vld [vmem:[#allocation44_spill] sm:$0xff] }
0x1535   :  { %v2894_v41 = vsel %vm234_vm0, %v2803_v24, 0.0  ;;  %v7229_v24 = vld [vmem:[#allocation45_spill] sm:$0xff] }
0x1536   :  { %4570 = vpow2.f32 %v2166_v54 }
0x1537   :  { %4572 = vpow2.f32 %v2174_v58 }
0x1538   :  { %2434 = vperm.xlu2 %4467, %v4553_v4   ;;  %2452 = vperm.xlu0 %4468, %v4557_v11   ;;  %v2892_v4 = vsel %vm234_vm0, %v2802_v20, 0.0 }
0x1539   :  { %2446 = vperm.xlu1 %4466, %v4555_v33  }
0x153a   :  { %v6190_v18 = vpop.permute.xlu2 %2344 }
0x153b   :  { %v2312_v25 = vpop.permute.xlu1 %2311 }
0x153c   :  { %v2327_v52 = vpop.permute.xlu0 %2326  ;;  %v2796_v42 = vmul.f32 %v4769_v47, %v2312_v25  ;;  %v2550_v21 = vperm.slane %v2312_v25, %v5697_v30  ;;  %v2562_v25 = vperm.slane %v6176_v45, %v5704_v44 }
0x153d   :  { %v2801_v50 = vmul.f32 %v4768_v15, %v2327_v52  ;;  %v2559_v46 = vperm.slane %v2327_v52, %v5697_v30 }
0x153e   :  { %v2876_v33 = vsel %vm234_vm0, %v2796_v42, 0.0  ;;  %v2552_v2 = vsel %vm1778_vm2, %v2551_v49, %v2550_v21  ;;  %v4565_v42 = vpop.eup %4564  ;;  %v4773_v49 = vld [vmem:[#allocation2 + $0x198] sm:$0xff]  ;;  %v2569_v21 = vperm.slane %v6190_v18, %v5701_v40 }
0x153f   :  { %v2891_v34 = vsel %vm234_vm0, %v2801_v50, 0.0  ;;  %v2561_v1 = vsel %vm1778_vm2, %v2560_v22, %v2559_v46  ;;  %v2878_v20 = vadd.f32 %v2877_v10, %v2876_v33  ;;  %v2168_v46 = vmul.f32 1.442695, %v2039_v57  ;;  %v4774_v33 = vld [vmem:[#allocation2 + $0x1a8] sm:$0xff] }
0x1540   :  { %2428 = vperm.xlu2 %4467, %v4559_v48   ;;  %v2893_v11 = vadd.f32 %v2892_v4, %v2891_v34  ;;  %2440 = vperm.xlu0 %4468, %v4563_v36   ;;  %v2563_v45 = vsel %vm1782_vm3, %v2562_v25, %v2561_v1  ;;  %v4567_v34 = vpop.eup %4566  ;;  %v2807_v10 = vmul.f32 %v4773_v49, %v6190_v18  ;;  %v4775_v1 = vld [vmem:[#allocation2 + $0x108] sm:$0xff] }
0x1541   :  { %2437 = vperm.xlu1 %4466, %v4561_v23   ;;  %v4569_v9 = vpop.eup %4568  ;;  %v2046_v23 = vsub.f32 %v7228_v39, %v6186_v32  ;;  %v2034_v36 = vsub.f32 %v7229_v24, %v6151_v37  ;;  %4574 = vpow2.f32 %v2168_v46  ;;  %v2050_v4 = vsub.f32 %v5886_v63, %v6205_v19 }
0x1542   :  { %v2348_v12 = vpop.permute.xlu2 %2347  ;;  %v2895_v47 = vadd.f32 %v2894_v41, %v2893_v11  ;;  %v2907_v37 = vsel %vm234_vm0, %v2807_v10, 0.0  ;;  %v4778_v10 = vld [vmem:[#allocation2 + $0x148] sm:$0xff] }
0x1543   :  { %v2318_v14 = vpop.permute.xlu1 %2317  ;;  %v2808_v11 = vmul.f32 %v4774_v33, %v2348_v12  ;;  %v2571_v58 = vperm.slane %v2348_v12, %v5704_v44  ;;  %v2182_v25 = vmul.f32 1.442695, %v2046_v23  ;;  %v2047_v12 = vsub.f32 %v5878_v16, %v6186_v32  ;;  %v4776_v16 = vld [vmem:[#allocation2 + $0xd0] sm:$0xf] }
0x1544   :  { %v2553_v3 = vperm.slane %v2318_v14, %v5704_v44  ;;  %v2798_v38 = vmul.f32 %v4771_v62, %v2318_v14  ;;  %v2336_v52 = vpop.permute.xlu0 %2335  ;;  %v4571_v62 = vpop.eup %4570 }
0x1545   :  { %v2564_v35 = vperm.slane %v2336_v52, %v5717_v59  ;;  %v2804_v15 = vmul.f32 %v4772_v51, %v2336_v52  ;;  %v2190_v52 = vmul.f32 1.442695, %v2050_v4  ;;  %4576 = vpow2.f32 %v2182_v25 }
0x1546   :  { %v6226_v50 = vsel %vm1782_vm3, %v2553_v3, %v2552_v2  ;;  %v2879_v17 = vsel %vm234_vm0, %v2798_v38, 0.0  ;;  %v2158_v3 = vmul.f32 1.442695, %v2034_v36  ;;  %v4573_v2 = vpop.eup %4572 }
0x1547   :  { %v6230_v6 = vadd.f32 %v2879_v17, %v2878_v20  ;;  %v6233_v0 = vsel %vm1786_vm4, %v2564_v35, %v2563_v45  ;;  %v2896_v48 = vsel %vm234_vm0, %v2804_v15, 0.0  ;;  %v2909_v20 = vsel %vm234_vm0, %v2808_v11, 0.0  ;;  %v4575_v35 = vpop.eup %4574 }
0x1548   :  { %v6236_v7 = vadd.f32 %v2896_v48, %v2895_v47  ;;  %2461 = vperm.xlu2 %4467, %v4565_v42   ;;  %2476 = vperm.xlu0 %4468, %v4569_v9   ;;  %v2043_v15 = vsub.f32 %v5876_v5, %v6183_v53  ;;  %4578 = vpow2.f32 %v2158_v3  ;;  %v2048_v45 = vsub.f32 %v5892_v55, %v6186_v32 }
0x1549   :  { %2464 = vperm.xlu1 %4466, %v4567_v34   ;;  %v6265_v47 = vperm.slane %v6148_v13, 5  ;;  %4580 = vpow2.f32 %v2190_v52  ;;  %v4777_v34 = vld [vmem:[#allocation2 + $0x30] sm:$0xff]  ;;  %v2184_v5 = vmul.f32 1.442695, %v2047_v12 }
0x154a   :  { %v2324_v8 = vpop.permute.xlu2 %2323  ;;  %v2176_v55 = vmul.f32 1.442695, %v2043_v15  ;;  %v2186_v4 = vmul.f32 1.442695, %v2048_v45 }
0x154b   :  { %v2342_v22 = vpop.permute.xlu1 %2341  ;;  %v2800_v48 = vmul.f32 %v4776_v16, %v2324_v8  ;;  %v2557_v23 = vperm.slane %v2324_v8, %v5722_v60  ;;  %v4577_v33 = vpop.eup %4576 }
0x154c   :  { %v2568_v57 = vperm.slane %v2342_v22, %v5697_v30  ;;  %v2806_v14 = vmul.f32 %v4775_v1, %v2342_v22  ;;  %v6248_v54 = vpop.permute.xlu0 %2359  ;;  %4582 = vpow2.f32 %v2176_v55 }
0x154d   :  { %4584 = vpow2.f32 %v2184_v5 }
0x154e   :  { %v2570_v41 = vsel %vm1778_vm2, %v2569_v21, %v2568_v57  ;;  %v2906_v63 = vsel %vm234_vm0, %v2806_v14, 0.0  ;;  %v2044_v21 = vsub.f32 %v5884_v43, %v6183_v53  ;;  %v4579_v14 = vpop.eup %4578  ;;  %v2051_v43 = vsub.f32 %v5882_v61, %v6205_v19  ;;  %v4779_v53 = vld [vmem:[#allocation2 + $0xf0] sm:$0xff] }
0x154f   :  { %v2908_v18 = vadd.f32 %v2907_v37, %v2906_v63  ;;  %v2572_v38 = vsel %vm1782_vm3, %v2571_v58, %v2570_v41  ;;  %v2883_v58 = vsel %vm1464_vm1, %v2800_v48, 0.0  ;;  %v4581_v25 = vpop.eup %4580  ;;  %v2056_v63 = vsub.f32 %v5898_v31, %v6265_v47  ;;  %v4781_v61 = vld [vmem:[#allocation2 + $0x190] sm:$0xff] }
0x1550   :  { %2455 = vperm.xlu2 %4467, %v4571_v62   ;;  %2458 = vperm.xlu0 %4468, %v4575_v35   ;;  %v4780_v62 = vld [vmem:[#allocation2 + $0x180] sm:$0xf]  ;;  %4586 = vpow2.f32 %v2186_v4  ;;  %v2178_v52 = vmul.f32 1.442695, %v2044_v21  ;;  %v2192_v16 = vmul.f32 1.442695, %v2051_v43 }
0x1551   :  { %2467 = vperm.xlu1 %4466, %v4573_v2   ;;  %v2910_v51 = vadd.f32 %v2909_v20, %v2908_v18  ;;  %v2578_v2 = vperm.slane %v6248_v54, %v5701_v40  ;;  %v4782_v35 = vld [vmem:[#allocation2 + $0xc0] sm:$0xff]  ;;  %v2202_v5 = vmul.f32 1.442695, %v2056_v63  ;;  %v7231_v4 = vld [vmem:[#allocation48_spill] sm:$0xff] }
0x1552   :  { %v6260_v17 = vpop.permute.xlu2 %2362  ;;  %4588 = vpow2.f32 %v2192_v16  ;;  %v2055_v21 = vsub.f32 %v7231_v4, %v6265_v47 }
0x1553   :  { %v2321_v42 = vpop.permute.xlu1 %2320  ;;  %v2813_v20 = vmul.f32 %v4781_v61, %v6260_v17  ;;  %v2580_v31 = vperm.slane %v6260_v17, %v5704_v44  ;;  %4590 = vpow2.f32 %v2178_v52  ;;  %v4784_v61 = vld [vmem:[#allocation2 + $0x38] sm:$0xff] }
0x1554   :  { %v2555_v46 = vperm.slane %v2321_v42, %v5717_v59  ;;  %v2799_v9 = vmul.f32 %v4777_v34, %v2321_v42  ;;  %v2351_v39 = vpop.permute.xlu0 %2350  ;;  %4592 = vpow2.f32 %v2202_v5 }
0x1555   :  { %v2573_v49 = vperm.slane %v2351_v39, %v5717_v59  ;;  %v2809_v24 = vmul.f32 %v4778_v10, %v2351_v39 }
0x1556   :  { %v2556_v36 = vsel %vm1786_vm4, %v2555_v46, %v6226_v50  ;;  %v2881_v22 = vsel %vm234_vm0, %v2799_v9, 0.0  ;;  %v4583_v9 = vpop.eup %4582 }
0x1557   :  { %v2882_v11 = vadd.f32 %v2881_v22, %v6230_v6  ;;  %v2574_v57 = vsel %vm1786_vm4, %v2573_v49, %v2572_v38  ;;  %v2911_v8 = vsel %vm234_vm0, %v2809_v24, 0.0  ;;  %v6279_v1 = vsel %vm1790_vm5, %v2557_v23, %v2556_v36  ;;  %v4585_v17 = vpop.eup %4584  ;;  %v7230_v24 = vld [vmem:[#allocation47_spill] sm:$0xff] }
0x1558   :  { %v2912_v50 = vadd.f32 %v2911_v8, %v2910_v51  ;;  %2479 = vperm.xlu2 %4467, %v4577_v33   ;;  %v2812_v6 = vmul.f32 %v4779_v53, %v6248_v54  ;;  %2491 = vperm.xlu0 %4468, %v4581_v25   ;;  %v2924_v49 = vsel %vm234_vm0, %v2813_v20, 0.0  ;;  %v4587_v10 = vpop.eup %4586  ;;  %v2052_v55 = vsub.f32 %v7230_v24, %v6205_v19 }
0x1559   :  { %v6282_v37 = vadd.f32 %v2883_v58, %v2882_v11  ;;  %2443 = vperm.xlu1 %4466, %v4579_v14   ;;  %v7232_v11 = vld [vmem:[#allocation53_spill] sm:$0xff]  ;;  %v4783_v14 = vld [vmem:[#allocation2 + $0x78] sm:$0xf] }
0x155a   :  { %v2354_v41 = vpop.permute.xlu2 %2353  ;;  %v2922_v48 = vsel %vm234_vm0, %v2812_v6, 0.0  ;;  %v2194_v25 = vmul.f32 1.442695, %v2052_v55  ;;  %v2200_v6 = vmul.f32 1.442695, %v2055_v21 }
0x155b   :  { %v2575_v3 = vperm.slane %v2354_v41, %v5722_v60  ;;  %v2810_v18 = vmul.f32 %v4780_v62, %v2354_v41  ;;  %v2357_v38 = vpop.permute.xlu1 %2356  ;;  %v4589_v41 = vpop.eup %4588 }
0x155c   :  { %v2577_v12 = vperm.slane %v2357_v38, %v5697_v30  ;;  %v2811_v51 = vmul.f32 %v4782_v35, %v2357_v38  ;;  %v6294_v15 = vpop.permute.xlu0 %2374  ;;  %4594 = vpow2.f32 %v2194_v25  ;;  %v6339_v35 = vperm.slane %v6148_v13, 6 }
0x155d   :  { %v2576_v45 = vsel %vm1790_vm5, %v2575_v3, %v2574_v57  ;;  %v2913_v42 = vsel %vm1464_vm1, %v2810_v18, 0.0  ;;  %v2057_v57 = vsub.f32 %v7232_v11, %v6265_v47  ;;  %v4591_v18 = vpop.eup %4590  ;;  %v2817_v20 = vmul.f32 %v4784_v61, %v6294_v15  ;;  %v4790_v61 = vld [vmem:[#allocation2 + $0x20] sm:$0xff] }
0x155e   :  { %v6301_v54 = vadd.f32 %v2913_v42, %v2912_v50  ;;  %v2579_v46 = vsel %vm1778_vm2, %v2578_v2, %v2577_v12  ;;  %v2921_v34 = vsel %vm234_vm0, %v2811_v51, 0.0  ;;  %v4593_v52 = vpop.eup %4592  ;;  %4596 = vpow2.f32 %v2200_v6  ;;  %v4785_v42 = vld [vmem:[#allocation2 + $0x10] sm:$0xff]  ;;  %v4788_v6 = vld [vmem:[#allocation2 + $0x58] sm:$0xff] }
0x155f   :  { %v2923_v39 = vadd.f32 %v2922_v48, %v2921_v34  ;;  %v6306_v23 = vsel %vm1782_vm3, %v2580_v31, %v2579_v46  ;;  %v2204_v62 = vmul.f32 1.442695, %v2057_v57  ;;  %v7235_v31 = vld [vmem:[#allocation56_spill] sm:$0xff]  ;;  %v4786_v46 = vld [vmem:[#allocation2 + $0xa0] sm:$0xff] }
0x1560   :  { %2470 = vperm.xlu2 %4467, %v4583_v9   ;;  %2485 = vperm.xlu0 %4468, %v4587_v10   ;;  %v7236_v57 = vld [vmem:[#allocation51_spill] sm:$0xff] }
0x1561   :  { %2482 = vperm.xlu1 %4466, %v4585_v17   ;;  %v6311_v36 = vadd.f32 %v2924_v49, %v2923_v39  ;;  %4598 = vpow2.f32 %v2204_v62  ;;  %v2937_v17 = vsel %vm234_vm0, %v2817_v20, 0.0  ;;  %v7238_v62 = vld [vmem:[#allocation58_spill] sm:$0xff] }
0x1562   :  { %v6313_v22 = vpop.permute.xlu2 %2386  ;;  %v4595_v24 = vpop.eup %4594 }
0x1563   :  { %v2339_v33 = vpop.permute.xlu1 %2338 }
0x1564   :  { %v2566_v8 = vperm.slane %v2339_v33, %v5722_v60  ;;  %v2805_v58 = vmul.f32 %v4783_v14, %v2339_v33  ;;  %v2378_v50 = vpop.permute.xlu0 %2377  ;;  %v4597_v33 = vpop.eup %4596 }
0x1565   :  { %v2818_v16 = vmul.f32 %v4785_v42, %v2378_v50  ;;  %v2589_v39 = vperm.slane %v2378_v50, %v5704_v44 }
0x1566   :  { %v2567_v43 = vsel %vm1790_vm5, %v2566_v8, %v6233_v0  ;;  %v2898_v53 = vsel %vm1464_vm1, %v2805_v58, 0.0  ;;  %v7233_v0 = vld [vmem:[#allocation49_spill] sm:$0xff]  ;;  %v2060_v8 = vsub.f32 %v7236_v57, %v6339_v35  ;;  %v4787_v58 = vld [vmem:[#allocation2 + $0x1b8] sm:$0xff] }
0x1567   :  { %v2694_v63 = vsel %vm375_vm9, %v2567_v43, %v6279_v1  ;;  %v6326_v3 = vadd.f32 %v2898_v53, %v6236_v7  ;;  %v2049_v2 = vsub.f32 %v7233_v0, %v6186_v32  ;;  %v7234_v7 = vld [vmem:[#allocation50_spill] sm:$0xff]  ;;  %v2587_v32 = vperm.slane %v6294_v15, %v5701_v40  ;;  %v4599_v14 = vpop.eup %4598  ;;  %v7237_v43 = vld [vmem:[#allocation52_spill] sm:$0xff] }
0x1568   :  { %v6329_v38 = vsel %vm1928_vm12, %v2576_v45, %v2694_v63  ;;  %2494 = vperm.xlu2 %4467, %v4589_v41   ;;  %2509 = vperm.xlu0 %4468, %v4593_v52   ;;  %v2053_v12 = vsub.f32 %v7234_v7, %v6205_v19  ;;  %v2054_v45 = vsub.f32 %v7235_v31, %v6205_v19  ;;  %v6351_v15 = vperm.slane %v6148_v13, 7  ;;  %v4789_v52 = vld [vmem:[#allocation2 + $0x48] sm:$0xf] }
0x1569   :  { %2473 = vperm.xlu1 %4466, %v4591_v18   ;;  %v2188_v5 = vmul.f32 1.442695, %v2049_v2  ;;  %v2939_v11 = vsel %vm234_vm0, %v2818_v16, 0.0  ;;  %v2061_v53 = vsub.f32 %v7237_v43, %v6339_v35  ;;  %v7241_v43 = vld [vmem:[#allocation59_spill] sm:$0xff] }
0x156a   :  { %v6334_v1 = vpop.permute.xlu2 %2380  ;;  %v2196_v19 = vmul.f32 1.442695, %v2053_v12  ;;  %v2198_v21 = vmul.f32 1.442695, %v2054_v45  ;;  %v2065_v18 = vsub.f32 %v7238_v62, %v6351_v15  ;;  %v2210_v12 = vmul.f32 1.442695, %v2060_v8 }
0x156b   :  { %v2372_v51 = vpop.permute.xlu1 %2371  ;;  %v2819_v50 = vmul.f32 %v4787_v58, %v6334_v1  ;;  %4600 = vpow2.f32 %v2188_v5 }
0x156c   :  { %v2586_v48 = vperm.slane %v2372_v51, %v5697_v30  ;;  %v2816_v34 = vmul.f32 %v4786_v46, %v2372_v51  ;;  %v2369_v9 = vpop.permute.xlu0 %2368  ;;  %4602 = vpow2.f32 %v2196_v19  ;;  %v2212_v46 = vmul.f32 1.442695, %v2061_v53 }
0x156d   :  { %4604 = vpow2.f32 %v2198_v21  ;;  %v2815_v0 = vmul.f32 %v4789_v52, %v2369_v9  ;;  %v2941_v51 = vsel %vm234_vm0, %v2819_v50, 0.0  ;;  %v2584_v31 = vperm.slane %v2369_v9, %v5722_v60 }
0x156e   :  { %v2588_v49 = vsel %vm1778_vm2, %v2587_v32, %v2586_v48  ;;  %v2936_v10 = vsel %vm234_vm0, %v2816_v34, 0.0  ;;  %v4791_v32 = vld [vmem:[#allocation2 + $0x1f0] sm:$0xff]  ;;  %4606 = vpow2.f32 %v2210_v12  ;;  %v2063_v53 = vsub.f32 %v7241_v43, %v6339_v35 }
0x156f   :  { %v6354_v55 = vsel %vm1782_vm3, %v2589_v39, %v2588_v49  ;;  %v2938_v4 = vadd.f32 %v2937_v17, %v2936_v10  ;;  %v2220_v49 = vmul.f32 1.442695, %v2065_v18  ;;  %v2928_v19 = vsel %vm1464_vm1, %v2815_v0, 0.0 }
0x1570   :  { %2497 = vperm.xlu2 %4467, %v4595_v24   ;;  %2512 = vperm.xlu0 %4468, %v4599_v14   ;;  %4608 = vpow2.f32 %v2212_v46  ;;  %v7240_v14 = vld [vmem:[#allocation55_spill] sm:$0xff] }
0x1571   :  { %v2940_v25 = vadd.f32 %v2939_v11, %v2938_v4  ;;  %2506 = vperm.xlu1 %4466, %v4597_v33   ;;  %v4601_v39 = vpop.eup %4600  ;;  %v7239_v33 = vld [vmem:[#allocation54_spill] sm:$0xff]  ;;  %v4792_v11 = vld [vmem:[#allocation2 + $0x248] sm:$0xff]  ;;  %v2062_v58 = vsub.f32 %v7240_v14, %v6339_v35  ;;  %4610 = vpow2.f32 %v2220_v49 }
0x1572   :  { %v6360_v13 = vpop.permute.xlu2 %2404  ;;  %v4603_v10 = vpop.eup %4602  ;;  %v2821_v57 = vmul.f32 %v4792_v11, %v6313_v22 }
0x1573   :  { %v2827_v41 = vmul.f32 %v4788_v6, %v6360_v13  ;;  %v2366_v63 = vpop.permute.xlu1 %2365  ;;  %v6377_v34 = vadd.f32 %v2941_v51, %v2940_v25  ;;  %v4605_v4 = vpop.eup %4604  ;;  %v4794_v6 = vld [vmem:[#allocation2 + $0x208] sm:$0xff]  ;;  %v2216_v51 = vmul.f32 1.442695, %v2063_v53  ;;  %v2064_v53 = vsub.f32 %v6001_v26, %v6339_v35 }
0x1574   :  { %v2582_v2 = vperm.slane %v2366_v63, %v5717_v59  ;;  %v2814_v20 = vmul.f32 %v4790_v61, %v2366_v63  ;;  %v6368_v7 = vpop.permute.xlu0 %2401  ;;  %v2951_v52 = vsel %vm234_vm0, %v2821_v57, 0.0  ;;  %v2214_v61 = vmul.f32 1.442695, %v2062_v58 }
0x1575   :  { %v2967_v45 = vsel %vm234_vm0, %v2827_v41, 0.0  ;;  %v2826_v42 = vmul.f32 %v4791_v32, %v6368_v7  ;;  %v7242_v32 = vld [vmem:[#allocation57_spill] sm:$0xff] }
0x1576   :  { %v2583_v16 = vsel %vm1786_vm4, %v2582_v2, %v6306_v23  ;;  %v2926_v48 = vsel %vm234_vm0, %v2814_v20, 0.0  ;;  %v4607_v20 = vpop.eup %4606 }
0x1577   :  { %v2585_v5 = vsel %vm1790_vm5, %v2584_v31, %v2583_v16  ;;  %v2927_v17 = vadd.f32 %v2926_v48, %v6311_v36  ;;  %v2966_v9 = vsel %vm234_vm0, %v2826_v42, 0.0  ;;  %v2058_v36 = vsub.f32 %v7239_v33, %v6265_v47  ;;  %v4609_v31 = vpop.eup %4608 }
0x1578   :  { %v2968_v24 = vadd.f32 %v2967_v45, %v2966_v9  ;;  %2488 = vperm.xlu2 %4467, %v4601_v39   ;;  %v6385_v23 = vsel %vm1930_vm13, %v2585_v5, %v6329_v38  ;;  %2503 = vperm.xlu0 %4468, %v4605_v4   ;;  %v4793_v38 = vld [vmem:[#allocation2 + $0x80] sm:$0xff]  ;;  %v4611_v45 = vpop.eup %4610  ;;  %v2066_v42 = vsub.f32 %v7242_v32, %v6351_v15  ;;  %v4795_v5 = vld [vmem:[#allocation2 + $0x98] sm:$0xff]  ;;  %v4796_v9 = vld [vmem:[#allocation2 + $0x188] sm:$0xff] }
0x1579   :  { %v6387_v21 = vadd.f32 %v2928_v19, %v2927_v17  ;;  %2500 = vperm.xlu1 %4466, %v4603_v10   ;;  %v2206_v18 = vmul.f32 1.442695, %v2058_v36  ;;  %v2059_v48 = vsub.f32 %v5934_v28, %v6265_v47  ;;  %v2068_v39 = vsub.f32 %v6032_v56, %v6351_v15  ;;  %v4797_v19 = vld [vmem:[#allocation2 + $0xa8] sm:$0xf] }
0x157a   :  { %v6392_v8 = vpop.permute.xlu2 %2407  ;;  %v2222_v10 = vmul.f32 1.442695, %v2066_v42 }
0x157b   :  { %v2828_v50 = vmul.f32 %v4793_v38, %v6392_v8  ;;  %v6397_v25 = vpop.permute.xlu1 %2389  ;;  %4612 = vpow2.f32 %v2206_v18  ;;  %v2208_v33 = vmul.f32 1.442695, %v2059_v48  ;;  %v2226_v47 = vmul.f32 1.442695, %v2068_v39 }
0x157c   :  { %v2822_v41 = vmul.f32 %v4794_v6, %v6397_v25  ;;  %v6403_v62 = vpop.permute.xlu0 %2395  ;;  %4614 = vpow2.f32 %v2214_v61  ;;  %v2067_v38 = vsub.f32 %v5978_v27, %v6351_v15  ;;  %v2591_v6 = vperm.slane %v6334_v1, %v5717_v59 }
0x157d   :  { %v2969_v63 = vsel %vm234_vm0, %v2828_v50, 0.0  ;;  %4616 = vpow2.f32 %v2216_v51  ;;  %v2824_v17 = vmul.f32 %v4795_v5, %v6403_v62  ;;  %v2600_v48 = vperm.slane %v6403_v62, %v5717_v59  ;;  %v4799_v5 = vld [vmem:[#allocation2 + $0x1b0] sm:$0xff] }
0x157e   :  { %v6406_v0 = vadd.f32 %v2969_v63, %v2968_v24  ;;  %v2952_v2 = vsel %vm234_vm0, %v2822_v41, 0.0  ;;  %4618 = vpow2.f32 %v2222_v10  ;;  %v2596_v41 = vperm.slane %v6397_v25, %v5701_v40 }
0x157f   :  { %v2953_v12 = vadd.f32 %v2952_v2, %v2951_v52  ;;  %v2956_v56 = vsel %vm234_vm0, %v2824_v17, 0.0  ;;  %4620 = vpow2.f32 %v2208_v33  ;;  %v4798_v2 = vld [vmem:[#allocation2 + $0x160] sm:$0xf]  ;;  %v2592_v26 = vsel %vm1786_vm4, %v2591_v6, %v6354_v55 }
0x1580   :  { %2521 = vperm.xlu2 %4467, %v4607_v20   ;;  %2536 = vperm.xlu0 %4468, %v4611_v45   ;;  %4622 = vpow2.f32 %v2226_v47  ;;  %v2595_v20 = vperm.slane %v6313_v22, %v5697_v30  ;;  %v2224_v1 = vmul.f32 1.442695, %v2067_v38  ;;  %v2069_v39 = vsub.f32 %v6028_v29, %v6351_v15 }
0x1581   :  { %2524 = vperm.xlu1 %4466, %v4609_v31   ;;  %v4613_v36 = vpop.eup %4612 }
0x1582   :  { %v6411_v16 = vpop.permute.xlu2 %2398  ;;  %v4615_v57 = vpop.eup %4614  ;;  %v2597_v31 = vsel %vm1778_vm2, %v2596_v41, %v2595_v20  ;;  %4624 = vpow2.f32 %v2224_v1  ;;  %v2228_v29 = vmul.f32 1.442695, %v2069_v39  ;;  %v4804_v41 = vld [vmem:[#allocation2 + $0x138] sm:$0xff] }
0x1583   :  { %v2393_v46 = vpop.permute.xlu1 %2392  ;;  %v2825_v24 = vmul.f32 %v4797_v19, %v6411_v16  ;;  %v4617_v14 = vpop.eup %4616  ;;  %v2602_v62 = vperm.slane %v6411_v16, %v5722_v60  ;;  %v4801_v19 = vld [vmem:[#allocation2 + $0x1e8] sm:$0xff] }
0x1584   :  { %v2823_v49 = vmul.f32 %v4796_v9, %v2393_v46  ;;  %v6420_v28 = vpop.permute.xlu0 %2419  ;;  %v2598_v27 = vperm.slane %v2393_v46, %v5704_v44  ;;  %v4619_v51 = vpop.eup %4618 }
0x1585   :  { %v2958_v50 = vsel %vm1464_vm1, %v2825_v24, 0.0  ;;  %v4621_v42 = vpop.eup %4620 }
0x1586   :  { %v2954_v4 = vsel %vm234_vm0, %v2823_v49, 0.0  ;;  %v2599_v22 = vsel %vm1782_vm3, %v2598_v27, %v2597_v31  ;;  %v4623_v55 = vpop.eup %4622  ;;  %v4800_v49 = vld [vmem:[#allocation2 + $0xe0] sm:$0xff] }
0x1587   :  { %v2955_v11 = vadd.f32 %v2954_v4, %v2953_v12  ;;  %v2218_v12 = vmul.f32 1.442695, %v2064_v53  ;;  %v2601_v17 = vsel %vm1786_vm4, %v2600_v48, %v2599_v22  ;;  %v4803_v53 = vld [vmem:[#allocation2 + $0x158] sm:$0xf]  ;;  %v4806_v48 = vld [vmem:[#allocation2 + $0x170] sm:$0xf] }
0x1588   :  { %2515 = vperm.xlu2 %4467, %v4613_v36   ;;  %2530 = vperm.xlu0 %4468, %v4617_v14   ;;  %v2603_v33 = vsel %vm1790_vm5, %v2602_v62, %v2601_v17  ;;  %v4625_v36 = vpop.eup %4624 }
0x1589   :  { %v2957_v58 = vadd.f32 %v2956_v56, %v2955_v11  ;;  %2527 = vperm.xlu1 %4466, %v4615_v57   ;;  %4626 = vpow2.f32 %v2218_v12 }
0x158a   :  { %v6426_v43 = vpop.permute.xlu2 %2413  ;;  %4628 = vpow2.f32 %v2228_v29 }
0x158b   :  { %v6434_v63 = vadd.f32 %v2958_v50, %v2957_v58  ;;  %v2384_v18 = vpop.permute.xlu1 %2383  ;;  %v4802_v58 = vld [vmem:[#allocation2 + $0xb8] sm:$0xff]  ;;  %v2830_v6 = vmul.f32 %v4803_v53, %v6426_v43 }
0x158c   :  { %v2593_v52 = vperm.slane %v2384_v18, %v5722_v60  ;;  %v2820_v61 = vmul.f32 %v4798_v2, %v2384_v18  ;;  %v6453_v46 = vpop.permute.xlu0 %2422 }
0x158d   :  { %v2833_v10 = vmul.f32 %v4800_v49, %v6453_v46  ;;  %v2973_v31 = vsel %vm1464_vm1, %v2830_v6, 0.0  ;;  %v7243_v49 = vld [vmem:[#allocation9_spill] sm:$0xff] }
0x158e   :  { %v2594_v35 = vsel %vm1790_vm5, %v2593_v52, %v2592_v26  ;;  %v2943_v25 = vsel %vm1464_vm1, %v2820_v61, 0.0  ;;  %v4805_v61 = vld [vmem:[#allocation2 + $0x130] sm:$0xff] }
0x158f   :  { %v2697_v45 = vsel %vm1932_vm8, %v2594_v35, %v6385_v23  ;;  %v6448_v32 = vadd.f32 %v2943_v25, %v6377_v34  ;;  %v2832_v23 = vmul.f32 %v4799_v5, %v6420_v28  ;;  %v4627_v57 = vpop.eup %4626  ;;  %v2984_v16 = vsel %vm234_vm0, %v2833_v10, 0.0 }
0x1590   :  { %2539 = vperm.xlu2 %4467, %v4619_v51   ;;  %2545 = vperm.xlu0 %4468, %v4623_v55   ;;  %v6469_v47 = vsel %vm1934_vm6, %v2603_v33, %v2697_v45  ;;  %v4629_v1 = vpop.eup %4628 }
0x1591   :  { %2518 = vperm.xlu1 %4466, %v4621_v42   ;;  %v2982_v15 = vsel %vm234_vm0, %v2832_v23, 0.0 }
0x1592   :  { %v2435_v34 = vpop.permute.xlu2 %2434 }
0x1593   :  { %v6459_v9 = vpop.permute.xlu1 %2416  ;;  %v2837_v38 = vmul.f32 %v4802_v58, %v2435_v34  ;;  %v2623_v52 = vperm.slane %v2435_v34, %v5701_v40  ;;  %v4810_v58 = vld [vmem:[#allocation2 + $0x210] sm:$0xff] }
0x1594   :  { %v2831_v24 = vmul.f32 %v4801_v19, %v6459_v9  ;;  %v4808_v19 = vld [vmem:[#allocation2 + $0x258] sm:$0xff] }
0x1595   :  { %v2997_v35 = vsel %vm234_vm0, %v2837_v38, 0.0 }
0x1596   :  { %v2981_v4 = vsel %vm234_vm0, %v2831_v24, 0.0 }
0x1597   :  { %v2983_v11 = vadd.f32 %v2982_v15, %v2981_v4 }
0x1598   :  { %2542 = vperm.xlu2 %4467, %v4625_v36   ;;  %v4809_v36 = vld [vmem:[#allocation2 + $0x240] sm:$0xff] }
0x1599   :  { %2533 = vperm.xlu1 %4466, %v4627_v57   ;;  %v2985_v56 = vadd.f32 %v2984_v16, %v2983_v11 }
0x159a   :  { %v6472_v14 = vpop.permute.xlu2 %2428  ;;  %v2432_v27 = vpop.permute.xlu0 %2431 }
0x159b   :  { %v6474_v50 = vpop.permute.xlu1 %2410  ;;  %v2622_v2 = vperm.slane %v2432_v27, %v5697_v30  ;;  %v2836_v20 = vmul.f32 %v4805_v61, %v2432_v27  ;;  %v2835_v39 = vmul.f32 %v4806_v48, %v6472_v14 }
0x159c   :  { %v2829_v18 = vmul.f32 %v4804_v41, %v6474_v50 }
0x159d   :  { %v6484_v12 = vsel %vm1778_vm2, %v2623_v52, %v2622_v2  ;;  %v2996_v51 = vsel %vm234_vm0, %v2836_v20, 0.0  ;;  %v2988_v62 = vsel %vm1464_vm1, %v2835_v39, 0.0  ;;  %v2613_v52 = vperm.slane %v6459_v9, %v5697_v30 }
0x159e   :  { %v2971_v26 = vsel %vm234_vm0, %v2829_v18, 0.0  ;;  %v6488_v45 = vadd.f32 %v2997_v35, %v2996_v51  ;;  %v4811_v18 = vld [vmem:[#allocation2 + $0xe8] sm:$0xff]  ;;  %v2605_v35 = vperm.slane %v6360_v13, %v5701_v40  ;;  %v2614_v9 = vperm.slane %v6420_v28, %v5701_v40 }
0x159f   :  { %v2972_v25 = vadd.f32 %v2971_v26, %v6406_v0  ;;  %v4807_v0 = vld [vmem:[#allocation2 + $0x228] sm:$0xff] }
0x15a0   :  { %2548 = vperm.xlu2 %4467, %v4629_v1   ;;  %v7244_v1 = vld [vmem:[#allocation10_spill] sm:$0xff] }
0x15a1   :  { %v6490_v42 = vadd.f32 %v2973_v31, %v2972_v25  ;;  %v2604_v25 = vperm.slane %v6368_v7, %v5697_v30  ;;  %v2607_v31 = vperm.slane %v6392_v8, %v5704_v44  ;;  %v2616_v7 = vperm.slane %v6453_v46, %v5704_v44  ;;  %v4812_v8 = vld [vmem:[#allocation2 + $0x118] sm:$0xff] }
0x15a2   :  { %v6492_v22 = vpop.permute.xlu2 %2461  ;;  %v2450_v23 = vpop.permute.xlu0 %2449 }
0x15a3   :  { %v6494_v55 = vpop.permute.xlu1 %2425  ;;  %v2842_v24 = vmul.f32 %v4808_v19, %v2450_v23  ;;  %v2632_v4 = vperm.slane %v2450_v23, %v5701_v40 }
0x15a4   :  { %v2834_v5 = vmul.f32 %v4807_v0, %v6494_v55  ;;  %v2615_v0 = vsel %vm1778_vm2, %v2614_v9, %v2613_v52  ;;  %v2618_v28 = vperm.slane %v6494_v55, %v5717_v59 }
0x15a5   :  { %v3012_v16 = vsel %vm234_vm0, %v2842_v24, 0.0  ;;  %v4813_v24 = vld [vmem:[#allocation2 + $0x1f8] sm:$0xff] }
0x15a6   :  { %v2986_v34 = vsel %vm234_vm0, %v2834_v5, 0.0  ;;  %v2609_v5 = vperm.slane %v6474_v50, %v5717_v59 }
0x15a7   :  { %v2987_v17 = vadd.f32 %v2986_v34, %v2985_v56 }
0x15a8   :  { %3218 = vrot.lane.b32.xlu2 %v7243_v49, %s4876_s4  ;;  %v2606_v49 = vsel %vm1778_vm2, %v2605_v35, %v2604_v25  ;;  %v4817_v35 = vld [vmem:[#allocation2 + $0x260] sm:$0xff] }
0x15a9   :  { %v6502_v10 = vadd.f32 %v2988_v62, %v2987_v17 }
0x15aa   :  { %v2456_v29 = vpop.permute.xlu2 %2455  ;;  %v2453_v57 = vpop.permute.xlu0 %2452 }
0x15ab   :  { %v2447_v15 = vpop.permute.xlu1 %2446  ;;  %v2634_v56 = vperm.slane %v2453_v57, %v5704_v44  ;;  %v2843_v38 = vmul.f32 %v4810_v58, %v2453_v57  ;;  %v2636_v41 = vperm.slane %v2456_v29, %v5717_v59  ;;  %v2844_v27 = vmul.f32 %v4811_v18, %v2456_v29  ;;  %v4814_v58 = vld [vmem:[#allocation2] sm:$0xff] }
0x15ac   :  { %v2631_v33 = vperm.slane %v2447_v15, %v5697_v30  ;;  %v2841_v11 = vmul.f32 %v4809_v36, %v2447_v15  ;;  %v2608_v29 = vsel %vm1782_vm3, %v2607_v31, %v2606_v49  ;;  %v2617_v15 = vsel %vm1782_vm3, %v2616_v7, %v2615_v0  ;;  %v4819_v49 = vld [vmem:[#allocation2 + $0xb0] sm:$0xff] }
0x15ad   :  { %v3014_v20 = vsel %vm234_vm0, %v2843_v38, 0.0  ;;  %v3016_v48 = vsel %vm234_vm0, %v2844_v27, 0.0  ;;  %v2611_v57 = vperm.slane %v6426_v43, %v5722_v60  ;;  %v2846_v38 = vmul.f32 %v4814_v58, %v6492_v22  ;;  %v4821_v58 = vld [vmem:[#allocation2 + $0x268] sm:$0xff] }
0x15ae   :  { %v2633_v53 = vsel %vm1778_vm2, %v2632_v4, %v2631_v33  ;;  %v3011_v6 = vsel %vm234_vm0, %v2841_v11, 0.0  ;;  %v2610_v4 = vsel %vm1786_vm4, %v2609_v5, %v2608_v29  ;;  %v2640_v43 = vperm.slane %v6492_v22, %v5697_v30 }
0x15af   :  { %v3013_v2 = vadd.f32 %v3012_v16, %v3011_v6  ;;  %v2635_v61 = vsel %vm1782_vm3, %v2634_v56, %v2633_v53  ;;  %v2619_v16 = vsel %vm1786_vm4, %v2618_v28, %v2617_v15  ;;  %v2620_v56 = vperm.slane %v6472_v14, %v5722_v60  ;;  %v4815_v6 = vld [vmem:[#allocation2 + $0x40] sm:$0xff]  ;;  %v4816_v14 = vld [vmem:[#allocation2 + $0x218] sm:$0xff] }
0x15b0   :  { %v6516_v26 = vsel %vm1786_vm4, %v2636_v41, %v2635_v61  ;;  %3220 = vrot.lane.b32.xlu2 %v7244_v1, %s4876_s4 }
0x15b1   :  { %v3015_v51 = vadd.f32 %v3014_v20, %v3013_v2  ;;  %v2621_v27 = vsel %vm1790_vm5, %v2620_v56, %v2619_v16 }
0x15b2   :  { %v2480_v39 = vpop.permute.xlu2 %2479  ;;  %v2441_v62 = vpop.permute.xlu0 %2440 }
0x15b3   :  { %v6532_v23 = vadd.f32 %v3016_v48, %v3015_v51  ;;  %v2438_v13 = vpop.permute.xlu1 %2437  ;;  %v2627_v19 = vperm.slane %v2441_v62, %v5717_v59  ;;  %v2839_v50 = vmul.f32 %v4813_v24, %v2441_v62  ;;  %v2852_v41 = vmul.f32 %v4815_v6, %v2480_v39 }
0x15b4   :  { %v2625_v34 = vperm.slane %v2438_v13, %v5704_v44  ;;  %v2838_v17 = vmul.f32 %v4812_v8, %v2438_v13  ;;  %v2650_v20 = vperm.slane %v2480_v39, %v5701_v40  ;;  %v3026_v51 = vsel %vm234_vm0, %v2846_v38, 0.0  ;;  %v4818_v8 = vld [vmem:[#allocation2 + $0x250] sm:$0xff] }
0x15b5   :  { %v3001_v11 = vsel %vm234_vm0, %v2839_v50, 0.0  ;;  %v3042_v0 = vsel %vm234_vm0, %v2852_v41, 0.0  ;;  %v4820_v50 = vld [vmem:[#allocation2 + $0x110] sm:$0xf] }
0x15b6   :  { %v2626_v46 = vsel %vm1782_vm3, %v2625_v34, %v6484_v12  ;;  %v2999_v55 = vsel %vm234_vm0, %v2838_v17, 0.0  ;;  %v4822_v41 = vld [vmem:[#allocation2 + $0x230] sm:$0xf] }
0x15b7   :  { %v3000_v33 = vadd.f32 %v2999_v55, %v6488_v45  ;;  %v6549_v36 = vsel %vm1786_vm4, %v2627_v19, %v2626_v46  ;;  %v2612_v45 = vsel %vm1790_vm5, %v2611_v57, %v2610_v4 }
0x15b8   :  { %v2699_v9 = vsel %vm1936_vm7, %v2612_v45, %v6469_v47 }
0x15b9   :  { %v6557_v12 = vadd.f32 %v3001_v11, %v3000_v33  ;;  %v2700_v48 = vsel %vm1938_vm11, %v2621_v27, %v2699_v9 }
0x15ba   :  { %v6560_v53 = vpop.permute.xlu2 %2470  ;;  %v2477_v61 = vpop.permute.xlu0 %2476  ;;  %v2710_v47 = vsel %vm1949_vm15, %v2700_v48, 0.0 }
0x15bb   :  { %v2465_v18 = vpop.permute.xlu1 %2464  ;;  %v2649_v1 = vperm.slane %v2477_v61, %v5697_v30  ;;  %v2851_v25 = vmul.f32 %v4817_v35, %v2477_v61  ;;  %v2849_v17 = vmul.f32 %v4818_v8, %v6560_v53 }
0x15bc   :  { %v2641_v52 = vperm.slane %v2465_v18, %v5701_v40  ;;  %v2847_v2 = vmul.f32 %v4816_v14, %v2465_v18 }
0x15bd   :  { %v2651_v39 = vsel %vm1778_vm2, %v2650_v20, %v2649_v1  ;;  %v3041_v13 = vsel %vm234_vm0, %v2851_v25, 0.0  ;;  %v3031_v33 = vsel %vm234_vm0, %v2849_v17, 0.0  ;;  %v4827_v17 = vld [vmem:[#allocation2 + $0x1a0] sm:$0xf] }
0x15be   :  { %v2642_v31 = vsel %vm1778_vm2, %v2641_v52, %v2640_v43  ;;  %v3027_v22 = vsel %vm234_vm0, %v2847_v2, 0.0  ;;  %v3043_v7 = vadd.f32 %v3042_v0, %v3041_v13  ;;  %v4823_v43 = vld [vmem:[#allocation2 + $0xc8] sm:$0xff]  ;;  %v4825_v0 = vld [vmem:[#allocation2 + $0x238] sm:$0xff] }
0x15bf   :  { %v3028_v5 = vadd.f32 %v3027_v22, %v3026_v51 }
0x15c2   :  { %v6578_v28 = vpop.permute.xlu2 %2494  ;;  %v2459_v24 = vpop.permute.xlu0 %2458 }
0x15c3   :  { %v2468_v34 = vpop.permute.xlu1 %2467  ;;  %2711 = vadd.xlane.f32.xlu1 %v2710_v47  ;;  %v2845_v29 = vmul.f32 %v4820_v50, %v2459_v24  ;;  %v2638_v16 = vperm.slane %v2459_v24, %v5722_v60  ;;  %v2857_v38 = vmul.f32 %v4821_v58, %v6578_v28  ;;  %v4826_v47 = vld [vmem:[#allocation2 + $0x18] sm:$0xff]  ;;  %v4828_v58 = vld [vmem:[#allocation2 + $0x1c8] sm:$0xf] }
0x15c4   :  { %v2643_v62 = vperm.slane %v2468_v34, %v5704_v44  ;;  %v2848_v19 = vmul.f32 %v4819_v49, %v2468_v34 }
0x15c5   :  { %v3018_v4 = vsel %vm1464_vm1, %v2845_v29, 0.0  ;;  %v2639_v2 = vsel %vm1790_vm5, %v2638_v16, %v6516_v26  ;;  %v3057_v1 = vsel %vm234_vm0, %v2857_v38, 0.0 }
0x15c6   :  { %v2644_v15 = vsel %vm1782_vm3, %v2643_v62, %v2642_v31  ;;  %v3029_v46 = vsel %vm234_vm0, %v2848_v19, 0.0  ;;  %v6588_v11 = vadd.f32 %v3018_v4, %v6532_v23  ;;  %v4824_v23 = vld [vmem:[#allocation2 + $0x90] sm:$0xff] }
0x15c7   :  { %v3030_v55 = vadd.f32 %v3029_v46, %v3028_v5 }
0x15c9   :  { %v3032_v57 = vadd.f32 %v3031_v33, %v3030_v55  ;;  %v2645_v55 = vperm.slane %v6560_v53, %v5717_v59 }
0x15ca   :  { %v6591_v56 = vpop.permute.xlu2 %2497  ;;  %v6595_v27 = vpop.permute.xlu0 %2491 }
0x15cb   :  { %v2444_v45 = vpop.permute.xlu1 %2443  ;;  %v2858_v52 = vmul.f32 %v4823_v43, %v6591_v56  ;;  %v2856_v14 = vmul.f32 %v4824_v23, %v6595_v27 }
0x15cc   :  { %v2629_v6 = vperm.slane %v2444_v45, %v5722_v60  ;;  %v2840_v18 = vmul.f32 %v4822_v41, %v2444_v45 }
0x15cd   :  { %v3056_v9 = vsel %vm234_vm0, %v2856_v14, 0.0  ;;  %v3059_v31 = vsel %vm234_vm0, %v2858_v52, 0.0  ;;  %v4829_v14 = vld [vmem:[#allocation2 + $0x1d8] sm:$0xff] }
0x15ce   :  { %v2630_v61 = vsel %vm1790_vm5, %v2629_v6, %v6549_v36  ;;  %v3003_v20 = vsel %vm1464_vm1, %v2840_v18, 0.0  ;;  %v3058_v51 = vadd.f32 %v3057_v1, %v3056_v9  ;;  %v2646_v6 = vsel %vm1786_vm4, %v2645_v55, %v2644_v15  ;;  %v4830_v15 = vld [vmem:[#allocation2 + $0x68] sm:$0xff] }
0x15cf   :  { %v2701_v35 = vsel %vm375_vm9, %v2639_v2, %v2630_v61  ;;  %v6607_v25 = vadd.f32 %v3003_v20, %v6557_v12 }
0x15d0   :  { %v3060_v48 = vadd.f32 %v3059_v31, %v3058_v51 }
0x15d2   :  { %v2489_v22 = vpop.permute.xlu2 %2488  ;;  %v2486_v36 = vpop.permute.xlu0 %2485 }
0x15d3   :  { %v2483_v26 = vpop.permute.xlu1 %2482  ;;  %v2854_v34 = vmul.f32 %v4826_v47, %v2486_v36  ;;  %v2855_v12 = vmul.f32 %v4827_v17, %v2489_v22  ;;  %v2654_v19 = vperm.slane %v2486_v36, %v5717_v59  ;;  %v4833_v17 = vld [vmem:[#allocation2 + $0x270] sm:$0xff] }
0x15d4   :  { %v2853_v5 = vmul.f32 %v4825_v0, %v2483_v26  ;;  %v2652_v13 = vperm.slane %v2483_v26, %v5704_v44 }
0x15d5   :  { %v3046_v49 = vsel %vm234_vm0, %v2854_v34, 0.0  ;;  %v3048_v29 = vsel %vm1464_vm1, %v2855_v12, 0.0 }
0x15d6   :  { %v3044_v8 = vsel %vm234_vm0, %v2853_v5, 0.0  ;;  %v2653_v24 = vsel %vm1782_vm3, %v2652_v13, %v2651_v39  ;;  %v2656_v39 = vperm.slane %v2489_v22, %v5722_v60  ;;  %v4832_v22 = vld [vmem:[#allocation2 + $0x200] sm:$0xff] }
0x15d7   :  { %v3045_v62 = vadd.f32 %v3044_v8, %v3043_v7  ;;  %v2655_v16 = vsel %vm1786_vm4, %v2654_v19, %v2653_v24 }
0x15d8   :  { %v2657_v53 = vsel %vm1790_vm5, %v2656_v39, %v2655_v16 }
0x15d9   :  { %v3047_v50 = vadd.f32 %v3046_v49, %v3045_v62  ;;  %v4834_v49 = vld [vmem:[#allocation2 + $0x28] sm:$0xf] }
0x15da   :  { %v6617_v46 = vpop.permute.xlu2 %2521  ;;  %v6625_v45 = vpop.permute.xlu0 %2509 }
0x15db   :  { %v6621_v4 = vadd.f32 %v3048_v29, %v3047_v50  ;;  %v2474_v33 = vpop.permute.xlu1 %2473  ;;  %v2862_v2 = vmul.f32 %v4829_v14, %v6625_v45 }
0x15dc   :  { %v2647_v7 = vperm.slane %v2474_v33, %v5722_v60  ;;  %v2850_v38 = vmul.f32 %v4828_v58, %v2474_v33  ;;  %v4835_v33 = vld [vmem:[#allocation2 + $0x220] sm:$0xff] }
0x15dd   :  { %v3072_v51 = vsel %vm234_vm0, %v2862_v2, 0.0  ;;  %v2866_v16 = vmul.f32 %v4835_v33, %v6617_v46  ;;  %v4836_v58 = vld [vmem:[#allocation2 + $0x1e0] sm:$0xff] }
0x15de   :  { %v2648_v41 = vsel %vm1790_vm5, %v2647_v7, %v2646_v6  ;;  %v3033_v18 = vsel %vm1464_vm1, %v2850_v38, 0.0  ;;  %v4837_v6 = vld [vmem:[#allocation2 + $0x1c0] sm:$0xff] }
0x15df   :  { %v2702_v43 = vsel %vm1928_vm12, %v2648_v41, %v2701_v35  ;;  %v6633_v52 = vadd.f32 %v3033_v18, %v3032_v57  ;;  %v4831_v35 = vld [vmem:[#allocation2 + $0x140] sm:$0xff]  ;;  %v3086_v2 = vsel %vm234_vm0, %v2866_v16, 0.0 }
0x15e0   :  { %v6636_v23 = vsel %vm1930_vm13, %v2657_v53, %v2702_v43  ;;  %v4838_v53 = vld [vmem:[#allocation2 + $0x178] sm:$0xff] }
0x15e2   :  { %v6639_v61 = vpop.permute.xlu2 %2515  ;;  %v6644_v9 = vpop.permute.xlu0 %2512 }
0x15e3   :  { %v6641_v20 = vpop.permute.xlu1 %2506  ;;  %v2864_v31 = vmul.f32 %v4831_v35, %v6639_v61  ;;  %v2863_v26 = vmul.f32 %v4832_v22, %v6644_v9 }
0x15e4   :  { %v2861_v1 = vmul.f32 %v4830_v15, %v6641_v20 }
0x15e5   :  { %v3074_v5 = vsel %vm234_vm0, %v2863_v26, 0.0  ;;  %v3076_v13 = vsel %vm234_vm0, %v2864_v31, 0.0 }
0x15e6   :  { %v3071_v57 = vsel %vm234_vm0, %v2861_v1, 0.0 }
0x15e7   :  { %v3073_v0 = vadd.f32 %v3072_v51, %v3071_v57 }
0x15e9   :  { %v3075_v36 = vadd.f32 %v3074_v5, %v3073_v0  ;;  %v4840_v0 = vld [vmem:[#allocation2 + $0x100] sm:$0xff] }
0x15ea   :  { %v6652_v47 = vpop.permute.xlu2 %2539  ;;  %v6659_v62 = vpop.permute.xlu0 %2503 }
0x15eb   :  { %v6654_v34 = vadd.f32 %v3076_v13, %v3075_v36  ;;  %v6656_v8 = vpop.permute.xlu1 %2500  ;;  %v2860_v19 = vmul.f32 %v4834_v49, %v6659_v62  ;;  %v2872_v38 = vmul.f32 %v4836_v58, %v6652_v47  ;;  %v4841_v13 = vld [vmem:[#allocation2 + $0x278] sm:$0xff]  ;;  %v2668_v58 = vperm.slane %v6625_v45, %v5701_v40 }
0x15ec   :  { %v2859_v12 = vmul.f32 %v4833_v17, %v6656_v8 }
0x15ed   :  { %v3063_v29 = vsel %vm1464_vm1, %v2860_v19, 0.0  ;;  %v3102_v1 = vsel %vm234_vm0, %v2872_v38, 0.0  ;;  %v2670_v38 = vperm.slane %v6644_v9, %v5704_v44  ;;  %v2686_v9 = vperm.slane %v6652_v47, %v5701_v40 }
0x15ee   :  { %v3061_v24 = vsel %vm234_vm0, %v2859_v12, 0.0  ;;  %v2658_v12 = vperm.slane %v6595_v27, %v5697_v30  ;;  %v2661_v27 = vperm.slane %v6591_v56, %v5704_v44 }
0x15ef   :  { %v3062_v50 = vadd.f32 %v3061_v24, %v3060_v48  ;;  %v4839_v48 = vld [vmem:[#allocation2 + $0x70] sm:$0xff] }
0x15f1   :  { %v6664_v55 = vadd.f32 %v3063_v29, %v3062_v50  ;;  %v2659_v50 = vperm.slane %v6578_v28, %v5701_v40  ;;  %v2667_v29 = vperm.slane %v6641_v20, %v5697_v30 }
0x15f2   :  { %v6667_v7 = vpop.permute.xlu2 %2542  ;;  %v2537_v18 = vpop.permute.xlu0 %2536 }
0x15f3   :  { %v2525_v39 = vpop.permute.xlu1 %2524  ;;  %v2873_v43 = vmul.f32 %v4838_v53, %v6667_v7  ;;  %v2871_v14 = vmul.f32 %v4839_v48, %v2537_v18  ;;  %v2660_v16 = vsel %vm1778_vm2, %v2659_v50, %v2658_v12  ;;  %v2669_v28 = vsel %vm1778_vm2, %v2668_v58, %v2667_v29  ;;  %v4842_v53 = vld [vmem:[#allocation2 + $0x1d0] sm:$0xf] }
0x15f4   :  { %v2867_v41 = vmul.f32 %v4837_v6, %v2525_v39  ;;  %v2663_v6 = vperm.slane %v6656_v8, %v5717_v59  ;;  %v2685_v20 = vperm.slane %v2537_v18, %v5697_v30  ;;  %v2676_v48 = vperm.slane %v6617_v46, %v5697_v30 }
0x15f5   :  { %v3101_v57 = vsel %vm234_vm0, %v2871_v14, 0.0  ;;  %v3104_v31 = vsel %vm234_vm0, %v2873_v43, 0.0  ;;  %v2662_v45 = vsel %vm1782_vm3, %v2661_v27, %v2660_v16  ;;  %v2677_v56 = vperm.slane %v2525_v39, %v5701_v40  ;;  %v3172_v27 = vld [vmem:[%s7080_s6 + $0x30] sm:$0xff] }
0x15f6   :  { %v3087_v15 = vsel %vm234_vm0, %v2867_v41, 0.0  ;;  %v3103_v35 = vadd.f32 %v3102_v1, %v3101_v57  ;;  %v2665_v8 = vperm.slane %v6659_v62, %v5722_v60  ;;  %v2664_v30 = vsel %vm1786_vm4, %v2663_v6, %v2662_v45  ;;  %v3169_v6 = vld [vmem:[%s7080_s6 + $0x18] sm:$0xff] }
0x15f7   :  { %v3088_v51 = vadd.f32 %v3087_v15, %v3086_v2  ;;  %v2671_v15 = vsel %vm1782_vm3, %v2670_v38, %v2669_v28  ;;  %v2672_v1 = vperm.slane %v6639_v61, %v5717_v59  ;;  %v2687_v40 = vsel %vm1778_vm2, %v2686_v9, %v2685_v20  ;;  %v3170_v38 = vld [vmem:[%s7080_s6 + $0x20] sm:$0xff]  ;;  %v3167_v28 = vld [vmem:[%s7080_s6 + $0x8] sm:$0xff] }
0x15f8   :  { %v6676_v22 = vadd.f32 %v3104_v31, %v3103_v35  ;;  %v2678_v62 = vsel %vm1778_vm2, %v2677_v56, %v2676_v48  ;;  %v2666_v35 = vsel %vm1790_vm5, %v2665_v8, %v2664_v30  ;;  %v3166_v20 = vld [vmem:[%s7080_s6] sm:$0xff]  ;;  %v2900_v48 = vrot.slane %v6326_v3, 4 }
0x15f9   :  { %v2673_v61 = vsel %vm1786_vm4, %v2672_v1, %v2671_v15  ;;  %v2930_v45 = vrot.slane %v6387_v21, 4  ;;  %v2960_v56 = vrot.slane %v6434_v63, 4  ;;  %v2945_v9 = vrot.slane %v6448_v32, 4 }
0x15fa   :  { %v2531_v36 = vpop.permute.xlu0 %2530  ;;  %v6726_v31 = vpop.permute.xlu2 %2548  ;;  %v2975_v30 = vrot.slane %v6490_v42, 4 }
0x15fb   :  { %v2528_v26 = vpop.permute.xlu1 %2527  ;;  %v2869_v17 = vmul.f32 %v4841_v13, %v2531_v36  ;;  %v2681_v57 = vperm.slane %v2531_v36, %v5717_v59  ;;  %v2692_v36 = vperm.slane %v6726_v31, %v5722_v60  ;;  %v2931_v15 = vadd.f32 %v2930_v45, %v6387_v21 }
0x15fc   :  { %v2868_v5 = vmul.f32 %v4840_v0, %v2528_v26  ;;  %v2679_v2 = vperm.slane %v2528_v26, %v5704_v44  ;;  %v2961_v1 = vadd.f32 %v2960_v56, %v6434_v63 }
0x15fd   :  { %v3091_v24 = vsel %vm234_vm0, %v2869_v17, 0.0 }
0x15fe   :  { %v3089_v49 = vsel %vm234_vm0, %v2868_v5, 0.0 }
0x15ff   :  { %v3090_v19 = vadd.f32 %v3089_v49, %v3088_v51  ;;  %v2688_v51 = vperm.slane %v6667_v7, %v5704_v44  ;;  %v4843_v44 = vld [vmem:[#allocation2 + $0x60] sm:$0xf] }
0x1601   :  { %v3092_v33 = vadd.f32 %v3091_v24, %v3090_v19  ;;  %v2689_v0 = vsel %vm1782_vm3, %v2688_v51, %v2687_v40  ;;  %v2946_v40 = vadd.f32 %v2945_v9, %v6448_v32 }
0x1602   :  { %v6701_v14 = vpop.permute.xlu0 %2545 }
0x1603   :  { %v2519_v41 = vpop.permute.xlu1 %2518  ;;  %v2690_v47 = vperm.slane %v6701_v14, %v5717_v59  ;;  %v2704_v59 = vsel %vm1932_vm8, %v2666_v35, %v6636_v23  ;;  %v2962_v35 = vrot.slane %v2961_v1, 2 }
0x1604   :  { %v2865_v43 = vmul.f32 %v4842_v53, %v2519_v41  ;;  %v2674_v46 = vperm.slane %v2519_v41, %v5722_v60  ;;  %v3168_v41 = vld [vmem:[%s7080_s6 + $0x10] sm:$0xff]  ;;  %v2885_v53 = vrot.slane %v6282_v37, 4 }
0x1605   :  { %v2691_v13 = vsel %vm1786_vm4, %v2690_v47, %v2689_v0  ;;  %v2963_v63 = vadd.f32 %v2962_v35, %v2961_v1 }
0x1606   :  { %v3078_v18 = vsel %vm1464_vm1, %v2865_v43, 0.0  ;;  %v2675_v26 = vsel %vm1790_vm5, %v2674_v46, %v2673_v61  ;;  %v2693_v29 = vsel %vm1790_vm5, %v2692_v36, %v2691_v13  ;;  %v2915_v43 = vrot.slane %v6301_v54, 4 }
0x1607   :  { %v6713_v39 = vadd.f32 %v3078_v18, %v6654_v34  ;;  %v2680_v34 = vsel %vm1782_vm3, %v2679_v2, %v2678_v62  ;;  %v2705_v24 = vsel %vm1934_vm6, %v2675_v26, %v2704_v59  ;;  %v2886_v8 = vadd.f32 %v2885_v53, %v6282_v37 }
0x1608   :  { %v2682_v12 = vsel %vm1786_vm4, %v2681_v57, %v2680_v34  ;;  %v2916_v2 = vadd.f32 %v2915_v43, %v6301_v54  ;;  %v2901_v18 = vadd.f32 %v2900_v48, %v6326_v3  ;;  %v2990_v46 = vrot.slane %v6502_v10, 4 }
0x1609   :  { %v2887_v47 = vrot.slane %v2886_v8, 2  ;;  %v2932_v57 = vrot.slane %v2931_v15, 2  ;;  %v2976_v37 = vadd.f32 %v2975_v30, %v6490_v42  ;;  %v2947_v3 = vrot.slane %v2946_v40, 2 }
0x160a   :  { %v2917_v62 = vrot.slane %v2916_v2, 2  ;;  %v2902_v51 = vrot.slane %v2901_v18, 2  ;;  %v2991_v54 = vadd.f32 %v2990_v46, %v6502_v10 }
0x160b   :  { %v2534_v5 = vpop.permute.xlu1 %2533  ;;  %v2888_v34 = vadd.f32 %v2887_v47, %v2886_v8  ;;  %v2933_v26 = vadd.f32 %v2932_v57, %v2931_v15  ;;  %v2977_v0 = vrot.slane %v2976_v37, 2 }
0x160c   :  { %v2683_v17 = vperm.slane %v2534_v5, %v5722_v60  ;;  %v2870_v7 = vmul.f32 %v4843_v44, %v2534_v5  ;;  %v3173_v60 = vld [vmem:[%s7080_s6 + $0x38] sm:$0xff]  ;;  %v2918_v21 = vadd.f32 %v2917_v62, %v2916_v2  ;;  %v2903_v61 = vadd.f32 %v2902_v51, %v2901_v18 }
0x160d   :  { %3236 = vmatpush.msrb.mxu0 %v3173_v60  ;;  %v2992_v5 = vrot.slane %v2991_v54, 2  ;;  %v2889_v32 = vrot.slane %v2888_v34, 1  ;;  %v2934_v59 = vrot.slane %v2933_v26, 1  ;;  %v2978_v36 = vadd.f32 %v2977_v0, %v2976_v37 }
0x160e   :  { %v2684_v49 = vsel %vm1790_vm5, %v2683_v17, %v2682_v12  ;;  %v3093_v19 = vsel %vm1464_vm1, %v2870_v7, 0.0  ;;  %v2948_v17 = vadd.f32 %v2947_v3, %v2946_v40  ;;  %v2919_v44 = vrot.slane %v2918_v21, 1 }
0x160f   :  { %v6741_v50 = vadd.f32 %v3093_v19, %v3092_v33  ;;  %v2706_v16 = vsel %vm1936_vm7, %v2684_v49, %v2705_v24  ;;  %v3171_v33 = vld [vmem:[%s7080_s6 + $0x28] sm:$0xff]  ;;  %3237 = vmatpush.msrb.mxu0 %v3172_v27  ;;  %v2904_v7 = vrot.slane %v2903_v61, 1  ;;  %v2993_v42 = vadd.f32 %v2992_v5, %v2991_v54 }
0x1610   :  { %v2707_v58 = vsel %vm1938_vm11, %v2693_v29, %v2706_v16  ;;  %v2964_v12 = vrot.slane %v2963_v63, 1  ;;  %v2949_v10 = vrot.slane %v2948_v17, 1  ;;  %v2890_v49 = vadd.f32 %v2889_v32, %v2888_v34 }
0x1611   :  { %v2713_v23 = vsel %vm1949_vm15, %v2707_v58, 0.0  ;;  %3238 = vmatpush.msrb.mxu0 %v3171_v33  ;;  %v2920_v19 = vadd.f32 %v2919_v44, %v2918_v21  ;;  %v2905_v29 = vadd.f32 %v2904_v7, %v2903_v61  ;;  %v2935_v16 = vadd.f32 %v2934_v59, %v2933_v26  ;;  %v4844_v26 = vld [vmem:[#allocation2 + $0x150] sm:$0xff] }
0x1612   :  { %2714 = vadd.xlane.f32.xlu0 %v2713_v23  ;;  %v2979_v58 = vrot.slane %v2978_v36, 1  ;;  %v2994_v23 = vrot.slane %v2993_v42, 1  ;;  %v2874_v0 = vmul.f32 %v4844_v26, %v6701_v14  ;;  %v3020_v32 = vrot.slane %v6588_v11, 4 }
0x1613   :  { %3239 = vmatpush.msrb.mxu0 %v3170_v38  ;;  %v3005_v44 = vrot.slane %v6607_v25, 4  ;;  %v3050_v59 = vrot.slane %v6621_v4, 4  ;;  %v3065_v14 = vrot.slane %v6664_v55, 4 }
0x1614   :  { %v2980_v56 = vadd.f32 %v2979_v58, %v2978_v36  ;;  %v2995_v9 = vadd.f32 %v2994_v23, %v2993_v42  ;;  %v3106_v5 = vsel %vm234_vm0, %v2874_v0, 0.0  ;;  %v3035_v36 = vrot.slane %v6633_v52, 4 }
0x1615   :  { %3240 = vmatpush.msrb.mxu0 %v3169_v6  ;;  %v2950_v6 = vadd.f32 %v2949_v10, %v2948_v17  ;;  %v3107_v17 = vadd.f32 %v3106_v5, %v6676_v22  ;;  %v3021_v22 = vadd.f32 %v3020_v32, %v6588_v11  ;;  %v3006_v10 = vadd.f32 %v3005_v44, %v6607_v25 }
0x1617   :  { %3241 = vmatpush.msrb.mxu0 %v3168_v41  ;;  %v2965_v41 = vadd.f32 %v2964_v12, %v2963_v63  ;;  %v3080_v12 = vrot.slane %v6713_v39, 4  ;;  %v3022_v11 = vrot.slane %v3021_v22, 2  ;;  %v3007_v23 = vrot.slane %v3006_v10, 2 }
0x1619   :  { %3242 = vmatpush.msrb.mxu0 %v3167_v28  ;;  %v3081_v58 = vadd.f32 %v3080_v12, %v6713_v39 }
0x161b   :  { %3243 = vmatpush.msrb.mxu0 %v3166_v20 }
0x1636   :  { %v2712_v13 = vpop.xlane.xlu1 %2711 }
0x1637   :  { %4630 = vrcp.f32 %v2712_v13  ;;  %v4845_v13 = vld [vmem:[#allocation2 + $0xd8] sm:$0xf] }
0x1638   :  { %v2875_v63 = vmul.f32 %v4845_v13, %v6726_v31  ;;  %v6809_v31 = vld [vmem:[%s7082_s8 + $0x18] sm:$0xff] }
0x1639   :  { %3306 = vmatpush.msrb.mxu2 %v6809_v31  ;;  %3528 = vmatpush.msrb.mxu3 %v6809_v31 }
0x163a   :  { %v3108_v7 = vsel %vm1464_vm1, %v2875_v63, 0.0  ;;  %3644 = vmatpush.msra.mxu0 %v6809_v31 }
0x163b   :  { %v3109_v42 = vadd.f32 %v3108_v7, %v3107_v17 }
0x163d   :  { %v4631_v24 = vpop.eup %4630 }
0x163e   :  { %v3120_v60 = vrot.slane %v4631_v24, 1  ;;  %v3121_v27 = vrot.slane %v4631_v24, 2  ;;  %v3122_v33 = vrot.slane %v4631_v24, 3  ;;  %v3123_v38 = vrot.slane %v4631_v24, 4 }
0x163f   :  { %v3124_v28 = vrot.slane %v4631_v24, 5  ;;  %v3125_v20 = vrot.slane %v4631_v24, 6  ;;  %v3126_v53 = vrot.slane %v4631_v24, 7  ;;  %v3150_v2 = vmul.f32 %v4631_v24, %v2890_v49 }
0x1640   :  { %v3151_v43 = vmul.f32 %v3120_v60, %v2905_v29  ;;  %v3152_v48 = vmul.f32 %v3121_v27, %v2920_v19  ;;  %v3153_v45 = vmul.f32 %v3122_v33, %v2935_v16  ;;  %v3154_v8 = vmul.f32 %v3123_v38, %v2950_v6 }
0x1641   :  { %v3155_v18 = vmul.f32 %v3124_v28, %v2965_v41  ;;  %v3156_v46 = vmul.f32 %v3125_v20, %v2980_v56  ;;  %v3157_v1 = vmul.f32 %v3126_v53, %v2995_v9  ;;  %v3051_v49 = vadd.f32 %v3050_v59, %v6621_v4 }
0x1642   :  { %v3190_v15 = vrot.slane %v3151_v43, 7  ;;  %v3192_v30 = vrot.slane %v3152_v48, 6  ;;  %v3194_v47 = vrot.slane %v3153_v45, 5  ;;  %v3196_v51 = vrot.slane %v3154_v8, 4 }
0x1643   :  { %v3198_v37 = vrot.slane %v3155_v18, 3  ;;  %v3200_v35 = vrot.slane %v3156_v46, 2  ;;  %v3202_v34 = vrot.slane %v3157_v1, 1  ;;  %v3036_v19 = vadd.f32 %v3035_v36, %v6633_v52 }
0x1644   :  { %v3191_v40 = vsel %vm375_vm9, %v3190_v15, %v3150_v2  ;;  %v3110_v24 = vrot.slane %v3109_v42, 4  ;;  %v3095_v29 = vrot.slane %v6741_v50, 4  ;;  %v3066_v16 = vadd.f32 %v3065_v14, %v6664_v55 }
0x1645   :  { %v3193_v62 = vsel %vm1928_vm12, %v3192_v30, %v3191_v40  ;;  %v3052_v25 = vrot.slane %v3051_v49, 2  ;;  %v3037_v60 = vrot.slane %v3036_v19, 2  ;;  %v3082_v4 = vrot.slane %v3081_v58, 2 }
0x1646   :  { %v3195_v57 = vsel %vm1930_vm13, %v3194_v47, %v3193_v62  ;;  %v3111_v27 = vadd.f32 %v3110_v24, %v3109_v42  ;;  %v3096_v33 = vadd.f32 %v3095_v29, %v6741_v50  ;;  %v3067_v38 = vrot.slane %v3066_v16, 2 }
0x1647   :  { %v3197_v54 = vsel %vm1932_vm8, %v3196_v51, %v3195_v57  ;;  %v3023_v6 = vadd.f32 %v3022_v11, %v3021_v22  ;;  %v3008_v52 = vadd.f32 %v3007_v23, %v3006_v10  ;;  %v3053_v41 = vadd.f32 %v3052_v25, %v3051_v49  ;;  %v3292_v25 = vld [vmem:[%s7082_s8 + $0x10] sm:$0xff] }
0x1648   :  { %v3199_v3 = vsel %vm1934_vm6, %v3198_v37, %v3197_v54  ;;  %v3038_v28 = vadd.f32 %v3037_v60, %v3036_v19  ;;  %v3112_v20 = vrot.slane %v3111_v27, 2  ;;  %v3097_v53 = vrot.slane %v3096_v33, 2  ;;  %v3256_v60 = vld [vmem:[%s7081_s7 + $0x18] sm:$0xff]  ;;  %3307 = vmatpush.msrb.mxu2 %v3292_v25  ;;  %3529 = vmatpush.msrb.mxu3 %v3292_v25 }
0x1649   :  { %v3201_v21 = vsel %vm1936_vm7, %v3200_v35, %v3199_v3  ;;  %v3068_v48 = vadd.f32 %v3067_v38, %v3066_v16  ;;  %v3083_v55 = vadd.f32 %v3082_v4, %v3081_v58  ;;  %v3024_v39 = vrot.slane %v3023_v6, 1  ;;  %3279 = vmatpush.msrb.mxu1 %v3256_v60  ;;  %v3290_v38 = vld [vmem:[%s7082_s8] sm:$0xff]  ;;  %v3254_v4 = vld [vmem:[%s7081_s7 + $0x8] sm:$0xff]  ;;  %3645 = vmatpush.msra.mxu0 %v3292_v25 }
0x164a   :  { %v3203_v61 = vsel %vm1938_vm11, %v3202_v34, %v3201_v21  ;;  %v3009_v45 = vrot.slane %v3008_v52, 1  ;;  %v3054_v56 = vrot.slane %v3053_v41, 1  ;;  %v3039_v9 = vrot.slane %v3038_v28, 1 }
0x164b   :  { %4302 = vmatmul.msk.f32.vlgmr.msrb.gmra.mxu0 %vm234_vm0, %v3203_v61  ;;  %v3113_v8 = vadd.f32 %v3112_v20, %v3111_v27  ;;  %v3098_v2 = vadd.f32 %v3097_v53, %v3096_v33  ;;  %v3069_v18 = vrot.slane %v3068_v48, 1  ;;  %v3084_v50 = vrot.slane %v3083_v55, 1  ;;  %v3291_v27 = vld [vmem:[%s7082_s8 + $0x8] sm:$0xff]  ;;  %v3255_v33 = vld [vmem:[%s7081_s7 + $0x10] sm:$0xff] }
0x164c   :  { %v3025_v15 = vadd.f32 %v3024_v39, %v3023_v6  ;;  %v3010_v30 = vadd.f32 %v3009_v45, %v3008_v52  ;;  %v3055_v1 = vadd.f32 %v3054_v56, %v3053_v41  ;;  %v3040_v40 = vadd.f32 %v3039_v9, %v3038_v28  ;;  %3308 = vmatpush.msrb.mxu2 %v3291_v27  ;;  %v3253_v6 = vld [vmem:[%s7081_s7] sm:$0xff]  ;;  %v3219_v41 = vpop.permute.xlu2 %3218 }
0x164d   :  { %v3099_v47 = vrot.slane %v3098_v2, 1  ;;  %v3114_v62 = vrot.slane %v3113_v8, 1  ;;  %v3070_v35 = vadd.f32 %v3069_v18, %v3068_v48  ;;  %v3085_v3 = vadd.f32 %v3084_v50, %v3083_v55  ;;  %3280 = vmatpush.msrb.mxu1 %v3255_v33  ;;  %3530 = vmatpush.msrb.mxu3 %v3291_v27  ;;  %v4469_v56 = vld [vmem:[%s7083_s9] ss:$0 sm:$0xff]  ;;  %s4878_s9 = smov [#allocation4]  }
0x164e   :  { %3646 = vmatpush.msra.mxu0 %v3291_v27  ;;  %3309 = vmatpush.msrb.mxu2 %v3290_v38  ;;  %v7245_v52 = vmov 0.0   ;;  %s4231_s12 = sshll.u32 %s4878_s9, 4  ;;  %s4232_s12 = int_to_ptr.vmem [resolvable:$true] %s4231_s12 }
0x164f   :  { %v3100_v13 = vadd.f32 %v3099_v47, %v3098_v2  ;;  %v3115_v63 = vadd.f32 %v3114_v62, %v3113_v8  ;;  %3281 = vmatpush.msrb.mxu1 %v3254_v4  ;;  %3310 = vmatmul.f32.vlgmr.msrb.gmra.mxu2 %v7245_v52 }
0x1650   :  { %3531 = vmatpush.msrb.mxu3 %v3290_v38  ;;  %3414 = vmatpush.msra.mxu2 %v6809_v31 }
0x1651   :  { %3282 = vmatpush.msrb.mxu1 %v3253_v6  ;;  %3647 = vmatpush.msra.mxu0 %v3290_v38 }
0x1652   :  { %3415 = vmatpush.msra.mxu2 %v3292_v25  ;;  %3992 = vmatpush.msra.mxu3 %v6809_v31 }
0x1653   :  { %3760 = vmatpush.msra.mxu1 %v6809_v31  ;;  %4108 = vmatpush.msrb.mxu0 %v6809_v31 }
0x1654   :  { %3416 = vmatpush.msra.mxu2 %v3291_v27  ;;  %3993 = vmatpush.msra.mxu3 %v3292_v25 }
0x1655   :  { %3761 = vmatpush.msra.mxu1 %v3292_v25  ;;  %4109 = vmatpush.msrb.mxu0 %v3292_v25 }
0x1656   :  { %3417 = vmatpush.msra.mxu2 %v3290_v38  ;;  %3994 = vmatpush.msra.mxu3 %v3291_v27 }
0x1657   :  { %3762 = vmatpush.msra.mxu1 %v3291_v27  ;;  %4110 = vmatpush.msrb.mxu0 %v3291_v27 }
0x1658   :  { %3876 = vmatpush.msrb.mxu2 %v6809_v31  ;;  %3995 = vmatpush.msra.mxu3 %v3290_v38 }
0x1659   :  { %3763 = vmatpush.msra.mxu1 %v3290_v38  ;;  %4111 = vmatpush.msrb.mxu0 %v3290_v38 }
0x165a   :  { %3877 = vmatpush.msrb.mxu2 %v3292_v25 }
0x165c   :  { %3878 = vmatpush.msrb.mxu2 %v3291_v27 }
0x165e   :  { %3879 = vmatpush.msrb.mxu2 %v3290_v38 }
0x1685   :  { %v2715_v43 = vpop.xlane.xlu0 %2714 }
0x1686   :  { %4632 = vrcp.f32 %v2715_v43  ;;  %v3221_v43 = vpop.permute.xlu2 %3220 }
0x168c   :  { %v4633_v46 = vpop.eup %4632 }
0x168d   :  { %v3127_v51 = vrot.slane %v4633_v46, 1  ;;  %v3128_v57 = vrot.slane %v4633_v46, 2  ;;  %v3129_v37 = vrot.slane %v4633_v46, 3  ;;  %v3130_v54 = vrot.slane %v4633_v46, 4 }
0x168e   :  { %v3131_v34 = vrot.slane %v4633_v46, 5  ;;  %v3132_v21 = vrot.slane %v4633_v46, 6  ;;  %v3133_v61 = vrot.slane %v4633_v46, 7  ;;  %v3158_v32 = vmul.f32 %v4633_v46, %v3010_v30 }
0x168f   :  { %v3159_v26 = vmul.f32 %v3127_v51, %v3025_v15  ;;  %v3160_v0 = vmul.f32 %v3128_v57, %v3040_v40  ;;  %v3161_v5 = vmul.f32 %v3129_v37, %v3055_v1  ;;  %v3162_v17 = vmul.f32 %v3130_v54, %v3070_v35 }
0x1690   :  { %v3163_v44 = vmul.f32 %v3131_v34, %v3085_v3  ;;  %v3164_v36 = vmul.f32 %v3132_v21, %v3100_v13  ;;  %v3165_v42 = vmul.f32 %v3133_v61, %v3115_v63 }
0x1691   :  { %v3204_v7 = vrot.slane %v3159_v26, 7  ;;  %v3206_v59 = vrot.slane %v3160_v0, 6  ;;  %v3208_v12 = vrot.slane %v3161_v5, 5  ;;  %v3210_v10 = vrot.slane %v3162_v17, 4 }
0x1692   :  { %v3212_v19 = vrot.slane %v3163_v44, 3  ;;  %v3214_v29 = vrot.slane %v3164_v36, 2  ;;  %v3216_v58 = vrot.slane %v3165_v42, 1 }
0x1693   :  { %v3205_v14 = vsel %vm375_vm9, %v3204_v7, %v3158_v32 }
0x1694   :  { %v3207_v22 = vsel %vm1928_vm12, %v3206_v59, %v3205_v14 }
0x1695   :  { %v3209_v49 = vsel %vm1930_vm13, %v3208_v12, %v3207_v22 }
0x1696   :  { %v3211_v24 = vsel %vm1932_vm8, %v3210_v10, %v3209_v49 }
0x1697   :  { %v3213_v16 = vsel %vm1934_vm6, %v3212_v19, %v3211_v24 }
0x1698   :  { %v3215_v11 = vsel %vm1936_vm7, %v3214_v29, %v3213_v16 }
0x1699   :  { %v3217_v23 = vsel %vm1938_vm11, %v3216_v58, %v3215_v11 }
0x169a   :  { %4303 = vmatmul.msk.f32.gmra.mxu0 %vm234_vm0, %v3217_v23 }
0x16c8   :  { %v3245_v28 = vpop.f32.mrf.mxu0 }
0x16c9   :  { %v3246_v20 = vadd.f32 %v3245_v28, %v3219_v41 }
0x16cb   :  { %4634 = vtanh.f32 %v3246_v20 }
0x16d1   :  { %v4635_v53 = vpop.eup %4634 }
0x16d2   :  { %4304 = vmatmul.msk.f32.vlgmr.msrb.gmra.mxu1 %vm268_vm10, %v4635_v53  ;;  %v3311_v45 = vpop.f32.mrf.mxu2 }
0x16d3   :  { %v3315_v9 = vrot.slane %v3311_v45, 1 }
0x1717   :  { %v3248_v48 = vpop.f32.mrf.mxu0 }
0x1718   :  { %v3249_v55 = vadd.f32 %v3248_v48, %v3221_v43 }
0x171a   :  { %4636 = vtanh.f32 %v3249_v55 }
0x1720   :  { %v4637_v39 = vpop.eup %4636 }
0x1721   :  { %4305 = vmatmul.msk.f32.gmra.mxu1 %vm268_vm10, %v4637_v39 }
0x174f   :  { %v3284_v31 = vpop.f32.mrf.mxu1 }
0x1750   :  { %v6865_v50 = vadd.f32 %v4469_v56, %v3284_v31 }
0x1752   :  { %v3318_v15 = vadd.f32 %v3311_v45, %v6865_v50 }
0x1754   :  { %v4306_v40 = vmul.f32 -1.442695, %v3318_v15 }
0x179e   :  { %v3287_v8 = vpop.f32.mrf.mxu1 }
0x179f   :  { %v6862_v2 = vadd.f32 %v4469_v56, %v3287_v8 }
0x17a1   :  { %v3319_v18 = vadd.f32 %v3315_v9, %v6862_v2 }
0x17a3   :  { %4638 = vtanh.f32 %v3319_v18  ;;  %v4307_v1 = vmul.f32 -1.442695, %v3319_v18 }
0x17a4   :  { %4640 = vtanh.f32 %v3318_v15 }
0x17a5   :  { %4642 = vpow2.f32 %v4307_v1 }
0x17a6   :  { %4644 = vpow2.f32 %v4306_v40 }
0x17a9   :  { %v4639_v30 = vpop.eup %4638 }
0x17aa   :  { %3366 = vrot.lane.b32.xlu2 %v4639_v30, %s4875_s0  ;;  %v4641_v46 = vpop.eup %4640 }
0x17ab   :  { %v4643_v47 = vpop.eup %4642 }
0x17ac   :  { %v3327_v62 = vadd.f32 1.0, %v4643_v47  ;;  %v4645_v51 = vpop.eup %4644 }
0x17ad   :  { %v3326_v57 = vadd.f32 1.0, %v4645_v51 }
0x17ae   :  { %4646 = vrcp.f32 %v3327_v62  ;;  %v3354_v0 = vand.u32 2147483648, %v3327_v62  ;;  %vm3348_vm15 = vweird.f32 %v3327_v62  ;;  %v3352_v5 = vand.u32 2147483647, %v3327_v62 }
0x17af   :  { %4648 = vrcp.f32 %v3326_v57  ;;  %v3339_v36 = vand.u32 2147483648, %v3326_v57  ;;  %vm3333_vm8 = vweird.f32 %v3326_v57  ;;  %v3337_v42 = vand.u32 2147483647, %v3326_v57 }
0x17b0   :  { %v3355_v17 = vor.u32 1.1754944e-38, %v3354_v0  ;;  %vm3353_vm7 = vcmp.eq.f32.partialorder %v3352_v5, 8.507059e+37 }
0x17b1   :  { %v3340_v12 = vor.u32 1.1754944e-38, %v3339_v36  ;;  %vm3338_vm1 = vcmp.eq.f32.partialorder %v3337_v42, 8.507059e+37 }
0x17b2   :  { %3364 = vrot.lane.b32.xlu2 %v4641_v46, %s4875_s0 }
0x17b4   :  { %v4647_v37 = vpop.eup %4646 }
0x17b5   :  { %v3344_v54 = vmul.f32 %v4647_v37, %v3327_v62  ;;  %v4649_v3 = vpop.eup %4648  ;;  %vm3349_vm0 = vweird.f32 %v4647_v37 }
0x17b6   :  { %v3329_v21 = vmul.f32 %v4649_v3, %v3326_v57  ;;  %vm3350_vm11 = vmor %vm3348_vm15, %vm3349_vm0  ;;  %vm3334_vm6 = vweird.f32 %v4649_v3 }
0x17b7   :  { %v3345_v35 = vsub.f32 1.0, %v3344_v54  ;;  %vm3335_vm13 = vmor %vm3333_vm8, %vm3334_vm6 }
0x17b8   :  { %v3330_v26 = vsub.f32 1.0, %v3329_v21 }
0x17b9   :  { %v3346_v34 = vmul.f32 %v4647_v37, %v3345_v35 }
0x17ba   :  { %v3331_v63 = vmul.f32 %v4649_v3, %v3330_v26 }
0x17bb   :  { %v3347_v61 = vadd.f32 %v4647_v37, %v3346_v34 }
0x17bc   :  { %v3332_v59 = vadd.f32 %v4649_v3, %v3331_v63 }
0x17bd   :  { %v3351_v13 = vsel %vm3350_vm11, %v4647_v37, %v3347_v61 }
0x17be   :  { %v3356_v44 = vsel %vm3353_vm7, %v3355_v17, %v3351_v13  ;;  %v3336_v14 = vsel %vm3335_vm13, %v4649_v3, %v3332_v59 }
0x17bf   :  { %v3341_v22 = vsel %vm3338_vm1, %v3340_v12, %v3336_v14  ;;  %v3361_v19 = vmul.f32 0.0, %v3356_v44 }
0x17c0   :  { %v3360_v58 = vmul.f32 0.0, %v3341_v22 }
0x1804   :  { %v3367_v32 = vpop.permute.xlu2 %3366 }
0x1805   :  { %v3371_v7 = vmul.f32 %v3367_v32, %v3356_v44 }
0x1807   :  { %3376 = vrot.lane.b32.xlu2 %v3371_v7, %s4875_s0 }
0x180c   :  { %v3365_v10 = vpop.permute.xlu2 %3364 }
0x180d   :  { %v3370_v49 = vmul.f32 %v3365_v10, %v3341_v22 }
0x180f   :  { %3374 = vrot.lane.b32.xlu1 %v3370_v49, %s4875_s0 }
0x1861   :  { %v3377_v24 = vpop.permute.xlu2 %3376 }
0x1862   :  { %v6872_v29 = vadd.f32 %v3377_v24, %v3361_v19 }
0x1864   :  { %4650 = vtanh.f32 %v6872_v29  ;;  %v3471_v32 = vrot.slane %v6872_v29, 7 }
0x186a   :  { %v4651_v16 = vpop.eup %4650 }
0x186b   :  { %3388 = vrot.lane.b32.xlu2 %v4651_v16, %s4875_s0 }
0x1881   :  { %v3375_v11 = vpop.permute.xlu1 %3374 }
0x1882   :  { %v6876_v23 = vadd.f32 %v3375_v11, %v3360_v58 }
0x1884   :  { %4652 = vtanh.f32 %v6876_v23  ;;  %v3470_v7 = vrot.slane %v6876_v23, 7 }
0x188a   :  { %v4653_v25 = vpop.eup %4652 }
0x188b   :  { %3386 = vrot.lane.b32.xlu0 %v4653_v25, %s4875_s0 }
0x18c5   :  { %v3389_v60 = vpop.permute.xlu2 %3388 }
0x18c6   :  { %v6880_v27 = vmul.f32 %v3389_v60, %v3356_v44 }
0x18c8   :  { %v3396_v38 = vrot.slane %v6880_v27, 7 }
0x18fd   :  { %v3387_v33 = vpop.permute.xlu0 %3386 }
0x18fe   :  { %v6883_v4 = vmul.f32 %v3387_v33, %v3341_v22 }
0x1900   :  { %v3397_v6 = vsel %vm375_vm9, %v3396_v38, %v6883_v4 }
0x1901   :  { %3398 = vrot.lane.b32.xlu2 %v3397_v6, %s4876_s4 }
0x195b   :  { %v3399_v52 = vpop.permute.xlu2 %3398 }
0x195c   :  { %4308 = vmatmul.msk.f32.vlgmr.msra.gmra.mxu2 %vm268_vm10, %v3399_v52 }
0x19df   :  { %v3419_v41 = vpop.f32.mrf.mxu2 }
0x19e0   :  { %v3423_v28 = vrot.slane %v3419_v41, 7  ;;  %v3427_v20 = vadd.f32 %v3419_v41, %v6862_v2 }
0x19e2   :  { %v3426_v53 = vadd.f32 %v3423_v28, %v6865_v50  ;;  %4654 = vtanh.f32 %v3427_v20  ;;  %v4310_v45 = vmul.f32 -1.442695, %v3427_v20 }
0x19e4   :  { %4656 = vtanh.f32 %v3426_v53  ;;  %v4309_v55 = vmul.f32 -1.442695, %v3426_v53 }
0x19e6   :  { %4658 = vpow2.f32 %v4309_v55 }
0x19e8   :  { %v4655_v43 = vpop.eup %4654 }
0x19e9   :  { %3480 = vrot.lane.b32.xlu1 %v4655_v43, %s4875_s0 }
0x19ea   :  { %v4657_v48 = vpop.eup %4656 }
0x19eb   :  { %3478 = vrot.lane.b32.xlu2 %v4657_v48, %s4875_s0 }
0x19ec   :  { %v4659_v39 = vpop.eup %4658 }
0x19ed   :  { %v3434_v31 = vadd.f32 1.0, %v4659_v39 }
0x19ef   :  { %4660 = vrcp.f32 %v3434_v31  ;;  %v3447_v1 = vand.u32 2147483648, %v3434_v31  ;;  %vm3441_vm3 = vweird.f32 %v3434_v31  ;;  %v3445_v40 = vand.u32 2147483647, %v3434_v31 }
0x19f0   :  { %4662 = vpow2.f32 %v4310_v45 }
0x19f1   :  { %v3448_v62 = vor.u32 1.1754944e-38, %v3447_v1  ;;  %vm3446_vm5 = vcmp.eq.f32.partialorder %v3445_v40, 8.507059e+37 }
0x19f5   :  { %v4661_v56 = vpop.eup %4660 }
0x19f6   :  { %v3437_v9 = vmul.f32 %v4661_v56, %v3434_v31  ;;  %v4663_v18 = vpop.eup %4662  ;;  %vm3442_vm2 = vweird.f32 %v4661_v56 }
0x19f7   :  { %v3435_v15 = vadd.f32 1.0, %v4663_v18  ;;  %vm3443_vm4 = vmor %vm3441_vm3, %vm3442_vm2 }
0x19f8   :  { %v3438_v8 = vsub.f32 1.0, %v3437_v9 }
0x19f9   :  { %4664 = vrcp.f32 %v3435_v15  ;;  %v3462_v61 = vand.u32 2147483648, %v3435_v15  ;;  %vm3456_vm0 = vweird.f32 %v3435_v15  ;;  %v3460_v26 = vand.u32 2147483647, %v3435_v15 }
0x19fa   :  { %v3439_v30 = vmul.f32 %v4661_v56, %v3438_v8 }
0x19fb   :  { %v3463_v5 = vor.u32 1.1754944e-38, %v3462_v61  ;;  %vm3461_vm11 = vcmp.eq.f32.partialorder %v3460_v26, 8.507059e+37 }
0x19fc   :  { %v3440_v46 = vadd.f32 %v4661_v56, %v3439_v30 }
0x19fe   :  { %v3444_v47 = vsel %vm3443_vm4, %v4661_v56, %v3440_v46 }
0x19ff   :  { %v4665_v51 = vpop.eup %4664  ;;  %v3449_v37 = vsel %vm3446_vm5, %v3448_v62, %v3444_v47  ;;  %vm7246_vm5 = vcmask 1041408  }
0x1a00   :  { %v3452_v35 = vmul.f32 %v4665_v51, %v3435_v15  ;;  %vm3457_vm12 = vweird.f32 %v4665_v51  ;;  %v3474_v42 = vmul.f32 %v3470_v7, %v3449_v37 }
0x1a01   :  { %vm3458_vm15 = vmor %vm3456_vm0, %vm3457_vm12 }
0x1a02   :  { %v3453_v3 = vsub.f32 1.0, %v3452_v35  ;;  %vm7247_vm12 = vmmov %vm7246_vm5 }
0x1a04   :  { %v3454_v34 = vmul.f32 %v4665_v51, %v3453_v3 }
0x1a06   :  { %v3455_v21 = vadd.f32 %v4665_v51, %v3454_v34 }
0x1a08   :  { %v3459_v0 = vsel %vm3458_vm15, %v4665_v51, %v3455_v21 }
0x1a09   :  { %v3464_v63 = vsel %vm3461_vm11, %v3463_v5, %v3459_v0 }
0x1a0a   :  { %v3475_v44 = vmul.f32 %v3471_v32, %v3464_v63 }
0x1a45   :  { %v3479_v57 = vpop.permute.xlu2 %3478 }
0x1a46   :  { %v3484_v54 = vmul.f32 %v3479_v57, %v3449_v37 }
0x1a48   :  { %3488 = vrot.lane.b32.xlu0 %v3484_v54, %s4875_s0 }
0x1a5b   :  { %v3481_v13 = vpop.permute.xlu1 %3480 }
0x1a5c   :  { %v3485_v17 = vmul.f32 %v3481_v13, %v3464_v63 }
0x1a5e   :  { %3490 = vrot.lane.b32.xlu2 %v3485_v17, %s4875_s0 }
0x1ab8   :  { %v3491_v59 = vpop.permute.xlu2 %3490 }
0x1ab9   :  { %v6897_v36 = vadd.f32 %v3491_v59, %v3475_v44 }
0x1aba   :  { %v3489_v14 = vpop.permute.xlu0 %3488 }
0x1abb   :  { %4666 = vtanh.f32 %v6897_v36  ;;  %v6900_v12 = vadd.f32 %v3489_v14, %v3474_v42  ;;  %v3586_v17 = vrot.slane %v6897_v36, 7 }
0x1abd   :  { %4668 = vtanh.f32 %v6900_v12  ;;  %v3585_v26 = vrot.slane %v6900_v12, 7 }
0x1ac1   :  { %v4667_v22 = vpop.eup %4666 }
0x1ac2   :  { %3502 = vrot.lane.b32.xlu0 %v4667_v22, %s4875_s0 }
0x1ac3   :  { %v4669_v10 = vpop.eup %4668 }
0x1ac4   :  { %3500 = vrot.lane.b32.xlu1 %v4669_v10, %s4875_s0 }
0x1b34   :  { %v3503_v49 = vpop.permute.xlu0 %3502 }
0x1b35   :  { %v6907_v29 = vmul.f32 %v3503_v49, %v3464_v63 }
0x1b36   :  { %v3501_v19 = vpop.permute.xlu1 %3500 }
0x1b37   :  { %v6905_v24 = vmul.f32 %v3501_v19, %v3449_v37  ;;  %v4204_v36 = vsel %vm1182_vm14, %v6880_v27, %v6907_v29 }
0x1b39   :  { %v3510_v16 = vrot.slane %v6905_v24, 1  ;;  %v4203_v22 = vsel %vm1182_vm14, %v6883_v4, %v6905_v24 }
0x1b3b   :  { %v3511_v58 = vsel %vm375_vm9, %v6907_v29, %v3510_v16 }
0x1b3c   :  { %3512 = vrot.lane.b32.xlu2 %v3511_v58, %s4876_s4 }
0x1b96   :  { %v3513_v11 = vpop.permute.xlu2 %3512 }
0x1b97   :  { %4311 = vmatmul.msk.f32.vlgmr.msrb.gmra.mxu3 %vm268_vm10, %v3513_v11 }
0x1c1a   :  { %v3533_v23 = vpop.f32.mrf.mxu3 }
0x1c1b   :  { %v3537_v25 = vrot.slane %v3533_v23, 6  ;;  %v3538_v60 = vrot.slane %v3533_v23, 7 }
0x1c1d   :  { %v3541_v33 = vadd.f32 %v3537_v25, %v6865_v50  ;;  %v3542_v38 = vadd.f32 %v3538_v60, %v6862_v2 }
0x1c1f   :  { %4670 = vtanh.f32 %v3541_v33  ;;  %v4312_v41 = vmul.f32 -1.442695, %v3541_v33  ;;  %v4313_v28 = vmul.f32 -1.442695, %v3542_v38 }
0x1c20   :  { %4672 = vtanh.f32 %v3542_v38 }
0x1c21   :  { %4674 = vpow2.f32 %v4312_v41 }
0x1c22   :  { %4676 = vpow2.f32 %v4313_v28 }
0x1c25   :  { %v4671_v6 = vpop.eup %4670 }
0x1c26   :  { %v4673_v52 = vpop.eup %4672  ;;  %3593 = vrot.lane.b32.xlu1 %v4671_v6, %s4875_s0 }
0x1c27   :  { %3595 = vrot.lane.b32.xlu0 %v4673_v52, %s4875_s0  ;;  %v4675_v20 = vpop.eup %4674 }
0x1c28   :  { %v4677_v53 = vpop.eup %4676  ;;  %v3549_v43 = vadd.f32 1.0, %v4675_v20 }
0x1c29   :  { %v3550_v48 = vadd.f32 1.0, %v4677_v53 }
0x1c2a   :  { %4678 = vrcp.f32 %v3549_v43  ;;  %v3562_v46 = vand.u32 2147483648, %v3549_v43  ;;  %vm3556_vm8 = vweird.f32 %v3549_v43  ;;  %v3560_v40 = vand.u32 2147483647, %v3549_v43 }
0x1c2b   :  { %4680 = vrcp.f32 %v3550_v48  ;;  %v3577_v1 = vand.u32 2147483648, %v3550_v48  ;;  %vm3571_vm13 = vweird.f32 %v3550_v48  ;;  %v3575_v47 = vand.u32 2147483647, %v3550_v48 }
0x1c2c   :  { %v3563_v57 = vor.u32 1.1754944e-38, %v3562_v46  ;;  %vm3561_vm3 = vcmp.eq.f32.partialorder %v3560_v40, 8.507059e+37 }
0x1c2d   :  { %v3578_v37 = vor.u32 1.1754944e-38, %v3577_v1  ;;  %vm3576_vm4 = vcmp.eq.f32.partialorder %v3575_v47, 8.507059e+37 }
0x1c30   :  { %v4679_v55 = vpop.eup %4678 }
0x1c31   :  { %v4681_v39 = vpop.eup %4680  ;;  %v3552_v31 = vmul.f32 %v4679_v55, %v3549_v43  ;;  %vm3557_vm7 = vweird.f32 %v4679_v55 }
0x1c32   :  { %v3567_v45 = vmul.f32 %v4681_v39, %v3550_v48  ;;  %vm3572_vm6 = vweird.f32 %v4681_v39  ;;  %vm3558_vm1 = vmor %vm3556_vm8, %vm3557_vm7 }
0x1c33   :  { %v3553_v56 = vsub.f32 1.0, %v3552_v31  ;;  %vm3573_vm2 = vmor %vm3571_vm13, %vm3572_vm6 }
0x1c34   :  { %v3568_v9 = vsub.f32 1.0, %v3567_v45 }
0x1c35   :  { %v3554_v8 = vmul.f32 %v4679_v55, %v3553_v56 }
0x1c36   :  { %v3569_v18 = vmul.f32 %v4681_v39, %v3568_v9 }
0x1c37   :  { %v3555_v15 = vadd.f32 %v4679_v55, %v3554_v8 }
0x1c38   :  { %v3570_v30 = vadd.f32 %v4681_v39, %v3569_v18 }
0x1c39   :  { %v3559_v62 = vsel %vm3558_vm1, %v4679_v55, %v3555_v15  ;;  %vm7248_vm1 = vcmask 1042432  }
0x1c3a   :  { %v3574_v51 = vsel %vm3573_vm2, %v4681_v39, %v3570_v30  ;;  %v3564_v35 = vsel %vm3561_vm3, %v3563_v57, %v3559_v62  ;;  %vm7249_vm2 = vmmov %vm7248_vm1 }
0x1c3b   :  { %v3579_v34 = vsel %vm3576_vm4, %v3578_v37, %v3574_v51  ;;  %v3589_v0 = vmul.f32 %v3585_v26, %v3564_v35 }
0x1c3c   :  { %v3590_v32 = vmul.f32 %v3586_v17, %v3579_v34 }
0x1c98   :  { %v3594_v54 = vpop.permute.xlu1 %3593 }
0x1c99   :  { %v3596_v3 = vpop.permute.xlu0 %3595  ;;  %v3599_v21 = vmul.f32 %v3594_v54, %v3564_v35 }
0x1c9a   :  { %v3600_v61 = vmul.f32 %v3596_v3, %v3579_v34 }
0x1c9b   :  { %3603 = vrot.lane.b32.xlu2 %v3599_v21, %s4875_s0 }
0x1c9c   :  { %3605 = vrot.lane.b32.xlu1 %v3600_v61, %s4875_s0 }
0x1cf5   :  { %v3604_v5 = vpop.permute.xlu2 %3603 }
0x1cf6   :  { %v6921_v13 = vadd.f32 %v3604_v5, %v3589_v0 }
0x1cf8   :  { %4682 = vtanh.f32 %v6921_v13  ;;  %v3701_v5 = vrot.slane %v6921_v13, 7 }
0x1cfe   :  { %v4683_v63 = vpop.eup %4682 }
0x1cff   :  { %3615 = vrot.lane.b32.xlu0 %v4683_v63, %s4875_s0 }
0x1d0e   :  { %v3606_v44 = vpop.permute.xlu1 %3605 }
0x1d0f   :  { %v6926_v7 = vadd.f32 %v3606_v44, %v3590_v32 }
0x1d11   :  { %4684 = vtanh.f32 %v6926_v7 }
0x1d17   :  { %v4685_v59 = vpop.eup %4684 }
0x1d18   :  { %3617 = vrot.lane.b32.xlu2 %v4685_v59, %s4875_s0 }
0x1d71   :  { %v3616_v42 = vpop.permute.xlu0 %3615 }
0x1d72   :  { %v3618_v14 = vpop.permute.xlu2 %3617  ;;  %v3621_v12 = vmul.f32 %v3616_v42, %v3564_v35 }
0x1d73   :  { %v3622_v10 = vmul.f32 %v3618_v14, %v3579_v34  ;;  %v3702_v34 = vrot.slane %v6926_v7, 7 }
0x1d74   :  { %v3625_v49 = vrot.slane %v3621_v12, 2  ;;  %v6937_v19 = vsel %vm7246_vm5, %v4203_v22, %v3621_v12 }
0x1d75   :  { %v3626_v16 = vrot.slane %v3622_v10, 1  ;;  %v6940_v58 = vsel %vm7247_vm12, %v4204_v36, %v3622_v10 }
0x1d77   :  { %v3627_v11 = vsel %vm375_vm9, %v3626_v16, %v3625_v49 }
0x1d78   :  { %3628 = vrot.lane.b32.xlu1 %v3627_v11, %s4876_s4 }
0x1dea   :  { %v3629_v23 = vpop.permute.xlu1 %3628 }
0x1deb   :  { %4314 = vmatmul.msk.f32.vlgmr.msra.gmra.mxu0 %vm268_vm10, %v3629_v23 }
0x1e68   :  { %v3649_v4 = vpop.f32.mrf.mxu0 }
0x1e69   :  { %v3653_v24 = vrot.slane %v3649_v4, 5  ;;  %v3654_v25 = vrot.slane %v3649_v4, 6 }
0x1e6b   :  { %v3657_v27 = vadd.f32 %v3653_v24, %v6865_v50  ;;  %v3658_v29 = vadd.f32 %v3654_v25, %v6862_v2 }
0x1e6d   :  { %4686 = vtanh.f32 %v3657_v27  ;;  %v4316_v38 = vmul.f32 -1.442695, %v3658_v29  ;;  %v4315_v28 = vmul.f32 -1.442695, %v3657_v27 }
0x1e6e   :  { %4688 = vtanh.f32 %v3658_v29 }
0x1e6f   :  { %4690 = vpow2.f32 %v4316_v38 }
0x1e73   :  { %v4687_v60 = vpop.eup %4686 }
0x1e74   :  { %v4689_v33 = vpop.eup %4688  ;;  %3709 = vrot.lane.b32.xlu0 %v4687_v60, %s4875_s0 }
0x1e75   :  { %3711 = vrot.lane.b32.xlu2 %v4689_v33, %s4875_s0  ;;  %v4691_v6 = vpop.eup %4690 }
0x1e76   :  { %v3666_v52 = vadd.f32 1.0, %v4691_v6 }
0x1e78   :  { %4692 = vrcp.f32 %v3666_v52  ;;  %v3693_v31 = vand.u32 2147483648, %v3666_v52  ;;  %vm3687_vm0 = vweird.f32 %v3666_v52  ;;  %v3691_v45 = vand.u32 2147483647, %v3666_v52 }
0x1e79   :  { %4694 = vpow2.f32 %v4315_v28 }
0x1e7a   :  { %v3694_v9 = vor.u32 1.1754944e-38, %v3693_v31  ;;  %vm3692_vm11 = vcmp.eq.f32.partialorder %v3691_v45, 8.507059e+37 }
0x1e7e   :  { %v4693_v41 = vpop.eup %4692 }
0x1e7f   :  { %v3683_v20 = vmul.f32 %v4693_v41, %v3666_v52  ;;  %v4695_v43 = vpop.eup %4694  ;;  %vm3688_vm14 = vweird.f32 %v4693_v41 }
0x1e80   :  { %v3665_v55 = vadd.f32 1.0, %v4695_v43  ;;  %vm3689_vm15 = vmor %vm3687_vm0, %vm3688_vm14 }
0x1e81   :  { %v3684_v53 = vsub.f32 1.0, %v3683_v20 }
0x1e82   :  { %4696 = vrcp.f32 %v3665_v55  ;;  %v3678_v62 = vand.u32 2147483648, %v3665_v55  ;;  %vm3672_vm6 = vweird.f32 %v3665_v55  ;;  %v3676_v51 = vand.u32 2147483647, %v3665_v55 }
0x1e83   :  { %v3685_v48 = vmul.f32 %v4693_v41, %v3684_v53 }
0x1e84   :  { %v3679_v37 = vor.u32 1.1754944e-38, %v3678_v62  ;;  %vm3677_vm13 = vcmp.eq.f32.partialorder %v3676_v51, 8.507059e+37 }
0x1e85   :  { %v3686_v39 = vadd.f32 %v4693_v41, %v3685_v48 }
0x1e87   :  { %v3690_v56 = vsel %vm3689_vm15, %v4693_v41, %v3686_v39 }
0x1e88   :  { %v3695_v18 = vsel %vm3692_vm11, %v3694_v9, %v3690_v56  ;;  %v4697_v15 = vpop.eup %4696 }
0x1e89   :  { %v3668_v46 = vmul.f32 %v4697_v15, %v3665_v55  ;;  %vm3673_vm7 = vweird.f32 %v4697_v15  ;;  %v3706_v21 = vmul.f32 %v3702_v34, %v3695_v18 }
0x1e8a   :  { %vm3674_vm8 = vmor %vm3672_vm6, %vm3673_vm7  ;;  %vm7250_vm7 = vcmask 1043456  }
0x1e8b   :  { %v3669_v1 = vsub.f32 1.0, %v3668_v46  ;;  %vm7251_vm6 = vmmov %vm7250_vm7 }
0x1e8d   :  { %v3670_v40 = vmul.f32 %v4697_v15, %v3669_v1 }
0x1e8f   :  { %v3671_v47 = vadd.f32 %v4697_v15, %v3670_v40 }
0x1e91   :  { %v3675_v57 = vsel %vm3674_vm8, %v4697_v15, %v3671_v47 }
0x1e92   :  { %v3680_v35 = vsel %vm3677_vm13, %v3679_v37, %v3675_v57 }
0x1e93   :  { %v3705_v63 = vmul.f32 %v3701_v5, %v3680_v35 }
0x1ecf   :  { %v3712_v8 = vpop.permute.xlu2 %3711 }
0x1ed0   :  { %v3716_v30 = vmul.f32 %v3712_v8, %v3695_v18 }
0x1ed2   :  { %3721 = vrot.lane.b32.xlu0 %v3716_v30, %s4875_s0 }
0x1ee6   :  { %v3710_v54 = vpop.permute.xlu0 %3709 }
0x1ee7   :  { %v3715_v3 = vmul.f32 %v3710_v54, %v3680_v35 }
0x1ee9   :  { %3719 = vrot.lane.b32.xlu1 %v3715_v3, %s4875_s0 }
0x1f44   :  { %v3722_v61 = vpop.permute.xlu0 %3721 }
0x1f45   :  { %v6952_v26 = vadd.f32 %v3722_v61, %v3706_v21 }
0x1f47   :  { %4698 = vtanh.f32 %v6952_v26  ;;  %v3818_v37 = vrot.slane %v6952_v26, 7 }
0x1f4d   :  { %v4699_v0 = vpop.eup %4698 }
0x1f4e   :  { %3733 = vrot.lane.b32.xlu1 %v4699_v0, %s4875_s0 }
0x1f5b   :  { %v3720_v17 = vpop.permute.xlu1 %3719 }
0x1f5c   :  { %v6957_v32 = vadd.f32 %v3720_v17, %v3705_v63 }
0x1f5e   :  { %4700 = vtanh.f32 %v6957_v32  ;;  %v3817_v57 = vrot.slane %v6957_v32, 7 }
0x1f64   :  { %v4701_v44 = vpop.eup %4700 }
0x1f65   :  { %3731 = vrot.lane.b32.xlu2 %v4701_v44, %s4875_s0 }
0x1fbf   :  { %v3732_v7 = vpop.permute.xlu2 %3731 }
0x1fc0   :  { %v3734_v59 = vpop.permute.xlu1 %3733  ;;  %v3737_v42 = vmul.f32 %v3732_v7, %v3680_v35 }
0x1fc1   :  { %v3738_v14 = vmul.f32 %v3734_v59, %v3695_v18 }
0x1fc2   :  { %v3741_v12 = vrot.slane %v3737_v42, 3  ;;  %v6963_v22 = vsel %vm7248_vm1, %v6937_v19, %v3737_v42 }
0x1fc3   :  { %v3742_v10 = vrot.slane %v3738_v14, 2  ;;  %v6967_v13 = vsel %vm7249_vm2, %v6940_v58, %v3738_v14 }
0x1fc5   :  { %v3743_v36 = vsel %vm375_vm9, %v3742_v10, %v3741_v12 }
0x1fc6   :  { %3744 = vrot.lane.b32.xlu0 %v3743_v36, %s4876_s4 }
0x2038   :  { %v3745_v49 = vpop.permute.xlu0 %3744 }
0x2039   :  { %4317 = vmatmul.msk.f32.vlgmr.msra.gmra.mxu1 %vm268_vm10, %v3745_v49 }
0x20b6   :  { %v3765_v16 = vpop.f32.mrf.mxu1 }
0x20b7   :  { %v3769_v11 = vrot.slane %v3765_v16, 4  ;;  %v3770_v23 = vrot.slane %v3765_v16, 5 }
0x20b9   :  { %v3773_v4 = vadd.f32 %v3769_v11, %v6865_v50  ;;  %v3774_v19 = vadd.f32 %v3770_v23, %v6862_v2 }
0x20bb   :  { %4702 = vtanh.f32 %v3773_v4  ;;  %v4318_v58 = vmul.f32 -1.442695, %v3773_v4  ;;  %v4319_v33 = vmul.f32 -1.442695, %v3774_v19 }
0x20bc   :  { %4704 = vtanh.f32 %v3774_v19 }
0x20bd   :  { %4706 = vpow2.f32 %v4318_v58 }
0x20c1   :  { %v4703_v24 = vpop.eup %4702 }
0x20c2   :  { %v4705_v25 = vpop.eup %4704  ;;  %3825 = vrot.lane.b32.xlu2 %v4703_v24, %s4875_s0 }
0x20c3   :  { %3827 = vrot.lane.b32.xlu1 %v4705_v25, %s4875_s0  ;;  %v4707_v27 = vpop.eup %4706 }
0x20c4   :  { %v3781_v29 = vadd.f32 1.0, %v4707_v27 }
0x20c6   :  { %4708 = vrcp.f32 %v3781_v29  ;;  %v3794_v53 = vand.u32 2147483648, %v3781_v29  ;;  %vm3788_vm4 = vweird.f32 %v3781_v29  ;;  %v3792_v43 = vand.u32 2147483647, %v3781_v29 }
0x20c7   :  { %4710 = vpow2.f32 %v4319_v33 }
0x20c8   :  { %v3795_v55 = vor.u32 1.1754944e-38, %v3794_v53  ;;  %vm3793_vm12 = vcmp.eq.f32.partialorder %v3792_v43, 8.507059e+37 }
0x20cc   :  { %v4709_v60 = vpop.eup %4708 }
0x20cd   :  { %v3784_v38 = vmul.f32 %v4709_v60, %v3781_v29  ;;  %v4711_v41 = vpop.eup %4710  ;;  %vm3789_vm3 = vweird.f32 %v4709_v60 }
0x20ce   :  { %v3782_v28 = vadd.f32 1.0, %v4711_v41  ;;  %vm3790_vm5 = vmor %vm3788_vm4, %vm3789_vm3 }
0x20cf   :  { %v3785_v6 = vsub.f32 1.0, %v3784_v38 }
0x20d0   :  { %4712 = vrcp.f32 %v3782_v28  ;;  %v3809_v30 = vand.u32 2147483648, %v3782_v28  ;;  %vm3803_vm0 = vweird.f32 %v3782_v28  ;;  %v3807_v46 = vand.u32 2147483647, %v3782_v28 }
0x20d1   :  { %v3786_v52 = vmul.f32 %v4709_v60, %v3785_v6 }
0x20d2   :  { %v3810_v40 = vor.u32 1.1754944e-38, %v3809_v30  ;;  %vm3808_vm11 = vcmp.eq.f32.partialorder %v3807_v46, 8.507059e+37 }
0x20d3   :  { %v3787_v20 = vadd.f32 %v4709_v60, %v3786_v52 }
0x20d5   :  { %v3791_v48 = vsel %vm3790_vm5, %v4709_v60, %v3787_v20 }
0x20d6   :  { %v3796_v31 = vsel %vm3793_vm12, %v3795_v55, %v3791_v48  ;;  %v4713_v56 = vpop.eup %4712 }
0x20d7   :  { %v3799_v9 = vmul.f32 %v4713_v56, %v3782_v28  ;;  %vm3804_vm14 = vweird.f32 %v4713_v56  ;;  %v3821_v54 = vmul.f32 %v3817_v57, %v3796_v31 }
0x20d8   :  { %vm3805_vm15 = vmor %vm3803_vm0, %vm3804_vm14  ;;  %vm7252_vm14 = vcmask 1044480  }
0x20d9   :  { %v3800_v8 = vsub.f32 1.0, %v3799_v9  ;;  %vm7253_vm0 = vmmov %vm7252_vm14 }
0x20db   :  { %v3801_v18 = vmul.f32 %v4713_v56, %v3800_v8 }
0x20dd   :  { %v3802_v15 = vadd.f32 %v4713_v56, %v3801_v18 }
0x20df   :  { %v3806_v1 = vsel %vm3805_vm15, %v4713_v56, %v3802_v15 }
0x20e0   :  { %v3811_v62 = vsel %vm3808_vm11, %v3810_v40, %v3806_v1 }
0x20e1   :  { %v3822_v35 = vmul.f32 %v3818_v37, %v3811_v62 }
0x211c   :  { %v3826_v39 = vpop.permute.xlu2 %3825 }
0x211d   :  { %v3831_v45 = vmul.f32 %v3826_v39, %v3796_v31 }
0x211f   :  { %3835 = vrot.lane.b32.xlu0 %v3831_v45, %s4875_s0 }
0x2135   :  { %v3828_v47 = vpop.permute.xlu1 %3827 }
0x2136   :  { %v3832_v51 = vmul.f32 %v3828_v47, %v3811_v62 }
0x2138   :  { %3837 = vrot.lane.b32.xlu2 %v3832_v51, %s4875_s0 }
0x2191   :  { %v3836_v3 = vpop.permute.xlu0 %3835 }
0x2192   :  { %v3838_v34 = vpop.permute.xlu2 %3837  ;;  %v6980_v21 = vadd.f32 %v3836_v3, %v3821_v54 }
0x2193   :  { %v6982_v61 = vadd.f32 %v3838_v34, %v3822_v35 }
0x2194   :  { %4714 = vtanh.f32 %v6980_v21  ;;  %v3933_v1 = vrot.slane %v6980_v21, 7 }
0x2195   :  { %4716 = vtanh.f32 %v6982_v61  ;;  %v3934_v57 = vrot.slane %v6982_v61, 7 }
0x219a   :  { %v4715_v0 = vpop.eup %4714 }
0x219b   :  { %v4717_v5 = vpop.eup %4716  ;;  %3847 = vrot.lane.b32.xlu1 %v4715_v0, %s4875_s0 }
0x219c   :  { %3849 = vrot.lane.b32.xlu0 %v4717_v5, %s4875_s0 }
0x220d   :  { %v3848_v63 = vpop.permute.xlu1 %3847 }
0x220e   :  { %v3850_v26 = vpop.permute.xlu0 %3849  ;;  %v3853_v17 = vmul.f32 %v3848_v63, %v3796_v31 }
0x220f   :  { %v3854_v32 = vmul.f32 %v3850_v26, %v3811_v62 }
0x2210   :  { %v3857_v44 = vrot.slane %v3853_v17, 4  ;;  %v6990_v7 = vsel %vm7250_vm7, %v6963_v22, %v3853_v17 }
0x2211   :  { %v3858_v59 = vrot.slane %v3854_v32, 3  ;;  %v6994_v42 = vsel %vm7251_vm6, %v6967_v13, %v3854_v32 }
0x2213   :  { %v3859_v14 = vsel %vm375_vm9, %v3858_v59, %v3857_v44 }
0x2214   :  { %3860 = vrot.lane.b32.xlu2 %v3859_v14, %s4876_s4 }
0x226e   :  { %v3861_v12 = vpop.permute.xlu2 %3860 }
0x226f   :  { %4320 = vmatmul.msk.f32.vlgmr.msrb.gmra.mxu2 %vm268_vm10, %v3861_v12 }
0x22f2   :  { %v3881_v10 = vpop.f32.mrf.mxu2 }
0x22f3   :  { %v3885_v36 = vrot.slane %v3881_v10, 3  ;;  %v3886_v49 = vrot.slane %v3881_v10, 4 }
0x22f5   :  { %v3889_v16 = vadd.f32 %v3885_v36, %v6865_v50  ;;  %v3890_v22 = vadd.f32 %v3886_v49, %v6862_v2 }
0x22f7   :  { %4718 = vtanh.f32 %v3889_v16  ;;  %v4321_v13 = vmul.f32 -1.442695, %v3889_v16  ;;  %v4322_v4 = vmul.f32 -1.442695, %v3890_v22 }
0x22f8   :  { %4720 = vtanh.f32 %v3890_v22 }
0x22f9   :  { %4722 = vpow2.f32 %v4321_v13 }
0x22fa   :  { %4724 = vpow2.f32 %v4322_v4 }
0x22fd   :  { %v4719_v11 = vpop.eup %4718 }
0x22fe   :  { %v4721_v23 = vpop.eup %4720  ;;  %3941 = vrot.lane.b32.xlu1 %v4719_v11, %s4875_s0 }
0x22ff   :  { %3943 = vrot.lane.b32.xlu0 %v4721_v23, %s4875_s0  ;;  %v4723_v19 = vpop.eup %4722 }
0x2300   :  { %v4725_v24 = vpop.eup %4724  ;;  %v3897_v25 = vadd.f32 1.0, %v4723_v19 }
0x2301   :  { %v3898_v58 = vadd.f32 1.0, %v4725_v24 }
0x2302   :  { %4726 = vrcp.f32 %v3897_v25  ;;  %v3910_v53 = vand.u32 2147483648, %v3897_v25  ;;  %vm3904_vm1 = vweird.f32 %v3897_v25  ;;  %v3908_v48 = vand.u32 2147483647, %v3897_v25 }
0x2303   :  { %4728 = vrcp.f32 %v3898_v58  ;;  %v3925_v43 = vand.u32 2147483648, %v3898_v58  ;;  %vm3919_vm2 = vweird.f32 %v3898_v58  ;;  %v3923_v55 = vand.u32 2147483647, %v3898_v58 }
0x2304   :  { %v3911_v45 = vor.u32 1.1754944e-38, %v3910_v53  ;;  %vm3909_vm5 = vcmp.eq.f32.partialorder %v3908_v48, 8.507059e+37 }
0x2305   :  { %v3926_v56 = vor.u32 1.1754944e-38, %v3925_v43  ;;  %vm3924_vm12 = vcmp.eq.f32.partialorder %v3923_v55, 8.507059e+37 }
0x2308   :  { %v4727_v27 = vpop.eup %4726 }
0x2309   :  { %v4729_v29 = vpop.eup %4728  ;;  %v3900_v60 = vmul.f32 %v4727_v27, %v3897_v25  ;;  %vm3905_vm8 = vweird.f32 %v4727_v27 }
0x230a   :  { %v3915_v33 = vmul.f32 %v4729_v29, %v3898_v58  ;;  %vm3920_vm13 = vweird.f32 %v4729_v29  ;;  %vm3906_vm3 = vmor %vm3904_vm1, %vm3905_vm8 }
0x230b   :  { %v3901_v38 = vsub.f32 1.0, %v3900_v60  ;;  %vm3921_vm4 = vmor %vm3919_vm2, %vm3920_vm13 }
0x230c   :  { %v3916_v6 = vsub.f32 1.0, %v3915_v33 }
0x230d   :  { %v3902_v52 = vmul.f32 %v4727_v27, %v3901_v38 }
0x230e   :  { %v3917_v41 = vmul.f32 %v4729_v29, %v3916_v6 }
0x230f   :  { %v3903_v28 = vadd.f32 %v4727_v27, %v3902_v52 }
0x2310   :  { %v3918_v20 = vadd.f32 %v4729_v29, %v3917_v41 }
0x2311   :  { %v3907_v39 = vsel %vm3906_vm3, %v4727_v27, %v3903_v28  ;;  %vm7254_vm3 = vcmask 1045504  }
0x2312   :  { %v3922_v31 = vsel %vm3921_vm4, %v4729_v29, %v3918_v20  ;;  %v3912_v8 = vsel %vm3909_vm5, %v3911_v45, %v3907_v39  ;;  %vm7255_vm4 = vmmov %vm7254_vm3 }
0x2313   :  { %v3927_v15 = vsel %vm3924_vm12, %v3926_v56, %v3922_v31  ;;  %v3937_v40 = vmul.f32 %v3933_v1, %v3912_v8 }
0x2314   :  { %v3938_v37 = vmul.f32 %v3934_v57, %v3927_v15 }
0x2370   :  { %v3942_v9 = vpop.permute.xlu1 %3941 }
0x2371   :  { %v3944_v18 = vpop.permute.xlu0 %3943  ;;  %v3947_v30 = vmul.f32 %v3942_v9, %v3912_v8 }
0x2372   :  { %v3948_v46 = vmul.f32 %v3944_v18, %v3927_v15 }
0x2373   :  { %3951 = vrot.lane.b32.xlu2 %v3947_v30, %s4875_s0 }
0x2374   :  { %3953 = vrot.lane.b32.xlu1 %v3948_v46, %s4875_s0 }
0x23cd   :  { %v3952_v47 = vpop.permute.xlu2 %3951 }
0x23ce   :  { %v7006_v62 = vadd.f32 %v3952_v47, %v3937_v40 }
0x23d0   :  { %4730 = vtanh.f32 %v7006_v62  ;;  %v4049_v1 = vrot.slane %v7006_v62, 7 }
0x23d6   :  { %v4731_v51 = vpop.eup %4730 }
0x23d7   :  { %3963 = vrot.lane.b32.xlu0 %v4731_v51, %s4875_s0 }
0x23e6   :  { %v3954_v54 = vpop.permute.xlu1 %3953 }
0x23e7   :  { %v7011_v35 = vadd.f32 %v3954_v54, %v3938_v37 }
0x23e9   :  { %4732 = vtanh.f32 %v7011_v35 }
0x23ef   :  { %v4733_v3 = vpop.eup %4732 }
0x23f0   :  { %3965 = vrot.lane.b32.xlu2 %v4733_v3, %s4875_s0 }
0x2449   :  { %v3964_v34 = vpop.permute.xlu0 %3963 }
0x244a   :  { %v3966_v21 = vpop.permute.xlu2 %3965  ;;  %v3969_v0 = vmul.f32 %v3964_v34, %v3912_v8  ;;  %v4050_v8 = vrot.slane %v7011_v35, 7 }
0x244b   :  { %v3970_v5 = vmul.f32 %v3966_v21, %v3927_v15 }
0x244c   :  { %v3973_v63 = vrot.slane %v3969_v0, 5  ;;  %v7017_v26 = vsel %vm7252_vm14, %v6990_v7, %v3969_v0 }
0x244d   :  { %v3974_v17 = vrot.slane %v3970_v5, 4  ;;  %v7021_v61 = vsel %vm7253_vm0, %v6994_v42, %v3970_v5 }
0x244f   :  { %v3975_v32 = vsel %vm375_vm9, %v3974_v17, %v3973_v63 }
0x2450   :  { %3976 = vrot.lane.b32.xlu1 %v3975_v32, %s4876_s4 }
0x24c2   :  { %v3977_v44 = vpop.permute.xlu1 %3976 }
0x24c3   :  { %4323 = vmatmul.msk.f32.vlgmr.msra.gmra.mxu3 %vm268_vm10, %v3977_v44 }
0x2546   :  { %v3997_v59 = vpop.f32.mrf.mxu3 }
0x2547   :  { %v4001_v14 = vrot.slane %v3997_v59, 2  ;;  %v4002_v12 = vrot.slane %v3997_v59, 3 }
0x2549   :  { %v4005_v10 = vadd.f32 %v4001_v14, %v6865_v50  ;;  %v4006_v7 = vadd.f32 %v4002_v12, %v6862_v2 }
0x254b   :  { %4734 = vtanh.f32 %v4005_v10  ;;  %v4325_v42 = vmul.f32 -1.442695, %v4006_v7  ;;  %v4324_v23 = vmul.f32 -1.442695, %v4005_v10 }
0x254c   :  { %4736 = vtanh.f32 %v4006_v7 }
0x254d   :  { %4738 = vpow2.f32 %v4325_v42 }
0x2551   :  { %v4735_v36 = vpop.eup %4734 }
0x2552   :  { %v4737_v49 = vpop.eup %4736  ;;  %4057 = vrot.lane.b32.xlu0 %v4735_v36, %s4875_s0 }
0x2553   :  { %4059 = vrot.lane.b32.xlu2 %v4737_v49, %s4875_s0  ;;  %v4739_v16 = vpop.eup %4738 }
0x2554   :  { %v4014_v22 = vadd.f32 1.0, %v4739_v16 }
0x2556   :  { %4740 = vrcp.f32 %v4014_v22  ;;  %v4041_v27 = vand.u32 2147483648, %v4014_v22  ;;  %vm4035_vm11 = vweird.f32 %v4014_v22  ;;  %v4039_v29 = vand.u32 2147483647, %v4014_v22 }
0x2557   :  { %4742 = vpow2.f32 %v4324_v23 }
0x2558   :  { %v4042_v33 = vor.u32 1.1754944e-38, %v4041_v27  ;;  %vm4040_vm6 = vcmp.eq.f32.partialorder %v4039_v29, 8.507059e+37 }
0x255c   :  { %v4741_v11 = vpop.eup %4740 }
0x255d   :  { %v4031_v13 = vmul.f32 %v4741_v11, %v4014_v22  ;;  %v4743_v19 = vpop.eup %4742  ;;  %vm4036_vm15 = vweird.f32 %v4741_v11 }
0x255e   :  { %v4013_v25 = vadd.f32 1.0, %v4743_v19  ;;  %vm4037_vm7 = vmor %vm4035_vm11, %vm4036_vm15 }
0x255f   :  { %v4032_v4 = vsub.f32 1.0, %v4031_v13 }
0x2560   :  { %4744 = vrcp.f32 %v4013_v25  ;;  %v4026_v48 = vand.u32 2147483648, %v4013_v25  ;;  %vm4020_vm13 = vweird.f32 %v4013_v25  ;;  %v4024_v55 = vand.u32 2147483647, %v4013_v25 }
0x2561   :  { %v4033_v24 = vmul.f32 %v4741_v11, %v4032_v4 }
0x2562   :  { %v4027_v31 = vor.u32 1.1754944e-38, %v4026_v48  ;;  %vm4025_vm2 = vcmp.eq.f32.partialorder %v4024_v55, 8.507059e+37 }
0x2563   :  { %v4034_v58 = vadd.f32 %v4741_v11, %v4033_v24 }
0x2565   :  { %v4038_v60 = vsel %vm4037_vm7, %v4741_v11, %v4034_v58 }
0x2566   :  { %v4043_v6 = vsel %vm4040_vm6, %v4042_v33, %v4038_v60  ;;  %v4745_v52 = vpop.eup %4744  ;;  %vm7256_vm6 = vcmask 1046528  }
0x2567   :  { %v4016_v28 = vmul.f32 %v4745_v52, %v4013_v25  ;;  %vm4021_vm8 = vweird.f32 %v4745_v52  ;;  %v4054_v18 = vmul.f32 %v4050_v8, %v4043_v6 }
0x2568   :  { %vm4022_vm1 = vmor %vm4020_vm13, %vm4021_vm8 }
0x2569   :  { %v4017_v20 = vsub.f32 1.0, %v4016_v28  ;;  %vm7257_vm8 = vmmov %vm7256_vm6 }
0x256b   :  { %v4018_v53 = vmul.f32 %v4745_v52, %v4017_v20 }
0x256d   :  { %v4019_v43 = vadd.f32 %v4745_v52, %v4018_v53 }
0x256f   :  { %v4023_v39 = vsel %vm4022_vm1, %v4745_v52, %v4019_v43 }
0x2570   :  { %v4028_v56 = vsel %vm4025_vm2, %v4027_v31, %v4023_v39 }
0x2571   :  { %v4053_v40 = vmul.f32 %v4049_v1, %v4028_v56 }
0x25ad   :  { %v4060_v38 = vpop.permute.xlu2 %4059 }
0x25ae   :  { %v4064_v41 = vmul.f32 %v4060_v38, %v4043_v6 }
0x25b0   :  { %4069 = vrot.lane.b32.xlu0 %v4064_v41, %s4875_s0 }
0x25c4   :  { %v4058_v45 = vpop.permute.xlu0 %4057 }
0x25c5   :  { %v4063_v9 = vmul.f32 %v4058_v45, %v4028_v56 }
0x25c7   :  { %4067 = vrot.lane.b32.xlu1 %v4063_v9, %s4875_s0 }
0x2622   :  { %v4070_v15 = vpop.permute.xlu0 %4069 }
0x2623   :  { %v7033_v30 = vadd.f32 %v4070_v15, %v4054_v18 }
0x2625   :  { %4746 = vtanh.f32 %v7033_v30  ;;  %v4166_v55 = vrot.slane %v7033_v30, 7 }
0x262b   :  { %v4747_v46 = vpop.eup %4746 }
0x262c   :  { %4081 = vrot.lane.b32.xlu1 %v4747_v46, %s4875_s0 }
0x2639   :  { %v4068_v47 = vpop.permute.xlu1 %4067 }
0x263a   :  { %v7038_v51 = vadd.f32 %v4068_v47, %v4053_v40 }
0x263c   :  { %4748 = vtanh.f32 %v7038_v51  ;;  %v4165_v48 = vrot.slane %v7038_v51, 7 }
0x2642   :  { %v4749_v57 = vpop.eup %4748 }
0x2643   :  { %4079 = vrot.lane.b32.xlu2 %v4749_v57, %s4875_s0 }
0x269d   :  { %v4080_v37 = vpop.permute.xlu2 %4079 }
0x269e   :  { %v4082_v54 = vpop.permute.xlu1 %4081  ;;  %v4085_v35 = vmul.f32 %v4080_v37, %v4028_v56 }
0x269f   :  { %v4086_v3 = vmul.f32 %v4082_v54, %v4043_v6 }
0x26a0   :  { %v4089_v34 = vrot.slane %v4085_v35, 6  ;;  %v7044_v21 = vsel %vm7254_vm3, %v7017_v26, %v4085_v35 }
0x26a1   :  { %v4090_v0 = vrot.slane %v4086_v3, 5  ;;  %v7048_v62 = vsel %vm7255_vm4, %v7021_v61, %v4086_v3 }
0x26a3   :  { %v4091_v5 = vsel %vm375_vm9, %v4090_v0, %v4089_v34 }
0x26a4   :  { %4092 = vrot.lane.b32.xlu0 %v4091_v5, %s4876_s4 }
0x2716   :  { %v4093_v63 = vpop.permute.xlu0 %4092 }
0x2717   :  { %4326 = vmatmul.msk.f32.vlgmr.msrb.gmra.mxu0 %vm268_vm10, %v4093_v63 }
0x2794   :  { %v4113_v17 = vpop.f32.mrf.mxu0 }
0x2795   :  { %v4117_v32 = vrot.slane %v4113_v17, 1  ;;  %v4118_v44 = vrot.slane %v4113_v17, 2 }
0x2797   :  { %v4121_v59 = vadd.f32 %v4117_v32, %v6865_v50  ;;  %v4122_v26 = vadd.f32 %v4118_v44, %v6862_v2 }
0x2799   :  { %4750 = vtanh.f32 %v4121_v59  ;;  %v4327_v61 = vmul.f32 -1.442695, %v4121_v59  ;;  %v4328_v49 = vmul.f32 -1.442695, %v4122_v26 }
0x279a   :  { %4752 = vtanh.f32 %v4122_v26 }
0x279b   :  { %4754 = vpow2.f32 %v4327_v61 }
0x279f   :  { %v4751_v14 = vpop.eup %4750 }
0x27a0   :  { %v4753_v12 = vpop.eup %4752  ;;  %4173 = vrot.lane.b32.xlu2 %v4751_v14, %s4875_s0 }
0x27a1   :  { %4175 = vrot.lane.b32.xlu1 %v4753_v12, %s4875_s0  ;;  %v4755_v10 = vpop.eup %4754 }
0x27a2   :  { %v4129_v7 = vadd.f32 1.0, %v4755_v10 }
0x27a4   :  { %4756 = vrcp.f32 %v4129_v7  ;;  %v4142_v23 = vand.u32 2147483648, %v4129_v7  ;;  %vm4136_vm5 = vweird.f32 %v4129_v7  ;;  %v4140_v13 = vand.u32 2147483647, %v4129_v7 }
0x27a5   :  { %4758 = vpow2.f32 %v4328_v49 }
0x27a6   :  { %v4143_v19 = vor.u32 1.1754944e-38, %v4142_v23  ;;  %vm4141_vm14 = vcmp.eq.f32.partialorder %v4140_v13, 8.507059e+37 }
0x27aa   :  { %v4757_v36 = vpop.eup %4756 }
0x27ab   :  { %v4132_v42 = vmul.f32 %v4757_v36, %v4129_v7  ;;  %v4759_v2 = vpop.eup %4758  ;;  %vm4137_vm9 = vweird.f32 %v4757_v36 }
0x27ac   :  { %v4130_v22 = vadd.f32 1.0, %v4759_v2  ;;  %vm4138_vm12 = vmor %vm4136_vm5, %vm4137_vm9 }
0x27ad   :  { %v4133_v50 = vsub.f32 1.0, %v4132_v42 }
0x27ae   :  { %4760 = vrcp.f32 %v4130_v22  ;;  %v4157_v6 = vand.u32 2147483648, %v4130_v22  ;;  %vm4151_vm15 = vweird.f32 %v4130_v22  ;;  %v4155_v52 = vand.u32 2147483647, %v4130_v22 }
0x27af   :  { %v4134_v16 = vmul.f32 %v4757_v36, %v4133_v50 }
0x27b0   :  { %v4158_v28 = vor.u32 1.1754944e-38, %v4157_v6  ;;  %vm4156_vm7 = vcmp.eq.f32.partialorder %v4155_v52, 8.507059e+37 }
0x27b1   :  { %v4135_v11 = vadd.f32 %v4757_v36, %v4134_v16 }
0x27b3   :  { %v4139_v4 = vsel %vm4138_vm12, %v4757_v36, %v4135_v11 }
0x27b4   :  { %v4144_v25 = vsel %vm4141_vm14, %v4143_v19, %v4139_v4  ;;  %v4761_v27 = vpop.eup %4760 }
0x27b5   :  { %v4147_v29 = vmul.f32 %v4761_v27, %v4130_v22  ;;  %vm4152_vm0 = vweird.f32 %v4761_v27  ;;  %v4169_v39 = vmul.f32 %v4165_v48, %v4144_v25 }
0x27b6   :  { %vm4153_vm11 = vmor %vm4151_vm15, %vm4152_vm0 }
0x27b7   :  { %v4148_v60 = vsub.f32 1.0, %v4147_v29 }
0x27b9   :  { %v4149_v33 = vmul.f32 %v4761_v27, %v4148_v60 }
0x27bb   :  { %v4150_v38 = vadd.f32 %v4761_v27, %v4149_v33 }
0x27bd   :  { %v4154_v41 = vsel %vm4153_vm11, %v4761_v27, %v4150_v38 }
0x27be   :  { %v4159_v53 = vsel %vm4156_vm7, %v4158_v28, %v4154_v41 }
0x27bf   :  { %v4170_v31 = vmul.f32 %v4166_v55, %v4159_v53 }
0x27fa   :  { %v4174_v24 = vpop.permute.xlu2 %4173 }
0x27fb   :  { %v4179_v58 = vmul.f32 %v4174_v24, %v4144_v25 }
0x27fd   :  { %4183 = vrot.lane.b32.xlu0 %v4179_v58, %s4875_s0 }
0x2813   :  { %v4176_v20 = vpop.permute.xlu1 %4175 }
0x2814   :  { %v4180_v43 = vmul.f32 %v4176_v20, %v4159_v53 }
0x2816   :  { %4185 = vrot.lane.b32.xlu2 %v4180_v43, %s4875_s0 }
0x286f   :  { %v4184_v45 = vpop.permute.xlu0 %4183 }
0x2870   :  { %v4186_v56 = vpop.permute.xlu2 %4185  ;;  %v4189_v9 = vadd.f32 %v4184_v45, %v4169_v39 }
0x2871   :  { %v4190_v8 = vadd.f32 %v4186_v56, %v4170_v31 }
0x2872   :  { %4762 = vtanh.f32 %v4189_v9 }
0x2873   :  { %4764 = vtanh.f32 %v4190_v8 }
0x2878   :  { %v4763_v18 = vpop.eup %4762 }
0x2879   :  { %v4765_v15 = vpop.eup %4764  ;;  %4195 = vrot.lane.b32.xlu1 %v4763_v18, %s4875_s0 }
0x287a   :  { %4197 = vrot.lane.b32.xlu0 %v4765_v15, %s4875_s0 }
0x28eb   :  { %v4196_v46 = vpop.permute.xlu1 %4195 }
0x28ec   :  { %v4198_v1 = vpop.permute.xlu0 %4197  ;;  %v4201_v40 = vmul.f32 %v4196_v46, %v4144_v25 }
0x28ed   :  { %v4202_v47 = vmul.f32 %v4198_v1, %v4159_v53 }
0x28ee   :  { %v4215_v30 = vsel %vm7256_vm6, %v7044_v21, %v4201_v40 }
0x28ef   :  { %v4216_v51 = vsel %vm7257_vm8, %v7048_v62, %v4202_v47  ;;  %4219 = vrot.lane.b32.xlu2 %v4215_v30, %s4876_s4 }
0x28f0   :  { %4221 = vrot.lane.b32.xlu1 %v4216_v51, %s4876_s4 }
0x2949   :  { %v4220_v57 = vpop.permute.xlu2 %4219 }
0x294a   :  { %4225 = vst.msk [vmem:[#allocation4] sm:$0xff] %vm268_vm10, %v4220_v57 }
0x2962   :  { %v4222_v37 = vpop.permute.xlu1 %4221 }
0x2963   :  { %4226 = vst.msk [vmem:[#allocation4 + $0x8] sm:$0xff] %vm268_vm10, %v4222_v37 }
0x2964   :  { %4239 = dma.vmem_to_hbm [thread:$0]  %s4232_s12, 256, %s4234_s14, [#allocation5], %s4879_s15, %s4879_s15, %s4880_s16  }
0x2965   :  { %4872 = dma.done.wait [#allocation5], 256  }
0x2966   :  { %4873 = vsyncadd [#allocation5], 4294967040 }
0x2967   :  { %4244 = vsyncpa [#allocation5], 1 }
0x2968   :  { %4245 = vsyncmov [#allocation3] }
0x296b   :  { %s4246_s4 = vpop.sfrf %4245 }
0x296c   :  { %p4329_p0 = scmp.ne.s32.totalorder %s4246_s4, 0 }
0x296e   :  { %4250 = shalt.err (%p4329_p0)  }

</bundles_post_ra>
